<compile_context>
chip_gen: v5e
topology: v5e:2x2
jax: 0.10.0
libtpu: 0.0.40
codegen_flags: <defaults>
</compile_context>

<pallas_src>
from functools import partial

import jax
import jax.numpy as jnp
import numpy as np
from jax.experimental import pallas as pl
from jax.experimental.pallas import tpu as pltpu


# ----------------------------------------------------------------------------
# In-kernel helpers
# ----------------------------------------------------------------------------
def _layernorm(v, g, b, eps=1e-5):
    # f32 on purpose (v5e VPU has no bf16); rsqrt goes to the EUP.
    mu = jnp.mean(v, axis=-1, keepdims=True)
    var = jnp.mean((v - mu) ** 2, axis=-1, keepdims=True)
    return (v - mu) * jax.lax.rsqrt(var + eps) * g + b


def _gelu_tanh(x):
    # tanh-approx GELU: transcendental runs on the EUP (separate VLIW slot).
    c = 0.7978845608028654  # sqrt(2/pi)
    return 0.5 * x * (1.0 + jnp.tanh(c * (x + 0.044715 * x * x * x)))


# ----------------------------------------------------------------------------
# Fused Block kernel (one batch-block per grid step)
# ----------------------------------------------------------------------------
def block_kernel(
    x_ref,                    # (Bb, L, C)  f32
    wqkv_ref,                 # (C, 3C)     bf16 (softmax scale folded into q cols)
    wproj_ref,                # (C, C)      bf16
    wfc1_ref,                 # (C, H)      bf16
    wfc2_ref,                 # (H, C)      bf16
    rot_ref,                  # (C, C)      bf16 block-diag rotate-half (+/-1)
    cs_ref,                   # (2, L, C)   f32  (head-tiled cos / sin)
    hmask_ref,                # (nH, C)     f32  per-head column mask
    consts_ref,               # (8, W)      f32  packed ln gains/biases + linear biases
    o_ref,                    # (Bb, L, C)  f32
    *, num_heads, hidden,
):
    Bb, L, C = x_ref.shape
    M = Bb * L
    H = hidden

    # ---- unpack small constants (static slices of one packed slab) ----
    cst = consts_ref[...]
    ln1g, ln1b = cst[0:1, :C], cst[1:2, :C]
    bqkv = cst[2:3, :3 * C]
    bproj = cst[3:4, :C]
    ln2g, ln2b = cst[4:5, :C], cst[5:6, :C]
    bfc1 = cst[6:7, :H]
    bfc2 = cst[7:8, :C]

    # ---- attention branch: x + proj(softmax(rope(q) rope(k)^T) v) ----
    xf = x_ref[...].reshape(M, C)                      # fold batch rows -> M = Bb*L
    xn = _layernorm(xf, ln1g, ln1b)
    qkv = jnp.dot(xn.astype(jnp.bfloat16), wqkv_ref[...],
                  preferred_element_type=jnp.float32) + bqkv          # (M, 3C) f32

    cos = cs_ref[0]                                    # (L, C)
    sin = cs_ref[1]
    rot = rot_ref[...]

    def rope3(t):
        # rotate-half for ALL heads at once: one (M,C)@(C,C) MXU matmul with a
        # block-diagonal +/-1 matrix + head-tiled cos/sin.  Returns (Bb, L, C).
        t_rot = jnp.dot(t.astype(jnp.bfloat16), rot,
                        preferred_element_type=jnp.float32)
        return (t.reshape(Bb, L, C) * cos[None]
                + t_rot.reshape(Bb, L, C) * sin[None])

    q3 = rope3(qkv[:, :C])                             # scale already folded in
    k3 = rope3(qkv[:, C:2 * C])
    v3 = qkv[:, 2 * C:].reshape(Bb, L, C)

    # Stack heads along rows via the per-head column mask:
    # q_st[b, h*L + l, :] = q3[b, l, :] * mask_h  ->  QK^T contracts the full C.
    hm = hmask_ref[...]                                # (nH, C)
    q_st = (q3[:, None, :, :] * hm[None, :, None, :]).reshape(Bb, num_heads * L, C)

    s = jnp.einsum('bmc,blc->bml',
                   q_st.astype(jnp.bfloat16), k3.astype(jnp.bfloat16),
                   preferred_element_type=jnp.float32)                # (Bb, nH*L, L)

    # one softmax pass over the whole logits slab
    s = s - jnp.max(s, axis=-1, keepdims=True)
    p = jnp.exp(s)
    p = p * pl.reciprocal(jnp.sum(p, axis=-1, keepdims=True), approx=True)

    o_st = jnp.einsum('bml,blc->bmc',
                      p.astype(jnp.bfloat16), v3.astype(jnp.bfloat16),
                      preferred_element_type=jnp.float32)             # (Bb, nH*L, C)

    # select each head's own columns and sum over heads -> head-concatenated (Bb,L,C)
    attn = jnp.sum(o_st.reshape(Bb, num_heads, L, C) * hm[None, :, None, :], axis=1)

    proj = jnp.dot(attn.reshape(M, C).astype(jnp.bfloat16), wproj_ref[...],
                   preferred_element_type=jnp.float32) + bproj
    x1 = xf + proj

    # ---- MLP branch: x1 + fc2(gelu(fc1(norm2(x1)))) ----
    xn2 = _layernorm(x1, ln2g, ln2b)
    h1 = jnp.dot(xn2.astype(jnp.bfloat16), wfc1_ref[...],
                 preferred_element_type=jnp.float32) + bfc1
    h1 = _gelu_tanh(h1)
    y = jnp.dot(h1.astype(jnp.bfloat16), wfc2_ref[...],
                preferred_element_type=jnp.float32) + bfc2

    o_ref[...] = (x1 + y).reshape(Bb, L, C).astype(o_ref.dtype)


# ----------------------------------------------------------------------------
# One-time parameter preparation (hoisted out of the per-call path)
# ----------------------------------------------------------------------------
def prepare_block_params(params, cos, sin, num_heads):
    (ln1g, ln1b, wqkv_t, bqkv, wproj_t, bproj,
     ln2g, ln2b, wfc1_t, bfc1, wfc2_t, bfc2) = params
    C = wqkv_t.shape[0]
    H = wfc1_t.shape[1]
    d = C // num_heads
    scale = d ** (-0.5)

    # Fold the softmax scale into the q-columns of wqkv / bqkv (RoPE is linear).
    col_scale = np.concatenate([np.full((C,), scale, np.float32),
                                np.ones((2 * C,), np.float32)])
    wqkv_s = np.asarray(wqkv_t, np.float32) * col_scale[None, :]
    bqkv_s = np.asarray(bqkv, np.float32).reshape(-1) * col_scale

    # bf16 matmul operands (f32 accumulation happens in-kernel on the MXU).
    wqkv_bf = jnp.asarray(wqkv_s, dtype=jnp.bfloat16)                 # (C, 3C)
    wproj_bf = jnp.asarray(np.asarray(wproj_t), dtype=jnp.bfloat16)   # (C, C)
    wfc1_bf = jnp.asarray(np.asarray(wfc1_t), dtype=jnp.bfloat16)     # (C, H)
    wfc2_bf = jnp.asarray(np.asarray(wfc2_t), dtype=jnp.bfloat16)     # (H, C)

    # Block-diagonal +/-1 rotate-half matrix (applied on the MXU in-kernel).
    half = d // 2
    r = np.zeros((d, d), np.float32)
    r[np.arange(half) + half, np.arange(half)] = -1.0     # -t2 -> 1st half
    r[np.arange(half), np.arange(half) + half] = 1.0      #  t1 -> 2nd half
    rot = jnp.asarray(np.kron(np.eye(num_heads, dtype=np.float32), r),
                      dtype=jnp.bfloat16)                             # (C, C)

    # RoPE tables tiled per head, packed as one (2, L, C) array.
    cos_full = np.tile(np.asarray(cos, np.float32), (1, num_heads))
    sin_full = np.tile(np.asarray(sin, np.float32), (1, num_heads))
    cs = jnp.asarray(np.stack([cos_full, sin_full]), dtype=jnp.float32)

    # Per-head column mask (nH, C).
    hmask = np.zeros((num_heads, C), np.float32)
    for h in range(num_heads):
        hmask[h, h * d:(h + 1) * d] = 1.0
    hmask = jnp.asarray(hmask)

    # Pack the 8 small gain/bias vectors into one (8, W) f32 slab.
    W = max(3 * C, H)

    def row(v):
        v = np.asarray(v, np.float32).reshape(-1)
        out = np.zeros((W,), np.float32)
        out[:v.shape[0]] = v
        return out

    consts = jnp.asarray(np.stack([
        row(ln1g), row(ln1b), row(bqkv_s), row(bproj),
        row(ln2g), row(ln2b), row(bfc1), row(bfc2)]), dtype=jnp.float32)

    prepared = (wqkv_bf, wproj_bf, wfc1_bf, wfc2_bf, rot, cs, hmask, consts)
    return prepared, H


def _pick_batch_block(B, L, min_grid_steps=1, target_rows=128):
    # Fold enough batch rows per step to make the matmul M-dim >= target_rows,
    # but keep at least `min_grid_steps` grid steps (set 2 on v7x: 2 TCs/chip).
    bb = min(B, max(1, -(-target_rows // L)))
    bb = min(bb, max(1, B // max(1, min_grid_steps)))
    while B % bb:
        bb -= 1
    return bb


# ----------------------------------------------------------------------------
# Wrapper
# ----------------------------------------------------------------------------
def block_forward(x, prepared, num_heads, hidden_dim, min_grid_steps=1):
    B, L, C = x.shape
    bb = _pick_batch_block(B, L, min_grid_steps)
    grid = (B // bb,)

    kernel = partial(block_kernel, num_heads=num_heads, hidden=hidden_dim)

    in_specs = [pl.BlockSpec((bb, L, C), lambda g: (g, 0, 0))]
    for p in prepared:
        # Grid-invariant inputs: full-array blocks, same block every step.
        # (At production sizes: pipeline_mode=pl.Buffered(1) + explicit
        # vmem_limit_bytes to fit v7x's 64 MiB VMEM; moot at grid=(1,).)
        in_specs.append(pl.BlockSpec(p.shape, lambda g, nd=p.ndim: (0,) * nd))

    out_spec = pl.BlockSpec((bb, L, C), lambda g: (g, 0, 0))

    return pl.pallas_call(
        kernel,
        out_shape=jax.ShapeDtypeStruct((B, L, C), x.dtype),
        grid=grid,
        in_specs=in_specs,
        out_specs=out_spec,
        compiler_params=pltpu.CompilerParams(
            # "parallel": lets v7x shard the batch loop over both TensorCores;
            # neutral on single-TC v5e/v6e (where grid=(1,) is used).
            dimension_semantics=("parallel",)),
    )(x, *prepared)


# ----------------------------------------------------------------------------
# Pure-JAX f32 reference (mirrors the PyTorch forward exactly) for self-check
# ----------------------------------------------------------------------------
def block_reference(x, params, cos, sin, num_heads):
    (ln1g, ln1b, wqkv_t, bqkv, wproj_t, bproj,
     ln2g, ln2b, wfc1_t, bfc1, wfc2_t, bfc2) = params
    B, L, C = x.shape
    d = C // num_heads

    def ln(v, g, b):
        mu = jnp.mean(v, -1, keepdims=True)
        var = jnp.mean((v - mu) ** 2, -1, keepdims=True)
        return (v - mu) / jnp.sqrt(var + 1e-5) * g + b

    def rope(t):  # t: (B, n, L, d)
        t1, t2 = t[..., : d // 2], t[..., d // 2:]
        rot = jnp.concatenate([-t2, t1], -1)
        return t * cos + rot * sin

    xn = ln(x, ln1g, ln1b)
    qkv = xn @ wqkv_t + bqkv                                    # (B, L, 3C)
    qkv = qkv.reshape(B, L, 3, num_heads, d).transpose(2, 0, 3, 1, 4)
    q, k, v = qkv[0], qkv[1], qkv[2]                            # (B, n, L, d)
    q, k = rope(q), rope(k)
    attn = jax.nn.softmax((d ** -0.5) * jnp.einsum("bnld,bnmd->bnlm", q, k), -1)
    o = jnp.einsum("bnlm,bnmd->bnld", attn, v).transpose(0, 2, 1, 3).reshape(B, L, C)
    x = x + o @ wproj_t + bproj

    xn2 = ln(x, ln2g, ln2b)
    h = jax.nn.gelu(xn2 @ wfc1_t + bfc1, approximate=False)
    return x + h @ wfc2_t + bfc2


# ----------------------------------------------------------------------------
if __name__ == "__main__":
    B, L, C = 2, 64, 32
    num_heads = 4
    mlp_ratio = 1.0
    H = int(C * mlp_ratio)
    d = C // num_heads

    key = jax.random.PRNGKey(0)
    ks = jax.random.split(key, 10)

    x = jax.random.normal(ks[0], (B, L, C), jnp.float32)

    # Deterministic synthetic parameters (shapes per module __init__).
    ln1_g = jnp.ones((1, C), jnp.float32)
    ln1_b = jnp.zeros((1, C), jnp.float32)
    wqkv = 0.1 * jax.random.normal(ks[1], (3 * C, C), jnp.float32)    # nn.Linear(C, 3C)
    bqkv = 0.1 * jax.random.normal(ks[2], (3 * C,), jnp.float32)
    wproj = 0.1 * jax.random.normal(ks[3], (C, C), jnp.float32)       # nn.Linear(C, C)
    bproj = 0.1 * jax.random.normal(ks[4], (C,), jnp.float32)
    ln2_g = jnp.ones((1, C), jnp.float32)
    ln2_b = jnp.zeros((1, C), jnp.float32)
    wfc1 = 0.1 * jax.random.normal(ks[5], (H, C), jnp.float32)        # nn.Linear(C, H)
    bfc1 = 0.1 * jax.random.normal(ks[6], (H,), jnp.float32)
    wfc2 = 0.1 * jax.random.normal(ks[7], (C, H), jnp.float32)        # nn.Linear(H, C)
    bfc2 = 0.1 * jax.random.normal(ks[8], (C,), jnp.float32)

    params = [
        ln1_g, ln1_b,
        wqkv.T, bqkv.reshape(1, -1),
        wproj.T, bproj.reshape(1, -1),
        ln2_g, ln2_b,
        wfc1.T, bfc1.reshape(1, -1),
        wfc2.T, bfc2.reshape(1, -1),
    ]

    # RoPE tables (rotate-half convention); `rope` is external in the reference module,
    # so we fix it here as standard rotary embeddings over head_dim.
    pos = jnp.arange(L, dtype=jnp.float32)
    inv_freq = 1.0 / (10000.0 ** (jnp.arange(0, d, 2, dtype=jnp.float32) / d))
    freqs = pos[:, None] * inv_freq[None, :]          # (L, d/2)
    emb = jnp.concatenate([freqs, freqs], axis=-1)    # (L, d)
    cos = jnp.cos(emb)
    sin = jnp.sin(emb)

    # One-time parameter prep (bf16 casts, scale fold, RoPE/rot tables, packing).
    prepared, hidden_dim = prepare_block_params(params, cos, sin, num_heads)

    out = block_forward(x, prepared, num_heads, hidden_dim)
    out = jax.block_until_ready(out)

    ref = block_reference(x, params, cos, sin, num_heads)
    assert out.shape == (B, L, C)
    # bf16 matmul operands + tanh-GELU + approx reciprocal -> check at bf16-level
    # tolerance against the exact-f32 reference (errors observed ~1e-2).
    assert np.allclose(np.asarray(out), np.asarray(ref), atol=5e-2, rtol=5e-2), (
        "mismatch vs reference: max abs err "
        f"{np.max(np.abs(np.asarray(out) - np.asarray(ref)))}")

    print("KERNEL_OK")
</pallas_src>

<mosaic_0001>
module attributes {stable_mosaic.version = 11 : i64} {
  func.func @block_kernel(%arg0: i32, %arg1: memref<2x64x32xf32, #tpu.memory_space<vmem>>, %arg2: memref<32x96xbf16, #tpu.memory_space<vmem>>, %arg3: memref<32x32xbf16, #tpu.memory_space<vmem>>, %arg4: memref<32x32xbf16, #tpu.memory_space<vmem>>, %arg5: memref<32x32xbf16, #tpu.memory_space<vmem>>, %arg6: memref<32x32xbf16, #tpu.memory_space<vmem>>, %arg7: memref<2x64x32xf32, #tpu.memory_space<vmem>>, %arg8: memref<4x32xf32, #tpu.memory_space<vmem>>, %arg9: memref<8x96xf32, #tpu.memory_space<vmem>>, %arg10: memref<2x64x32xf32, #tpu.memory_space<vmem>>) attributes {dimension_semantics = [#tpu.dimension_semantics<parallel>], iteration_bounds = array<i64: 1>, scalar_prefetch = 0 : i64, scratch_operands = 0 : i64, tpu.core_type = #tpu.core_type<tc>, window_params = [{transform_indices = @transform_0, window_bounds = array<i64: 2, 64, 32>}, {pipeline_mode = #tpu.pipeline_mode<synchronous>, transform_indices = @transform_1, window_bounds = array<i64: 32, 96>}, {pipeline_mode = #tpu.pipeline_mode<synchronous>, transform_indices = @transform_2, window_bounds = array<i64: 32, 32>}, {pipeline_mode = #tpu.pipeline_mode<synchronous>, transform_indices = @transform_3, window_bounds = array<i64: 32, 32>}, {pipeline_mode = #tpu.pipeline_mode<synchronous>, transform_indices = @transform_4, window_bounds = array<i64: 32, 32>}, {pipeline_mode = #tpu.pipeline_mode<synchronous>, transform_indices = @transform_5, window_bounds = array<i64: 32, 32>}, {pipeline_mode = #tpu.pipeline_mode<synchronous>, transform_indices = @transform_6, window_bounds = array<i64: 2, 64, 32>}, {pipeline_mode = #tpu.pipeline_mode<synchronous>, transform_indices = @transform_7, window_bounds = array<i64: 4, 32>}, {pipeline_mode = #tpu.pipeline_mode<synchronous>, transform_indices = @transform_8, window_bounds = array<i64: 8, 96>}, {transform_indices = @transform_9, window_bounds = array<i64: 2, 64, 32>}]} {
    %c0 = arith.constant 0 : index
    %c0_0 = arith.constant 0 : index
    %0 = vector.load %arg9[%c0, %c0_0] : memref<8x96xf32, #tpu.memory_space<vmem>>, vector<8x96xf32>
    %1 = vector.extract_strided_slice %0 {offsets = [0, 0], sizes = [1, 32], strides = [1, 1]} : vector<8x96xf32> to vector<1x32xf32>
    %2 = vector.extract_strided_slice %0 {offsets = [1, 0], sizes = [1, 32], strides = [1, 1]} : vector<8x96xf32> to vector<1x32xf32>
    %3 = vector.extract_strided_slice %0 {offsets = [2, 0], sizes = [1, 96], strides = [1, 1]} : vector<8x96xf32> to vector<1x96xf32>
    %4 = vector.extract_strided_slice %0 {offsets = [3, 0], sizes = [1, 32], strides = [1, 1]} : vector<8x96xf32> to vector<1x32xf32>
    %5 = vector.extract_strided_slice %0 {offsets = [4, 0], sizes = [1, 32], strides = [1, 1]} : vector<8x96xf32> to vector<1x32xf32>
    %6 = vector.extract_strided_slice %0 {offsets = [5, 0], sizes = [1, 32], strides = [1, 1]} : vector<8x96xf32> to vector<1x32xf32>
    %7 = vector.extract_strided_slice %0 {offsets = [6, 0], sizes = [1, 32], strides = [1, 1]} : vector<8x96xf32> to vector<1x32xf32>
    %8 = vector.extract_strided_slice %0 {offsets = [7, 0], sizes = [1, 32], strides = [1, 1]} : vector<8x96xf32> to vector<1x32xf32>
    %c0_1 = arith.constant 0 : index
    %c0_2 = arith.constant 0 : index
    %c0_3 = arith.constant 0 : index
    %9 = vector.load %arg1[%c0_1, %c0_2, %c0_3] : memref<2x64x32xf32, #tpu.memory_space<vmem>>, vector<2x64x32xf32>
    %10 = vector.shape_cast %9 : vector<2x64x32xf32> to vector<128x32xf32>
    %cst = arith.constant dense<0.000000e+00> : vector<128xf32>
    %11 = vector.multi_reduction <add>, %10, %cst [1] : vector<128x32xf32> to vector<128xf32>
    %12 = vector.shape_cast %11 : vector<128xf32> to vector<128x1xf32>
    %cst_4 = arith.constant 3.200000e+01 : f32
    %13 = vector.broadcast %cst_4 : f32 to vector<128x1xf32>
    %14 = arith.divf %12, %13 : vector<128x1xf32>
    %15 = vector.broadcast %14 : vector<128x1xf32> to vector<128x32xf32>
    %16 = arith.subf %10, %15 : vector<128x32xf32>
    %17 = arith.mulf %16, %16 : vector<128x32xf32>
    %cst_5 = arith.constant dense<0.000000e+00> : vector<128xf32>
    %18 = vector.multi_reduction <add>, %17, %cst_5 [1] : vector<128x32xf32> to vector<128xf32>
    %19 = vector.shape_cast %18 : vector<128xf32> to vector<128x1xf32>
    %cst_6 = arith.constant 3.200000e+01 : f32
    %20 = vector.broadcast %cst_6 : f32 to vector<128x1xf32>
    %21 = arith.divf %19, %20 : vector<128x1xf32>
    %22 = vector.broadcast %14 : vector<128x1xf32> to vector<128x32xf32>
    %23 = arith.subf %10, %22 : vector<128x32xf32>
    %cst_7 = arith.constant 9.99999974E-6 : f32
    %24 = vector.broadcast %cst_7 : f32 to vector<128x1xf32>
    %25 = arith.addf %21, %24 : vector<128x1xf32>
    %26 = math.rsqrt %25 : vector<128x1xf32>
    %27 = vector.broadcast %26 : vector<128x1xf32> to vector<128x32xf32>
    %28 = arith.mulf %23, %27 : vector<128x32xf32>
    %29 = vector.broadcast %1 : vector<1x32xf32> to vector<128x32xf32>
    %30 = arith.mulf %28, %29 : vector<128x32xf32>
    %31 = vector.broadcast %2 : vector<1x32xf32> to vector<128x32xf32>
    %32 = arith.addf %30, %31 : vector<128x32xf32>
    %33 = arith.truncf %32 : vector<128x32xf32> to vector<128x32xbf16>
    %c0_8 = arith.constant 0 : index
    %c0_9 = arith.constant 0 : index
    %34 = vector.load %arg2[%c0_8, %c0_9] : memref<32x96xbf16, #tpu.memory_space<vmem>>, vector<32x96xbf16>
    %cst_10 = arith.constant dense<0.000000e+00> : vector<128x96xf32>
    %35 = tpu.matmul %33, %34, %cst_10 {dimension_numbers = #tpu.dot_dimension_numbers<[1], [0], [0], [1], [0, 0, 1, 1], [], []>} : vector<128x32xbf16>, vector<32x96xbf16>, vector<128x96xf32> -> vector<128x96xf32>
    %36 = vector.broadcast %3 : vector<1x96xf32> to vector<128x96xf32>
    %37 = arith.addf %35, %36 : vector<128x96xf32>
    %c0_11 = arith.constant 0 : index
    %c0_12 = arith.constant 0 : index
    %c0_13 = arith.constant 0 : index
    %38 = vector.load %arg7[%c0_11, %c0_12, %c0_13] : memref<2x64x32xf32, #tpu.memory_space<vmem>>, vector<1x64x32xf32>
    %39 = vector.shape_cast %38 : vector<1x64x32xf32> to vector<64x32xf32>
    %c1 = arith.constant 1 : index
    %c0_14 = arith.constant 0 : index
    %c0_15 = arith.constant 0 : index
    %40 = vector.load %arg7[%c1, %c0_14, %c0_15] : memref<2x64x32xf32, #tpu.memory_space<vmem>>, vector<1x64x32xf32>
    %41 = vector.shape_cast %40 : vector<1x64x32xf32> to vector<64x32xf32>
    %c0_16 = arith.constant 0 : index
    %c0_17 = arith.constant 0 : index
    %42 = vector.load %arg6[%c0_16, %c0_17] : memref<32x32xbf16, #tpu.memory_space<vmem>>, vector<32x32xbf16>
    %43 = vector.extract_strided_slice %37 {offsets = [0, 0], sizes = [128, 32], strides = [1, 1]} : vector<128x96xf32> to vector<128x32xf32>
    %44 = arith.truncf %43 : vector<128x32xf32> to vector<128x32xbf16>
    %cst_18 = arith.constant dense<0.000000e+00> : vector<128x32xf32>
    %45 = tpu.matmul %44, %42, %cst_18 {dimension_numbers = #tpu.dot_dimension_numbers<[1], [0], [0], [1], [0, 0, 1, 1], [], []>} : vector<128x32xbf16>, vector<32x32xbf16>, vector<128x32xf32> -> vector<128x32xf32>
    %46 = vector.shape_cast %43 : vector<128x32xf32> to vector<2x64x32xf32>
    %47 = vector.shape_cast %39 : vector<64x32xf32> to vector<1x64x32xf32>
    %48 = vector.broadcast %47 : vector<1x64x32xf32> to vector<2x64x32xf32>
    %49 = arith.mulf %46, %48 : vector<2x64x32xf32>
    %50 = vector.shape_cast %45 : vector<128x32xf32> to vector<2x64x32xf32>
    %51 = vector.shape_cast %41 : vector<64x32xf32> to vector<1x64x32xf32>
    %52 = vector.broadcast %51 : vector<1x64x32xf32> to vector<2x64x32xf32>
    %53 = arith.mulf %50, %52 : vector<2x64x32xf32>
    %54 = arith.addf %49, %53 : vector<2x64x32xf32>
    %55 = vector.extract_strided_slice %37 {offsets = [0, 32], sizes = [128, 32], strides = [1, 1]} : vector<128x96xf32> to vector<128x32xf32>
    %56 = arith.truncf %55 : vector<128x32xf32> to vector<128x32xbf16>
    %cst_19 = arith.constant dense<0.000000e+00> : vector<128x32xf32>
    %57 = tpu.matmul %56, %42, %cst_19 {dimension_numbers = #tpu.dot_dimension_numbers<[1], [0], [0], [1], [0, 0, 1, 1], [], []>} : vector<128x32xbf16>, vector<32x32xbf16>, vector<128x32xf32> -> vector<128x32xf32>
    %58 = vector.shape_cast %55 : vector<128x32xf32> to vector<2x64x32xf32>
    %59 = vector.shape_cast %39 : vector<64x32xf32> to vector<1x64x32xf32>
    %60 = vector.broadcast %59 : vector<1x64x32xf32> to vector<2x64x32xf32>
    %61 = arith.mulf %58, %60 : vector<2x64x32xf32>
    %62 = vector.shape_cast %57 : vector<128x32xf32> to vector<2x64x32xf32>
    %63 = vector.shape_cast %41 : vector<64x32xf32> to vector<1x64x32xf32>
    %64 = vector.broadcast %63 : vector<1x64x32xf32> to vector<2x64x32xf32>
    %65 = arith.mulf %62, %64 : vector<2x64x32xf32>
    %66 = arith.addf %61, %65 : vector<2x64x32xf32>
    %67 = vector.extract_strided_slice %37 {offsets = [0, 64], sizes = [128, 32], strides = [1, 1]} : vector<128x96xf32> to vector<128x32xf32>
    %68 = vector.shape_cast %67 : vector<128x32xf32> to vector<2x64x32xf32>
    %c0_20 = arith.constant 0 : index
    %c0_21 = arith.constant 0 : index
    %69 = vector.load %arg8[%c0_20, %c0_21] : memref<4x32xf32, #tpu.memory_space<vmem>>, vector<4x32xf32>
    %70 = vector.shape_cast %54 : vector<2x64x32xf32> to vector<2x1x64x32xf32>
    %71 = vector.shape_cast %69 : vector<4x32xf32> to vector<1x4x1x32xf32>
    %72 = vector.broadcast %70 : vector<2x1x64x32xf32> to vector<2x4x64x32xf32>
    %73 = vector.broadcast %71 : vector<1x4x1x32xf32> to vector<2x4x64x32xf32>
    %74 = arith.mulf %72, %73 : vector<2x4x64x32xf32>
    %75 = vector.shape_cast %74 : vector<2x4x64x32xf32> to vector<2x256x32xf32>
    %76 = arith.truncf %75 : vector<2x256x32xf32> to vector<2x256x32xbf16>
    %77 = arith.truncf %66 : vector<2x64x32xf32> to vector<2x64x32xbf16>
    "tpu.trace_start"() <{level = 10 : i32, message = "bmc,blc->bml"}> : () -> ()
    %cst_22 = arith.constant dense<0.000000e+00> : vector<2x256x64xf32>
    %78 = tpu.matmul %76, %77, %cst_22 {dimension_numbers = #tpu.dot_dimension_numbers<[2], [2], [1], [1], [0, 0, 0, 1, 1, 1], [0], [0]>} : vector<2x256x32xbf16>, vector<2x64x32xbf16>, vector<2x256x64xf32> -> vector<2x256x64xf32>
    "tpu.trace_stop"() : () -> ()
    %cst_23 = arith.constant dense<0xFF800000> : vector<2x256xf32>
    %79 = vector.multi_reduction <maximumf>, %78, %cst_23 [2] : vector<2x256x64xf32> to vector<2x256xf32>
    %80 = vector.shape_cast %79 : vector<2x256xf32> to vector<2x256x1xf32>
    %81 = vector.broadcast %80 : vector<2x256x1xf32> to vector<2x256x64xf32>
    %82 = arith.subf %78, %81 : vector<2x256x64xf32>
    %83 = math.exp %82 : vector<2x256x64xf32>
    %cst_24 = arith.constant dense<0.000000e+00> : vector<2x256xf32>
    %84 = vector.multi_reduction <add>, %83, %cst_24 [2] : vector<2x256x64xf32> to vector<2x256xf32>
    %85 = vector.shape_cast %84 : vector<2x256xf32> to vector<2x256x1xf32>
    %86 = tpu.reciprocal %85 {approx = true} : vector<2x256x1xf32> -> vector<2x256x1xf32>
    %87 = vector.broadcast %86 : vector<2x256x1xf32> to vector<2x256x64xf32>
    %88 = arith.mulf %83, %87 : vector<2x256x64xf32>
    %89 = arith.truncf %88 : vector<2x256x64xf32> to vector<2x256x64xbf16>
    %90 = arith.truncf %68 : vector<2x64x32xf32> to vector<2x64x32xbf16>
    "tpu.trace_start"() <{level = 10 : i32, message = "bml,blc->bmc"}> : () -> ()
    %cst_25 = arith.constant dense<0.000000e+00> : vector<2x256x32xf32>
    %91 = tpu.matmul %89, %90, %cst_25 {dimension_numbers = #tpu.dot_dimension_numbers<[2], [1], [1], [2], [0, 0, 0, 1, 1, 2], [0], [0]>} : vector<2x256x64xbf16>, vector<2x64x32xbf16>, vector<2x256x32xf32> -> vector<2x256x32xf32>
    "tpu.trace_stop"() : () -> ()
    %92 = vector.shape_cast %91 : vector<2x256x32xf32> to vector<2x4x64x32xf32>
    %93 = vector.shape_cast %69 : vector<4x32xf32> to vector<1x4x1x32xf32>
    %94 = vector.broadcast %93 : vector<1x4x1x32xf32> to vector<2x4x64x32xf32>
    %95 = arith.mulf %92, %94 : vector<2x4x64x32xf32>
    %cst_26 = arith.constant dense<0.000000e+00> : vector<2x64x32xf32>
    %96 = vector.multi_reduction <add>, %95, %cst_26 [1] : vector<2x4x64x32xf32> to vector<2x64x32xf32>
    %97 = vector.shape_cast %96 : vector<2x64x32xf32> to vector<128x32xf32>
    %98 = arith.truncf %97 : vector<128x32xf32> to vector<128x32xbf16>
    %c0_27 = arith.constant 0 : index
    %c0_28 = arith.constant 0 : index
    %99 = vector.load %arg3[%c0_27, %c0_28] : memref<32x32xbf16, #tpu.memory_space<vmem>>, vector<32x32xbf16>
    %cst_29 = arith.constant dense<0.000000e+00> : vector<128x32xf32>
    %100 = tpu.matmul %98, %99, %cst_29 {dimension_numbers = #tpu.dot_dimension_numbers<[1], [0], [0], [1], [0, 0, 1, 1], [], []>} : vector<128x32xbf16>, vector<32x32xbf16>, vector<128x32xf32> -> vector<128x32xf32>
    %101 = vector.broadcast %4 : vector<1x32xf32> to vector<128x32xf32>
    %102 = arith.addf %100, %101 : vector<128x32xf32>
    %103 = arith.addf %10, %102 : vector<128x32xf32>
    %cst_30 = arith.constant dense<0.000000e+00> : vector<128xf32>
    %104 = vector.multi_reduction <add>, %103, %cst_30 [1] : vector<128x32xf32> to vector<128xf32>
    %105 = vector.shape_cast %104 : vector<128xf32> to vector<128x1xf32>
    %cst_31 = arith.constant 3.200000e+01 : f32
    %106 = vector.broadcast %cst_31 : f32 to vector<128x1xf32>
    %107 = arith.divf %105, %106 : vector<128x1xf32>
    %108 = vector.broadcast %107 : vector<128x1xf32> to vector<128x32xf32>
    %109 = arith.subf %103, %108 : vector<128x32xf32>
    %110 = arith.mulf %109, %109 : vector<128x32xf32>
    %cst_32 = arith.constant dense<0.000000e+00> : vector<128xf32>
    %111 = vector.multi_reduction <add>, %110, %cst_32 [1] : vector<128x32xf32> to vector<128xf32>
    %112 = vector.shape_cast %111 : vector<128xf32> to vector<128x1xf32>
    %cst_33 = arith.constant 3.200000e+01 : f32
    %113 = vector.broadcast %cst_33 : f32 to vector<128x1xf32>
    %114 = arith.divf %112, %113 : vector<128x1xf32>
    %115 = vector.broadcast %107 : vector<128x1xf32> to vector<128x32xf32>
    %116 = arith.subf %103, %115 : vector<128x32xf32>
    %cst_34 = arith.constant 9.99999974E-6 : f32
    %117 = vector.broadcast %cst_34 : f32 to vector<128x1xf32>
    %118 = arith.addf %114, %117 : vector<128x1xf32>
    %119 = math.rsqrt %118 : vector<128x1xf32>
    %120 = vector.broadcast %119 : vector<128x1xf32> to vector<128x32xf32>
    %121 = arith.mulf %116, %120 : vector<128x32xf32>
    %122 = vector.broadcast %5 : vector<1x32xf32> to vector<128x32xf32>
    %123 = arith.mulf %121, %122 : vector<128x32xf32>
    %124 = vector.broadcast %6 : vector<1x32xf32> to vector<128x32xf32>
    %125 = arith.addf %123, %124 : vector<128x32xf32>
    %126 = arith.truncf %125 : vector<128x32xf32> to vector<128x32xbf16>
    %c0_35 = arith.constant 0 : index
    %c0_36 = arith.constant 0 : index
    %127 = vector.load %arg4[%c0_35, %c0_36] : memref<32x32xbf16, #tpu.memory_space<vmem>>, vector<32x32xbf16>
    %cst_37 = arith.constant dense<0.000000e+00> : vector<128x32xf32>
    %128 = tpu.matmul %126, %127, %cst_37 {dimension_numbers = #tpu.dot_dimension_numbers<[1], [0], [0], [1], [0, 0, 1, 1], [], []>} : vector<128x32xbf16>, vector<32x32xbf16>, vector<128x32xf32> -> vector<128x32xf32>
    %129 = vector.broadcast %7 : vector<1x32xf32> to vector<128x32xf32>
    %130 = arith.addf %128, %129 : vector<128x32xf32>
    %cst_38 = arith.constant 5.000000e-01 : f32
    %131 = vector.broadcast %cst_38 : f32 to vector<128x32xf32>
    %132 = arith.mulf %131, %130 : vector<128x32xf32>
    %cst_39 = arith.constant 4.471500e-02 : f32
    %133 = vector.broadcast %cst_39 : f32 to vector<128x32xf32>
    %134 = arith.mulf %133, %130 : vector<128x32xf32>
    %135 = arith.mulf %134, %130 : vector<128x32xf32>
    %136 = arith.mulf %135, %130 : vector<128x32xf32>
    %137 = arith.addf %130, %136 : vector<128x32xf32>
    %cst_40 = arith.constant 0.797884583 : f32
    %138 = vector.broadcast %cst_40 : f32 to vector<128x32xf32>
    %139 = arith.mulf %138, %137 : vector<128x32xf32>
    %140 = math.tanh %139 : vector<128x32xf32>
    %cst_41 = arith.constant 1.000000e+00 : f32
    %141 = vector.broadcast %cst_41 : f32 to vector<128x32xf32>
    %142 = arith.addf %141, %140 : vector<128x32xf32>
    %143 = arith.mulf %132, %142 : vector<128x32xf32>
    %144 = arith.truncf %143 : vector<128x32xf32> to vector<128x32xbf16>
    %c0_42 = arith.constant 0 : index
    %c0_43 = arith.constant 0 : index
    %145 = vector.load %arg5[%c0_42, %c0_43] : memref<32x32xbf16, #tpu.memory_space<vmem>>, vector<32x32xbf16>
    %cst_44 = arith.constant dense<0.000000e+00> : vector<128x32xf32>
    %146 = tpu.matmul %144, %145, %cst_44 {dimension_numbers = #tpu.dot_dimension_numbers<[1], [0], [0], [1], [0, 0, 1, 1], [], []>} : vector<128x32xbf16>, vector<32x32xbf16>, vector<128x32xf32> -> vector<128x32xf32>
    %147 = vector.broadcast %8 : vector<1x32xf32> to vector<128x32xf32>
    %148 = arith.addf %146, %147 : vector<128x32xf32>
    %149 = arith.addf %103, %148 : vector<128x32xf32>
    %150 = vector.shape_cast %149 : vector<128x32xf32> to vector<2x64x32xf32>
    %c0_45 = arith.constant 0 : index
    %c0_46 = arith.constant 0 : index
    %c0_47 = arith.constant 0 : index
    %151 = vector.load %arg10[%c0_45, %c0_46, %c0_47] : memref<2x64x32xf32, #tpu.memory_space<vmem>>, vector<2x64x32xf32>
    tpu.vector_store %arg10[%c0_45, %c0_46, %c0_47], %150 {strides = array<i32>} : memref<2x64x32xf32, #tpu.memory_space<vmem>>, vector<2x64x32xf32>,
    return
  }
  func.func @transform_0(%arg0: i32) -> (i32, i32, i32) {
    %c0_i32 = arith.constant 0 : i32
    %c0_i32_0 = arith.constant 0 : i32
    %c0_i32_1 = arith.constant 0 : i32
    return %arg0, %c0_i32, %c0_i32_0 : i32, i32, i32
  }
  func.func @transform_1(%arg0: i32) -> (i32, i32) {
    %c0_i32 = arith.constant 0 : i32
    %c0_i32_0 = arith.constant 0 : i32
    %c0_i32_1 = arith.constant 0 : i32
    return %c0_i32, %c0_i32_0 : i32, i32
  }
  func.func @transform_2(%arg0: i32) -> (i32, i32) {
    %c0_i32 = arith.constant 0 : i32
    %c0_i32_0 = arith.constant 0 : i32
    %c0_i32_1 = arith.constant 0 : i32
    return %c0_i32, %c0_i32_0 : i32, i32
  }
  func.func @transform_3(%arg0: i32) -> (i32, i32) {
    %c0_i32 = arith.constant 0 : i32
    %c0_i32_0 = arith.constant 0 : i32
    %c0_i32_1 = arith.constant 0 : i32
    return %c0_i32, %c0_i32_0 : i32, i32
  }
  func.func @transform_4(%arg0: i32) -> (i32, i32) {
    %c0_i32 = arith.constant 0 : i32
    %c0_i32_0 = arith.constant 0 : i32
    %c0_i32_1 = arith.constant 0 : i32
    return %c0_i32, %c0_i32_0 : i32, i32
  }
  func.func @transform_5(%arg0: i32) -> (i32, i32) {
    %c0_i32 = arith.constant 0 : i32
    %c0_i32_0 = arith.constant 0 : i32
    %c0_i32_1 = arith.constant 0 : i32
    return %c0_i32, %c0_i32_0 : i32, i32
  }
  func.func @transform_6(%arg0: i32) -> (i32, i32, i32) {
    %c0_i32 = arith.constant 0 : i32
    %c0_i32_0 = arith.constant 0 : i32
    %c0_i32_1 = arith.constant 0 : i32
    %c0_i32_2 = arith.constant 0 : i32
    return %c0_i32, %c0_i32_0, %c0_i32_1 : i32, i32, i32
  }
  func.func @transform_7(%arg0: i32) -> (i32, i32) {
    %c0_i32 = arith.constant 0 : i32
    %c0_i32_0 = arith.constant 0 : i32
    %c0_i32_1 = arith.constant 0 : i32
    return %c0_i32, %c0_i32_0 : i32, i32
  }
  func.func @transform_8(%arg0: i32) -> (i32, i32) {
    %c0_i32 = arith.constant 0 : i32
    %c0_i32_0 = arith.constant 0 : i32
    %c0_i32_1 = arith.constant 0 : i32
    return %c0_i32, %c0_i32_0 : i32, i32
  }
  func.func @transform_9(%arg0: i32) -> (i32, i32, i32) {
    %c0_i32 = arith.constant 0 : i32
    %c0_i32_0 = arith.constant 0 : i32
    %c0_i32_1 = arith.constant 0 : i32
    return %arg0, %c0_i32, %c0_i32_0 : i32, i32, i32
  }
}

</mosaic_0001>

<bundles_post_ra>
// kernel: tpu_custom_call.1
= control target key start
LH: loop header
LB: loop body
LE: loop exit
PB: predicated region body
PF: predicated region fallthrough
CT: control target
= control target key end

     0   :  { %vm50_vm0 = vcmask 261120   ;;  %v4501_v18 = vmov 32.0   ;;  %s4503_s30 = smov 32   ;;  %s7184_s0 = inlined_call_operand.vmem [shape: f32[2,64,32], index: 0, kind: input, shape index: {}]   ;;  %s7185_s1 = inlined_call_operand.vmem [shape: bf16[32,96], index: 1, kind: input, shape index: {}]   ;;  %s7186_s8 = inlined_call_operand.vmem [shape: f32[8,96], index: 8, kind: input, shape index: {}]   ;;  %s7187_s5 = inlined_call_operand.vmem [shape: bf16[32,32], index: 5, kind: input, shape index: {}]   ;;  %s7188_s7 = inlined_call_operand.vmem [shape: f32[4,32], index: 7, kind: input, shape index: {}]   ;;  %s7189_s6 = inlined_call_operand.vmem [shape: f32[2,64,32], index: 6, kind: input, shape index: {}]   ;;  %s7190_s2 = inlined_call_operand.vmem [shape: bf16[32,32], index: 2, kind: input, shape index: {}]   ;;  %s7191_s3 = inlined_call_operand.vmem [shape: bf16[32,32], index: 3, kind: input, shape index: {}]   ;;  %s7192_s4 = inlined_call_operand.vmem [shape: bf16[32,32], index: 4, kind: input, shape index: {}]   ;;  %s7193_s9 = inlined_call_operand.vmem [shape: f32[2,64,32], index: 9, kind: output, shape index: {}]  }
   0x1   :  { %v4558_v0 = vld [vmem:[%s7184_s0 + $0x20] sm:$0xff]  ;;  %v36_v4 = vld [vmem:[%s7184_s0 + $0x10] sm:$0xff]  ;;  %v39_v6 = vld [vmem:[%s7184_s0 + $0x28] sm:$0xff]  ;;  %4129 = vrcp.f32 %v4501_v18 }
   0x2   :  { %v34_v1 = vld [vmem:[%s7184_s0] sm:$0xff]  ;;  %v63_v2 = vsel %vm50_vm0, %v4558_v0, 0.0  ;;  %v57_v5 = vsel %vm50_vm0, %v36_v4, 0.0  ;;  %v35_v7 = vld [vmem:[%s7184_s0 + $0x8] sm:$0xff]  ;;  %v37_v8 = vld [vmem:[%s7184_s0 + $0x18] sm:$0xff]  ;;  %v66_v9 = vsel %vm50_vm0, %v39_v6, 0.0 }
   0x3   :  { %v51_v3 = vsel %vm50_vm0, %v34_v1, 0.0  ;;  %64 = vadd.xlane.f32.xlu2 %v63_v2  ;;  %58 = vadd.xlane.f32.xlu1 %v57_v5  ;;  %v54_v10 = vsel %vm50_vm0, %v35_v7, 0.0  ;;  %v60_v11 = vsel %vm50_vm0, %v37_v8, 0.0  ;;  %v40_v12 = vld [vmem:[%s7184_s0 + $0x30] sm:$0xff]  ;;  %v43_v14 = vld [vmem:[%s7184_s0 + $0x48] sm:$0xff]  ;;  %v4611_v37 = vld [vmem:[%s7184_s0 + $0x38] sm:$0xff] }
   0x4   :  { %52 = vadd.xlane.f32.xlu0 %v51_v3  ;;  %v69_v13 = vsel %vm50_vm0, %v40_v12, 0.0  ;;  %v78_v15 = vsel %vm50_vm0, %v43_v14, 0.0  ;;  %v4593_v16 = vld [vmem:[%s7184_s0 + $0x50] sm:$0xff]  ;;  %v72_v42 = vsel %vm50_vm0, %v4611_v37, 0.0  ;;  %v4634_v51 = vld [vmem:[%s7184_s0 + $0x40] sm:$0xff]  ;;  %v4651_v61 = vld [vmem:[%s7184_s0 + $0x58] sm:$0xff] }
   0x5   :  { %v81_v17 = vsel %vm50_vm0, %v4593_v16, 0.0  ;;  %v75_v56 = vsel %vm50_vm0, %v4634_v51, 0.0 }
   0x7   :  { %v4130_v19 = vpop.eup %4129 }
   0x8   :  { %v100_v20 = vmul.f32 32.0, %v4130_v19  ;;  %vm104_vm1 = vweird.f32 %v4130_v19 }
   0xa   :  { %v101_v21 = vsub.f32 1.0, %v100_v20  ;;  %v4111_v20 = vld [vmem:[%s7185_s1] sm:$0xff] }
   0xb   :  { %67 = vadd.xlane.f32.xlu2 %v66_v9  ;;  %61 = vadd.xlane.f32.xlu1 %v60_v11 }
   0xc   :  { %55 = vadd.xlane.f32.xlu0 %v54_v10  ;;  %v102_v22 = vmul.f32 %v4130_v19, %v101_v21 }
   0xe   :  { %v103_v23 = vadd.f32 %v4130_v19, %v102_v22 }
  0x10   :  { %v4597_v24 = vsel %vm104_vm1, %v4130_v19, %v103_v23 }
  0x11   :  { %7259 = vst [vmem:[#allocation2_spill] sm:$0xff] %v4597_v24 }
  0x13   :  { %70 = vadd.xlane.f32.xlu2 %v69_v13 }
  0x1b   :  { %79 = vadd.xlane.f32.xlu2 %v78_v15 }
  0x23   :  { %82 = vadd.xlane.f32.xlu2 %v81_v17 }
  0x76   :  { %v65_v25 = vpop.xlane.xlu2 %64  ;;  %v59_v30 = vpop.xlane.xlu1 %58 }
  0x77   :  { %v53_v26 = vpop.xlane.xlu0 %52  ;;  %v108_v36 = vmul.f32 %v4597_v24, %v59_v30  ;;  %v110_v60 = vmul.f32 %v4597_v24, %v65_v25 }
  0x78   :  { %v106_v27 = vmul.f32 %v4597_v24, %v53_v26 }
  0x79   :  { %v4619_v41 = vsub.f32 %v36_v4, %v108_v36  ;;  %v4662_v3 = vsub.f32 %v4558_v0, %v110_v60 }
  0x7a   :  { %v4600_v28 = vsub.f32 %v34_v1, %v106_v27  ;;  %v84_v1 = vsel %vm50_vm0, %v4651_v61, 0.0 }
  0x7b   :  { %v140_v48 = vmul.f32 %v4619_v41, %v4619_v41  ;;  %v142_v9 = vmul.f32 %v4662_v3, %v4662_v3 }
  0x7c   :  { %v138_v29 = vmul.f32 %v4600_v28, %v4600_v28 }
  0x7d   :  { %v160_v53 = vsel %vm50_vm0, %v140_v48, 0.0 }
  0x7e   :  { %v154_v31 = vsel %vm50_vm0, %v138_v29, 0.0  ;;  %v68_v32 = vpop.xlane.xlu2 %67  ;;  %v62_v46 = vpop.xlane.xlu1 %61 }
  0x7f   :  { %155 = vadd.xlane.f32.xlu0 %v154_v31  ;;  %v56_v33 = vpop.xlane.xlu0 %55  ;;  %v111_v34 = vmul.f32 %v4597_v24, %v68_v32  ;;  %v109_v50 = vmul.f32 %v4597_v24, %v62_v46 }
  0x80   :  { %v107_v35 = vmul.f32 %v4597_v24, %v56_v33 }
  0x81   :  { %v4613_v38 = vsub.f32 %v39_v6, %v111_v34  ;;  %v4641_v55 = vsub.f32 %v37_v8, %v109_v50  ;;  %v4670_v8 = vld [vmem:[%s7184_s0 + $0x60] sm:$0xff] }
  0x82   :  { %v4615_v39 = vsub.f32 %v35_v7, %v107_v35  ;;  %v87_v10 = vsel %vm50_vm0, %v4670_v8, 0.0 }
  0x83   :  { %v143_v40 = vmul.f32 %v4613_v38, %v4613_v38  ;;  %v141_v62 = vmul.f32 %v4641_v55, %v4641_v55 }
  0x84   :  { %v139_v43 = vmul.f32 %v4615_v39, %v4615_v39 }
  0x85   :  { %v169_v44 = vsel %vm50_vm0, %v143_v40, 0.0  ;;  %v163_v4 = vsel %vm50_vm0, %v141_v62, 0.0 }
  0x86   :  { %v157_v45 = vsel %vm50_vm0, %v139_v43, 0.0  ;;  %170 = vadd.xlane.f32.xlu2 %v169_v44  ;;  %v71_v47 = vpop.xlane.xlu2 %70 }
  0x87   :  { %73 = vadd.xlane.f32.xlu0 %v72_v42  ;;  %158 = vadd.xlane.f32.xlu1 %v157_v45  ;;  %v112_v49 = vmul.f32 %v4597_v24, %v71_v47 }
  0x89   :  { %v4636_v52 = vsub.f32 %v40_v12, %v112_v49  ;;  %v166_v12 = vsel %vm50_vm0, %v142_v9, 0.0 }
  0x8b   :  { %v144_v54 = vmul.f32 %v4636_v52, %v4636_v52 }
  0x8d   :  { %v172_v57 = vsel %vm50_vm0, %v144_v54, 0.0 }
  0x8e   :  { %173 = vadd.xlane.f32.xlu2 %v172_v57  ;;  %v80_v58 = vpop.xlane.xlu2 %79 }
  0x8f   :  { %161 = vadd.xlane.f32.xlu0 %v160_v53  ;;  %76 = vadd.xlane.f32.xlu1 %v75_v56  ;;  %v115_v59 = vmul.f32 %v4597_v24, %v80_v58 }
  0x91   :  { %v4655_v63 = vsub.f32 %v43_v14, %v115_v59  ;;  %v4686_v14 = vld [vmem:[%s7184_s0 + $0x68] sm:$0xff] }
  0x92   :  { %v90_v15 = vsel %vm50_vm0, %v4686_v14, 0.0 }
  0x93   :  { %v147_v2 = vmul.f32 %v4655_v63, %v4655_v63 }
  0x95   :  { %v181_v5 = vsel %vm50_vm0, %v147_v2, 0.0 }
  0x96   :  { %182 = vadd.xlane.f32.xlu2 %v181_v5  ;;  %v83_v6 = vpop.xlane.xlu2 %82 }
  0x97   :  { %85 = vadd.xlane.f32.xlu0 %v84_v1  ;;  %164 = vadd.xlane.f32.xlu1 %v163_v4  ;;  %v116_v7 = vmul.f32 %v4597_v24, %v83_v6  ;;  %v4736_v4 = vld [vmem:[%s7186_s8] sm:$0xff] }
  0x99   :  { %v4675_v0 = vsub.f32 %v4593_v16, %v116_v7  ;;  %v4112_v16 = vld [vmem:[%s7185_s1 + $0x8] sm:$0xff] }
  0x9a   :  { %499 = vmatpush.bf16.msra.mxu0 %v4112_v16  ;;  %4121 = vmatpush.bf16.msra.mxu2 %v4112_v16 }
  0x9b   :  { %v148_v11 = vmul.f32 %v4675_v0, %v4675_v0 }
  0x9d   :  { %v184_v13 = vsel %vm50_vm0, %v148_v11, 0.0 }
  0x9e   :  { %185 = vadd.xlane.f32.xlu2 %v184_v13  ;;  %500 = vmatpush.bf16.msra.mxu0 %v4111_v20 }
  0x9f   :  { %88 = vadd.xlane.f32.xlu0 %v87_v10  ;;  %167 = vadd.xlane.f32.xlu1 %v166_v12  ;;  %v4746_v10 = vld [vmem:[%s7184_s0 + $0x78] sm:$0xff] }
  0xa0   :  { %4122 = vmatpush.bf16.msra.mxu2 %v4111_v20 }
  0xa7   :  { %91 = vadd.xlane.f32.xlu1 %v90_v15  ;;  %v4751_v15 = vperm.slane %v4736_v4, 0 }
  0xf2   :  { %v156_v17 = vpop.xlane.xlu0 %155 }
  0xf3   :  { %v202_v18 = vmul.f32 %v156_v17, %v4597_v24 }
  0xf5   :  { %v218_v19 = vadd.f32 1e-05, %v202_v18  ;;  %v96_v18 = vsel %vm50_vm0, %v4746_v10, 0.0 }
  0xf7   :  { %4131 = vrsqrt.f32 %v218_v19  ;;  %vm240_vm3 = vweird.f32 %v218_v19 }
  0xf9   :  { %v171_v35 = vpop.xlane.xlu2 %170 }
  0xfa   :  { %v74_v21 = vpop.xlane.xlu0 %73  ;;  %v159_v22 = vpop.xlane.xlu1 %158  ;;  %v207_v45 = vmul.f32 %v171_v35, %v4597_v24 }
  0xfb   :  { %v113_v23 = vmul.f32 %v4597_v24, %v74_v21  ;;  %v203_v25 = vmul.f32 %v159_v22, %v4597_v24 }
  0xfc   :  { %v4723_v56 = vadd.f32 1e-05, %v207_v45 }
  0xfd   :  { %v4132_v26 = vpop.eup %4131  ;;  %v4700_v27 = vsub.f32 %v4611_v37, %v113_v23  ;;  %v219_v30 = vadd.f32 1e-05, %v203_v25  ;;  %v4709_v37 = vld [vmem:[%s7184_s0 + $0x70] sm:$0xff]  ;;  %v4761_v25 = vperm.slane %v4736_v4, 1 }
  0xfe   :  { %v235_v29 = vmul.f32 %v4132_v26, %v218_v19  ;;  %v93_v49 = vsel %vm50_vm0, %v4709_v37, 0.0  ;;  %vm241_vm2 = vweird.f32 %v4132_v26  ;;  %vm290_vm1 = vweird.f32 %v4723_v56 }
  0xff   :  { %v145_v31 = vmul.f32 %v4700_v27, %v4700_v27  ;;  %4133 = vrsqrt.f32 %v219_v30  ;;  %vm4725_vm4 = vmor %vm240_vm3, %vm241_vm2  ;;  %vm250_vm6 = vweird.f32 %v219_v30 }
 0x100   :  { %v236_v32 = vmul.f32 %v4132_v26, %v235_v29 }
 0x101   :  { %v175_v33 = vsel %vm50_vm0, %v145_v31, 0.0 }
 0x102   :  { %v237_v34 = vmul.f32 0.5, %v236_v32  ;;  %176 = vadd.xlane.f32.xlu0 %v175_v33  ;;  %v162_v36 = vpop.xlane.xlu0 %161  ;;  %v77_v40 = vpop.xlane.xlu1 %76 }
 0x103   :  { %v204_v42 = vmul.f32 %v162_v36, %v4597_v24  ;;  %v114_v44 = vmul.f32 %v4597_v24, %v77_v40 }
 0x104   :  { %v238_v43 = vsub.f32 1.5, %v237_v34 }
 0x105   :  { %v4713_v46 = vadd.f32 1e-05, %v204_v42  ;;  %v4134_v47 = vpop.eup %4133  ;;  %v4716_v48 = vsub.f32 %v4634_v51, %v114_v44 }
 0x106   :  { %v239_v50 = vmul.f32 %v4132_v26, %v238_v43  ;;  %v245_v53 = vmul.f32 %v4134_v47, %v219_v30  ;;  %vm251_vm5 = vweird.f32 %v4134_v47 }
 0x107   :  { %4135 = vrsqrt.f32 %v4713_v46  ;;  %v146_v54 = vmul.f32 %v4716_v48, %v4716_v48  ;;  %vm252_vm7 = vmor %vm250_vm6, %vm251_vm5  ;;  %vm260_vm8 = vweird.f32 %v4713_v46 }
 0x108   :  { %v246_v57 = vmul.f32 %v4134_v47, %v245_v53  ;;  %v243_v60 = vsel %vm4725_vm4, %v4132_v26, %v239_v50  ;;  %4137 = vrsqrt.f32 %v4723_v56 }
 0x109   :  { %v178_v51 = vsel %vm50_vm0, %v146_v54, 0.0  ;;  %v394_v13 = vmul.f32 %v243_v60, %v4600_v28 }
 0x10a   :  { %94 = vadd.xlane.f32.xlu0 %v93_v49  ;;  %v86_v59 = vpop.xlane.xlu0 %85  ;;  %v247_v62 = vmul.f32 0.5, %v246_v57  ;;  %179 = vadd.xlane.f32.xlu1 %v178_v51  ;;  %v165_v1 = vpop.xlane.xlu1 %164 }
 0x10b   :  { %v117_v2 = vmul.f32 %v4597_v24, %v86_v59  ;;  %v205_v5 = vmul.f32 %v165_v1, %v4597_v24  ;;  %v411_v23 = vmul.f32 %v4751_v15, %v394_v13 }
 0x10c   :  { %v248_v7 = vsub.f32 1.5, %v247_v62 }
 0x10d   :  { %v4136_v6 = vpop.eup %4135  ;;  %v4741_v9 = vsub.f32 %v4651_v61, %v117_v2  ;;  %v221_v12 = vadd.f32 1e-05, %v205_v5  ;;  %v428_v40 = vadd.f32 %v4761_v25, %v411_v23 }
 0x10e   :  { %v255_v11 = vmul.f32 %v4136_v6, %v4713_v46  ;;  %v249_v16 = vmul.f32 %v4134_v47, %v248_v7  ;;  %v4763_v26 = vpop.eup %4137  ;;  %vm261_vm9 = vweird.f32 %v4136_v6 }
 0x10f   :  { %v149_v17 = vmul.f32 %v4741_v9, %v4741_v9  ;;  %4139 = vrsqrt.f32 %v221_v12  ;;  %v285_v35 = vmul.f32 %v4763_v26, %v4723_v56  ;;  %vm4778_vm10 = vmor %vm260_vm8, %vm261_vm9  ;;  %vm270_vm11 = vweird.f32 %v221_v12 }
 0x110   :  { %v256_v61 = vmul.f32 %v4136_v6, %v255_v11  ;;  %v253_v19 = vsel %vm252_vm7, %v4134_v47, %v249_v16  ;;  %vm291_vm2 = vweird.f32 %v4763_v26 }
 0x111   :  { %v187_v20 = vsel %vm50_vm0, %v149_v17, 0.0  ;;  %v395_v22 = vmul.f32 %v253_v19, %v4615_v39  ;;  %v286_v50 = vmul.f32 %v4763_v26, %v285_v35  ;;  %vm292_vm4 = vmor %vm290_vm1, %vm291_vm2 }
 0x112   :  { %v257_v21 = vmul.f32 0.5, %v256_v61  ;;  %188 = vadd.xlane.f32.xlu0 %v187_v20  ;;  %v89_v28 = vpop.xlane.xlu0 %88  ;;  %97 = vadd.xlane.f32.xlu1 %v96_v18  ;;  %v168_v29 = vpop.xlane.xlu1 %167 }
 0x113   :  { %v118_v30 = vmul.f32 %v4597_v24, %v89_v28  ;;  %v206_v32 = vmul.f32 %v168_v29, %v4597_v24  ;;  %v412_v33 = vmul.f32 %v4751_v15, %v395_v22  ;;  %v287_v1 = vmul.f32 0.5, %v286_v50 }
 0x114   :  { %v258_v31 = vsub.f32 1.5, %v257_v21 }
 0x115   :  { %v4770_v39 = vsub.f32 %v4670_v8, %v118_v30  ;;  %v4140_v34 = vpop.eup %4139  ;;  %v222_v36 = vadd.f32 1e-05, %v206_v32  ;;  %v429_v42 = vadd.f32 %v4761_v25, %v412_v33  ;;  %v288_v17 = vsub.f32 1.5, %v287_v1 }
 0x116   :  { %v259_v43 = vmul.f32 %v4136_v6, %v258_v31  ;;  %v265_v44 = vmul.f32 %v4140_v34, %v221_v12  ;;  %vm271_vm12 = vweird.f32 %v4140_v34 }
 0x117   :  { %v150_v45 = vmul.f32 %v4770_v39, %v4770_v39  ;;  %4141 = vrsqrt.f32 %v222_v36  ;;  %v444_v8 = vpack.c.bf16 %v429_v42, %v428_v40  ;;  %vm272_vm13 = vmor %vm270_vm11, %vm271_vm12  ;;  %vm280_vm14 = vweird.f32 %v222_v36 }
 0x118   :  { %v266_v47 = vmul.f32 %v4140_v34, %v265_v44  ;;  %v263_v53 = vsel %vm4778_vm10, %v4136_v6, %v259_v43 }
 0x119   :  { %v190_v49 = vsel %vm50_vm0, %v150_v45, 0.0  ;;  %3959 = vmatmul.msk.bf16.vlgmr.msra.gmra.mxu0 %vm50_vm0, %v444_v8  ;;  %v396_v62 = vmul.f32 %v263_v53, %v4619_v41 }
 0x11a   :  { %v267_v54 = vmul.f32 0.5, %v266_v47  ;;  %v92_v57 = vpop.xlane.xlu1 %91  ;;  %191 = vadd.xlane.f32.xlu1 %v190_v49 }
 0x11b   :  { %v119_v58 = vmul.f32 %v4597_v24, %v92_v57  ;;  %v413_v16 = vmul.f32 %v4751_v15, %v396_v62 }
 0x11c   :  { %v268_v51 = vsub.f32 1.5, %v267_v54  ;;  %v4114_v54 = vld [vmem:[%s7187_s5 + $0x8] sm:$0xff] }
 0x11d   :  { %v4142_v59 = vpop.eup %4141  ;;  %v4789_v60 = vsub.f32 %v4686_v14, %v119_v58  ;;  %v430_v18 = vadd.f32 %v4761_v25, %v413_v16  ;;  %613 = vmatpush.bf16.msra.mxu1 %v4114_v54  ;;  %4123 = vmatpush.bf16.msra.mxu3 %v4114_v54 }
 0x11e   :  { %v269_v2 = vmul.f32 %v4140_v34, %v268_v51  ;;  %v275_v5 = vmul.f32 %v4142_v59, %v222_v36  ;;  %vm281_vm15 = vweird.f32 %v4142_v59  ;;  %758 = vmatpush.bf16.msrb.mxu2 %v4114_v54 }
 0x11f   :  { %v151_v6 = vmul.f32 %v4789_v60, %v4789_v60  ;;  %vm282_vm3 = vmor %vm280_vm14, %vm281_vm15 }
 0x120   :  { %v273_v7 = vsel %vm272_vm13, %v4140_v34, %v269_v2  ;;  %v276_v11 = vmul.f32 %v4142_v59, %v275_v5  ;;  %v174_v34 = vpop.xlane.xlu2 %173  ;;  %v4113_v5 = vld [vmem:[%s7187_s5] sm:$0xff]  ;;  %s4502_s5 = smov 96  }
 0x121   :  { %v193_v12 = vsel %vm50_vm0, %v151_v6, 0.0  ;;  %v397_v13 = vmul.f32 %v273_v7, %v4641_v55  ;;  %v289_v55 = vmul.f32 %v4763_v26, %v288_v17  ;;  %v208_v35 = vmul.f32 %v174_v34, %v4597_v24  ;;  %614 = vmatpush.bf16.msra.mxu1 %v4113_v5  ;;  %4124 = vmatpush.bf16.msra.mxu3 %v4113_v5 }
 0x122   :  { %v277_v61 = vmul.f32 0.5, %v276_v11  ;;  %194 = vadd.xlane.f32.xlu2 %v193_v12  ;;  %759 = vmatpush.bf16.msrb.mxu2 %v4113_v5 }
 0x123   :  { %v414_v41 = vmul.f32 %v4751_v15, %v397_v13  ;;  %v293_v22 = vsel %vm292_vm4, %v4763_v26, %v289_v55  ;;  %v224_v36 = vadd.f32 1e-05, %v208_v35 }
 0x124   :  { %v278_v14 = vsub.f32 1.5, %v277_v61  ;;  %v399_v23 = vmul.f32 %v293_v22, %v4613_v38 }
 0x125   :  { %v431_v19 = vadd.f32 %v4761_v25, %v414_v41  ;;  %4143 = vrsqrt.f32 %v224_v36  ;;  %vm300_vm5 = vweird.f32 %v224_v36 }
 0x126   :  { %v279_v20 = vmul.f32 %v4142_v59, %v278_v14  ;;  %v416_v30 = vmul.f32 %v4751_v15, %v399_v23 }
 0x127   :  { %v445_v21 = vpack.c.bf16 %v431_v19, %v430_v18 }
 0x128   :  { %v283_v28 = vsel %vm282_vm3, %v4142_v59, %v279_v20  ;;  %v433_v32 = vadd.f32 %v4761_v25, %v416_v30  ;;  %v183_v26 = vpop.xlane.xlu2 %182 }
 0x129   :  { %3960 = vmatmul.msk.bf16.gmra.mxu0 %vm50_vm0, %v445_v21  ;;  %v398_v56 = vmul.f32 %v283_v28, %v4662_v3  ;;  %v211_v3 = vmul.f32 %v183_v26, %v4597_v24 }
 0x12b   :  { %v415_v29 = vmul.f32 %v4751_v15, %v398_v56  ;;  %v4814_v38 = vadd.f32 1e-05, %v211_v3  ;;  %v4144_v40 = vpop.eup %4143 }
 0x12c   :  { %v295_v42 = vmul.f32 %v4144_v40, %v224_v36  ;;  %vm301_vm6 = vweird.f32 %v4144_v40 }
 0x12d   :  { %v432_v31 = vadd.f32 %v4761_v25, %v415_v29  ;;  %4145 = vrsqrt.f32 %v4814_v38  ;;  %vm4838_vm7 = vmor %vm300_vm5, %vm301_vm6  ;;  %vm330_vm10 = vweird.f32 %v4814_v38 }
 0x12e   :  { %v296_v43 = vmul.f32 %v4144_v40, %v295_v42 }
 0x12f   :  { %v446_v33 = vpack.c.bf16 %v433_v32, %v432_v31 }
 0x130   :  { %v186_v45 = vpop.xlane.xlu2 %185  ;;  %v297_v49 = vmul.f32 0.5, %v296_v43 }
 0x131   :  { %v212_v50 = vmul.f32 %v186_v45, %v4597_v24 }
 0x132   :  { %v298_v57 = vsub.f32 1.5, %v297_v49 }
 0x133   :  { %v4818_v8 = vpop.eup %4145  ;;  %v4826_v58 = vadd.f32 1e-05, %v212_v50 }
 0x134   :  { %v325_v53 = vmul.f32 %v4818_v8, %v4814_v38  ;;  %v299_v11 = vmul.f32 %v4144_v40, %v298_v57  ;;  %vm331_vm11 = vweird.f32 %v4818_v8 }
 0x135   :  { %vm4860_vm13 = vmor %vm330_vm10, %vm331_vm11  ;;  %vm340_vm4 = vweird.f32 %v4826_v58 }
 0x136   :  { %v326_v59 = vmul.f32 %v4818_v8, %v325_v53  ;;  %v303_v14 = vsel %vm4838_vm7, %v4144_v40, %v299_v11 }
 0x137   :  { %v400_v29 = vmul.f32 %v303_v14, %v4636_v52 }
 0x138   :  { %v327_v17 = vmul.f32 0.5, %v326_v59 }
 0x139   :  { %3961 = vmatmul.msk.bf16.gmra.mxu0 %vm50_vm0, %v446_v33  ;;  %v417_v38 = vmul.f32 %v4751_v15, %v400_v29 }
 0x13a   :  { %v328_v55 = vsub.f32 1.5, %v327_v17 }
 0x13c   :  { %v329_v33 = vmul.f32 %v4818_v8, %v328_v55 }
 0x13e   :  { %v333_v42 = vsel %vm4860_vm13, %v4818_v8, %v329_v33 }
 0x13f   :  { %v403_v8 = vmul.f32 %v333_v42, %v4655_v63 }
 0x141   :  { %v420_v11 = vmul.f32 %v4751_v15, %v403_v8 }
 0x175   :  { %v177_v44 = vpop.xlane.xlu0 %176 }
 0x176   :  { %v209_v46 = vmul.f32 %v177_v44, %v4597_v24 }
 0x178   :  { %v225_v47 = vadd.f32 1e-05, %v209_v46 }
 0x17a   :  { %4147 = vrsqrt.f32 %v225_v47  ;;  %vm310_vm8 = vweird.f32 %v225_v47 }
 0x17b   :  { %4149 = vrsqrt.f32 %v4826_v58 }
 0x17d   :  { %v95_v51 = vpop.xlane.xlu0 %94  ;;  %v180_v62 = vpop.xlane.xlu1 %179 }
 0x17e   :  { %v120_v1 = vmul.f32 %v4597_v24, %v95_v51  ;;  %v210_v2 = vmul.f32 %v180_v62, %v4597_v24 }
 0x180   :  { %v4148_v6 = vpop.eup %4147  ;;  %v4835_v7 = vsub.f32 %v4709_v37, %v120_v1  ;;  %v226_v13 = vadd.f32 1e-05, %v210_v2 }
 0x181   :  { %v305_v12 = vmul.f32 %v4148_v6, %v225_v47  ;;  %v4848_v28 = vpop.eup %4149  ;;  %vm311_vm9 = vweird.f32 %v4148_v6 }
 0x182   :  { %v152_v61 = vmul.f32 %v4835_v7, %v4835_v7  ;;  %4151 = vrsqrt.f32 %v226_v13  ;;  %v335_v34 = vmul.f32 %v4848_v28, %v4826_v58  ;;  %vm312_vm12 = vmor %vm310_vm8, %vm311_vm9  ;;  %vm320_vm15 = vweird.f32 %v226_v13 }
 0x183   :  { %v306_v41 = vmul.f32 %v4148_v6, %v305_v12  ;;  %vm341_vm5 = vweird.f32 %v4848_v28  ;;  %v4893_v58 = vperm.slane %v4736_v4, 2 }
 0x184   :  { %v196_v37 = vsel %vm50_vm0, %v152_v61, 0.0  ;;  %v336_v43 = vmul.f32 %v4848_v28, %v335_v34  ;;  %vm342_vm7 = vmor %vm340_vm4, %vm341_vm5  ;;  %vm1616_vm5 = vcmask 523264  }
 0x185   :  { %v307_v18 = vmul.f32 0.5, %v306_v41  ;;  %197 = vadd.xlane.f32.xlu0 %v196_v37  ;;  %v189_v19 = vpop.xlane.xlu0 %188  ;;  %v98_v20 = vpop.xlane.xlu1 %97 }
 0x186   :  { %v213_v21 = vmul.f32 %v189_v19, %v4597_v24  ;;  %v121_v56 = vmul.f32 %v4597_v24, %v98_v20  ;;  %v337_v51 = vmul.f32 0.5, %v336_v43 }
 0x187   :  { %v308_v22 = vsub.f32 1.5, %v307_v18  ;;  %v437_v18 = vadd.f32 %v4761_v25, %v420_v11 }
 0x188   :  { %v229_v23 = vadd.f32 1e-05, %v213_v21  ;;  %v4152_v30 = vpop.eup %4151  ;;  %v4855_v32 = vsub.f32 %v4746_v10, %v121_v56  ;;  %v338_v12 = vsub.f32 1.5, %v337_v51 }
 0x189   :  { %v309_v31 = vmul.f32 %v4148_v6, %v308_v22  ;;  %v315_v35 = vmul.f32 %v4152_v30, %v226_v13  ;;  %vm321_vm14 = vweird.f32 %v4152_v30 }
 0x18a   :  { %4153 = vrsqrt.f32 %v229_v23  ;;  %v153_v52 = vmul.f32 %v4855_v32, %v4855_v32  ;;  %vm322_vm1 = vmor %vm320_vm15, %vm321_vm14  ;;  %vm350_vm2 = vweird.f32 %v229_v23  ;;  %v339_v19 = vmul.f32 %v4848_v28, %v338_v12 }
 0x18b   :  { %v313_v26 = vsel %vm312_vm12, %v4148_v6, %v309_v31  ;;  %v316_v3 = vmul.f32 %v4152_v30, %v315_v35 }
 0x18c   :  { %v401_v10 = vmul.f32 %v313_v26, %v4700_v27  ;;  %v199_v40 = vsel %vm50_vm0, %v153_v52, 0.0  ;;  %v434_v27 = vadd.f32 %v4761_v25, %v417_v38  ;;  %v343_v22 = vsel %vm342_vm7, %v4848_v28, %v339_v19 }
 0x18d   :  { %v317_v44 = vmul.f32 0.5, %v316_v3  ;;  %200 = vadd.xlane.f32.xlu1 %v199_v40  ;;  %v192_v45 = vpop.xlane.xlu1 %191  ;;  %v404_v34 = vmul.f32 %v343_v22, %v4675_v0 }
 0x18e   :  { %v418_v46 = vmul.f32 %v4751_v15, %v401_v10  ;;  %v214_v47 = vmul.f32 %v192_v45, %v4597_v24 }
 0x18f   :  { %v318_v50 = vsub.f32 1.5, %v317_v44 }
 0x190   :  { %v4154_v49 = vpop.eup %4153  ;;  %v435_v53 = vadd.f32 %v4761_v25, %v418_v46  ;;  %v4877_v57 = vadd.f32 1e-05, %v214_v47 }
 0x191   :  { %v345_v54 = vmul.f32 %v4154_v49, %v229_v23  ;;  %v319_v59 = vmul.f32 %v4152_v30, %v318_v50  ;;  %vm351_vm3 = vweird.f32 %v4154_v49 }
 0x192   :  { %v447_v62 = vpack.c.bf16 %v435_v53, %v434_v27  ;;  %4155 = vrsqrt.f32 %v4877_v57  ;;  %vm352_vm6 = vmor %vm350_vm2, %vm351_vm3  ;;  %vm360_vm10 = vweird.f32 %v4877_v57 }
 0x193   :  { %v346_v1 = vmul.f32 %v4154_v49, %v345_v54  ;;  %v323_v2 = vsel %vm322_vm1, %v4152_v30, %v319_v59 }
 0x194   :  { %3962 = vmatmul.msk.bf16.gmra.mxu0 %vm50_vm0, %v447_v62  ;;  %v402_v6 = vmul.f32 %v323_v2, %v4716_v48 }
 0x195   :  { %v347_v5 = vmul.f32 0.5, %v346_v1  ;;  %v195_v63 = vpop.xlane.xlu2 %194 }
 0x196   :  { %v215_v13 = vmul.f32 %v195_v63, %v4597_v24  ;;  %v502_v17 = vpop.f32.mrf.mxu0  ;;  %v419_v61 = vmul.f32 %v4751_v15, %v402_v6 }
 0x197   :  { %v348_v16 = vsub.f32 1.5, %v347_v5  ;;  %v4899_v30 = vadd.f32 %v502_v17, %v4893_v58 }
 0x198   :  { %v4156_v41 = vpop.eup %4155  ;;  %v231_v48 = vadd.f32 1e-05, %v215_v13  ;;  %v436_v14 = vadd.f32 %v4761_v25, %v419_v61 }
 0x199   :  { %v349_v37 = vmul.f32 %v4154_v49, %v348_v16  ;;  %v355_v55 = vmul.f32 %v4156_v41, %v4877_v57  ;;  %vm361_vm11 = vweird.f32 %v4156_v41 }
 0x19a   :  { %4157 = vrsqrt.f32 %v231_v48  ;;  %v448_v20 = vpack.c.bf16 %v437_v18, %v436_v14  ;;  %vm370_vm8 = vweird.f32 %v231_v48  ;;  %vm362_vm13 = vmor %vm360_vm10, %vm361_vm11 }
 0x19b   :  { %v353_v21 = vsel %vm352_vm6, %v4154_v49, %v349_v37  ;;  %v356_v56 = vmul.f32 %v4156_v41, %v355_v55 }
 0x19c   :  { %3963 = vmatmul.msk.bf16.vlgmr.msra.gmra.mxu2 %vm50_vm0, %v448_v20  ;;  %v405_v29 = vmul.f32 %v353_v21, %v4741_v9  ;;  %v421_v9 = vmul.f32 %v4751_v15, %v404_v34 }
 0x19d   :  { %v357_v35 = vmul.f32 0.5, %v356_v56 }
 0x19e   :  { %v504_v23 = vpop.f32.mrf.mxu0  ;;  %v422_v28 = vmul.f32 %v4751_v15, %v405_v29  ;;  %v438_v40 = vadd.f32 %v4761_v25, %v421_v9 }
 0x19f   :  { %v4902_v31 = vadd.f32 %v504_v23, %v4893_v58  ;;  %v358_v52 = vsub.f32 1.5, %v357_v35 }
 0x1a0   :  { %v4158_v33 = vpop.eup %4157  ;;  %v439_v10 = vadd.f32 %v4761_v25, %v422_v28 }
 0x1a1   :  { %v365_v4 = vmul.f32 %v4158_v33, %v231_v48  ;;  %v563_v36 = vpack.c.bf16 %v4902_v31, %v4899_v30  ;;  %vm371_vm9 = vweird.f32 %v4158_v33  ;;  %v359_v42 = vmul.f32 %v4156_v41, %v358_v52 }
 0x1a2   :  { %vm372_vm12 = vmor %vm370_vm8, %vm371_vm9  ;;  %v449_v44 = vpack.c.bf16 %v439_v10, %v438_v40 }
 0x1a3   :  { %v366_v26 = vmul.f32 %v4158_v33, %v365_v4  ;;  %712 = vrot.lane.b32.xlu2 %v563_v36, %s4502_s5  ;;  %3983 = vmatmul.msk.bf16.vlgmr.msra.gmra.mxu1 %vm50_vm0, %v563_v36  ;;  %v363_v46 = vsel %vm362_vm13, %v4156_v41, %v359_v42 }
 0x1a4   :  { %v406_v53 = vmul.f32 %v363_v46, %v4770_v39 }
 0x1a5   :  { %v367_v3 = vmul.f32 0.5, %v366_v26 }
 0x1a6   :  { %v507_v0 = vpop.f32.mrf.mxu0  ;;  %v423_v8 = vmul.f32 %v4751_v15, %v406_v53  ;;  %v4996_v53 = vld [vmem:[%s7189_s6 + $0x8] sm:$0xff] }
 0x1a7   :  { %v368_v38 = vsub.f32 1.5, %v367_v3  ;;  %v4917_v50 = vadd.f32 %v507_v0, %v4893_v58  ;;  %v4963_v3 = vld [vmem:[%s7188_s7] sm:$0xf] }
 0x1a8   :  { %v440_v59 = vadd.f32 %v4761_v25, %v423_v8  ;;  %v948_v42 = vrot.slane %v4963_v3, 2 }
 0x1a9   :  { %v369_v43 = vmul.f32 %v4158_v33, %v368_v38  ;;  %v947_v38 = vrot.slane %v4963_v3, 1 }
 0x1ab   :  { %v373_v45 = vsel %vm372_vm12, %v4158_v33, %v369_v43  ;;  %v4984_v46 = vperm.slane %v947_v38, 0 }
 0x1ac   :  { %3964 = vmatmul.msk.bf16.gmra.mxu2 %vm50_vm0, %v449_v44  ;;  %v407_v49 = vmul.f32 %v373_v45, %v4789_v60  ;;  %v949_v44 = vrot.slane %v4963_v3, 3 }
 0x1ad   :  { %7268 = vst [vmem:[#allocation3_spill] sm:$0xff] %v4984_v46 }
 0x1ae   :  { %v509_v47 = vpop.f32.mrf.mxu0  ;;  %v424_v57 = vmul.f32 %v4751_v15, %v407_v49  ;;  %v4991_v49 = vld [vmem:[%s7189_s6 + $0x48] sm:$0xff] }
 0x1af   :  { %v4920_v27 = vadd.f32 %v509_v47, %v4893_v58  ;;  %v4986_v47 = vperm.slane %v948_v42, 0 }
 0x1b0   :  { %v441_v51 = vadd.f32 %v4761_v25, %v424_v57 }
 0x1b1   :  { %v564_v54 = vpack.c.bf16 %v4920_v27, %v4917_v50  ;;  %7269 = vst [vmem:[#allocation4_spill] sm:$0xff] %v4986_v47 }
 0x1b2   :  { %v450_v62 = vpack.c.bf16 %v441_v51, %v440_v59 }
 0x1b3   :  { %3984 = vmatmul.msk.bf16.gmra.mxu1 %vm50_vm0, %v564_v54  ;;  %714 = vrot.lane.b32.xlu0 %v564_v54, %s4502_s5  ;;  %v4998_v54 = vperm.slane %v949_v44, 0 }
 0x1b5   :  { %7270 = vst [vmem:[#allocation5_spill] sm:$0xff] %v4998_v54 }
 0x1b6   :  { %v512_v60 = vpop.f32.mrf.mxu0 }
 0x1b7   :  { %v4933_v1 = vadd.f32 %v512_v60, %v4893_v58 }
 0x1bc   :  { %3965 = vmatmul.msk.bf16.gmra.mxu2 %vm50_vm0, %v450_v62 }
 0x1be   :  { %v514_v39 = vpop.f32.mrf.mxu0 }
 0x1bf   :  { %v4936_v2 = vadd.f32 %v514_v39, %v4893_v58  ;;  %v657_v39 = vmul.f32 %v4996_v53, %v4902_v31 }
 0x1c1   :  { %v565_v5 = vpack.c.bf16 %v4936_v2, %v4933_v1 }
 0x1c3   :  { %3985 = vmatmul.msk.bf16.gmra.mxu1 %vm50_vm0, %v565_v5  ;;  %716 = vrot.lane.b32.xlu1 %v565_v5, %s4502_s5 }
 0x1f8   :  { %v198_v6 = vpop.xlane.xlu0 %197 }
 0x1f9   :  { %v216_v11 = vmul.f32 %v198_v6, %v4597_v24 }
 0x1fb   :  { %v232_v12 = vadd.f32 1e-05, %v216_v11 }
 0x1fd   :  { %4159 = vrsqrt.f32 %v232_v12  ;;  %vm380_vm14 = vweird.f32 %v232_v12 }
 0x200   :  { %v201_v63 = vpop.xlane.xlu1 %200 }
 0x201   :  { %v217_v16 = vmul.f32 %v201_v63, %v4597_v24 }
 0x203   :  { %v4160_v13 = vpop.eup %4159  ;;  %v233_v61 = vadd.f32 1e-05, %v217_v16 }
 0x204   :  { %v375_v17 = vmul.f32 %v4160_v13, %v232_v12  ;;  %vm381_vm15 = vweird.f32 %v4160_v13 }
 0x205   :  { %4161 = vrsqrt.f32 %v233_v61  ;;  %vm382_vm1 = vmor %vm380_vm14, %vm381_vm15  ;;  %vm390_vm3 = vweird.f32 %v233_v61 }
 0x206   :  { %v376_v41 = vmul.f32 %v4160_v13, %v375_v17 }
 0x208   :  { %v377_v37 = vmul.f32 0.5, %v376_v41  ;;  %v713_v41 = vpop.permute.xlu2 %712 }
 0x20a   :  { %v378_v48 = vsub.f32 1.5, %v377_v37  ;;  %v5030_v37 = vld [vmem:[%s7189_s6 + $0x50] sm:$0xff] }
 0x20b   :  { %v4162_v14 = vpop.eup %4161 }
 0x20c   :  { %v379_v18 = vmul.f32 %v4160_v13, %v378_v48  ;;  %v385_v19 = vmul.f32 %v4162_v14, %v233_v61  ;;  %vm391_vm2 = vweird.f32 %v4162_v14 }
 0x20d   :  { %vm392_vm4 = vmor %vm390_vm3, %vm391_vm2 }
 0x20e   :  { %v386_v55 = vmul.f32 %v4162_v14, %v385_v19  ;;  %v383_v20 = vsel %vm382_vm1, %v4160_v13, %v379_v18  ;;  %v5036_v18 = vld [vmem:[%s7189_s6 + $0x10] sm:$0xff] }
 0x20f   :  { %v408_v23 = vmul.f32 %v383_v20, %v4835_v7 }
 0x210   :  { %v387_v21 = vmul.f32 0.5, %v386_v55 }
 0x211   :  { %v517_v22 = vpop.f32.mrf.mxu0  ;;  %v425_v35 = vmul.f32 %v4751_v15, %v408_v23 }
 0x212   :  { %v388_v56 = vsub.f32 1.5, %v387_v21  ;;  %v4948_v36 = vadd.f32 %v517_v22, %v4893_v58 }
 0x213   :  { %v442_v9 = vadd.f32 %v4761_v25, %v425_v35 }
 0x214   :  { %v389_v29 = vmul.f32 %v4162_v14, %v388_v56 }
 0x216   :  { %v393_v33 = vsel %vm392_vm4, %v4162_v14, %v389_v29 }
 0x217   :  { %v409_v34 = vmul.f32 %v393_v33, %v4855_v32 }
 0x219   :  { %v519_v4 = vpop.f32.mrf.mxu0  ;;  %v426_v26 = vmul.f32 %v4751_v15, %v409_v34  ;;  %v4968_v15 = vld [vmem:[%s7189_s6 + $0x40] sm:$0xff]  ;;  %v658_v34 = vmul.f32 %v5036_v18, %v4917_v50 }
 0x21a   :  { %v4951_v28 = vadd.f32 %v519_v4, %v4893_v58 }
 0x21b   :  { %v443_v52 = vadd.f32 %v4761_v25, %v426_v26  ;;  %v4974_v25 = vld [vmem:[%s7189_s6] sm:$0xff] }
 0x21c   :  { %v566_v7 = vpack.c.bf16 %v4951_v28, %v4948_v36  ;;  %v656_v43 = vmul.f32 %v4974_v25, %v4899_v30 }
 0x21d   :  { %v451_v32 = vpack.c.bf16 %v443_v52, %v442_v9 }
 0x21e   :  { %718 = vrot.lane.b32.xlu2 %v566_v7, %s4502_s5  ;;  %3986 = vmatmul.msk.bf16.gmra.mxu1 %vm50_vm0, %v566_v7 }
 0x21f   :  { %v522_v0 = vpop.f32.mrf.mxu2  ;;  %3966 = vmatmul.msk.bf16.gmra.mxu2 %vm50_vm0, %v451_v32  ;;  %v5064_v32 = vld [vmem:[%s7189_s6 + $0x58] sm:$0xff] }
 0x220   :  { %v616_v10 = vpop.f32.mrf.mxu1  ;;  %v5001_v8 = vadd.f32 %v522_v0, %v4893_v58  ;;  %v5069_v0 = vld [vmem:[%s7189_s6 + $0x18] sm:$0xff] }
 0x221   :  { %v672_v40 = vmul.f32 %v4968_v15, %v616_v10 }
 0x222   :  { %7271 = vst [vmem:[#allocation6_spill] sm:$0xff] %v5001_v8 }
 0x223   :  { %v4982_v45 = vadd.f32 %v672_v40, %v656_v43 }
 0x225   :  { %v966_v59 = vmul.f32 %v4984_v46, %v4982_v45  ;;  %v974_v5 = vmul.f32 %v4986_v47, %v4982_v45  ;;  %v982_v11 = vmul.f32 %v4998_v54, %v4982_v45 }
 0x227   :  { %v524_v57 = vpop.f32.mrf.mxu2  ;;  %v1030_v63 = vpack.c.bf16 %v966_v59, %v966_v59  ;;  %v1038_v17 = vpack.c.bf16 %v974_v5, %v974_v5  ;;  %v1046_v48 = vpack.c.bf16 %v982_v11, %v982_v11 }
 0x228   :  { %v5004_v60 = vadd.f32 %v524_v57, %v4893_v58  ;;  %v618_v51 = vpop.f32.mrf.mxu1  ;;  %v659_v57 = vmul.f32 %v5069_v0, %v4920_v27 }
 0x229   :  { %v673_v62 = vmul.f32 %v4991_v49, %v618_v51  ;;  %v5038_v22 = vunpack.c.l.b16 %v1030_v63  ;;  %v5043_v29 = vunpack.c.l.b16 %v1038_v17  ;;  %v5049_v35 = vunpack.c.l.b16 %v1046_v48  ;;  %v5101_v17 = vld [vmem:[%s7189_s6 + $0x60] sm:$0xff] }
 0x22a   :  { %v567_v6 = vpack.c.bf16 %v5004_v60, %v5001_v8  ;;  %v5107_v48 = vld [vmem:[%s7189_s6 + $0x20] sm:$0xff] }
 0x22b   :  { %v5017_v12 = vadd.f32 %v673_v62, %v657_v39  ;;  %7272 = vst [vmem:[#allocation7_spill] sm:$0xff] %v5038_v22 }
 0x22c   :  { %3987 = vmatmul.msk.bf16.vlgmr.msra.gmra.mxu3 %vm50_vm0, %v567_v6  ;;  %720 = vrot.lane.b32.xlu0 %v567_v6, %s4502_s5  ;;  %7274 = vst [vmem:[#allocation9_spill] sm:$0xff] %v5043_v29 }
 0x22d   :  { %v967_v16 = vmul.f32 %v4984_v46, %v5017_v12  ;;  %v975_v13 = vmul.f32 %v4986_v47, %v5017_v12  ;;  %v983_v61 = vmul.f32 %v4998_v54, %v5017_v12  ;;  %7276 = vst [vmem:[#allocation11_spill] sm:$0xff] %v5049_v35 }
 0x22f   :  { %v527_v14 = vpop.f32.mrf.mxu2  ;;  %3991 = vmatmul.msk.bf16.vlgmr.msrb.gmra.mxu2 %vm50_vm0, %v713_v41  ;;  %v1031_v19 = vpack.c.bf16 %v967_v16, %v967_v16  ;;  %v1039_v55 = vpack.c.bf16 %v975_v13, %v975_v13  ;;  %v1047_v20 = vpack.c.bf16 %v983_v61, %v983_v61  ;;  %v715_v13 = vpop.permute.xlu0 %714 }
 0x230   :  { %v621_v21 = vpop.f32.mrf.mxu1  ;;  %v5072_v38 = vadd.f32 %v527_v14, %v4893_v58 }
 0x231   :  { %v674_v56 = vmul.f32 %v5030_v37, %v621_v21  ;;  %v5041_v23 = vunpack.c.l.b16 %v1031_v19  ;;  %v5045_v33 = vunpack.c.l.b16 %v1039_v55  ;;  %v5051_v4 = vunpack.c.l.b16 %v1047_v20 }
 0x233   :  { %7273 = vst [vmem:[#allocation8_spill] sm:$0xff] %v5041_v23  ;;  %v5057_v9 = vadd.f32 %v674_v56, %v658_v34 }
 0x234   :  { %7275 = vst [vmem:[#allocation10_spill] sm:$0xff] %v5045_v33 }
 0x235   :  { %7277 = vst [vmem:[#allocation12_spill] sm:$0xff] %v5051_v4  ;;  %v968_v43 = vmul.f32 %v4984_v46, %v5057_v9  ;;  %v976_v51 = vmul.f32 %v4986_v47, %v5057_v9  ;;  %v984_v62 = vmul.f32 %v4998_v54, %v5057_v9  ;;  %v717_v26 = vpop.permute.xlu1 %716 }
 0x237   :  { %v529_v10 = vpop.f32.mrf.mxu2  ;;  %v1032_v5 = vpack.c.bf16 %v968_v43, %v968_v43  ;;  %v1040_v63 = vpack.c.bf16 %v976_v51, %v976_v51  ;;  %v1048_v61 = vpack.c.bf16 %v984_v62, %v984_v62  ;;  %v660_v43 = vmul.f32 %v5107_v48, %v4933_v1  ;;  %v5127_v51 = vld [vmem:[%s7189_s6 + $0x30] sm:$0xff] }
 0x238   :  { %v5075_v40 = vadd.f32 %v529_v10, %v4893_v58  ;;  %v623_v42 = vpop.f32.mrf.mxu1 }
 0x239   :  { %v675_v44 = vmul.f32 %v5064_v32, %v623_v42  ;;  %v5109_v21 = vunpack.c.l.b16 %v1032_v5  ;;  %v5114_v10 = vunpack.c.l.b16 %v1040_v63  ;;  %v5147_v63 = vld [vmem:[%s7189_s6 + $0x28] sm:$0xff] }
 0x23a   :  { %v568_v59 = vpack.c.bf16 %v5075_v40, %v5072_v38 }
 0x23b   :  { %v5088_v39 = vadd.f32 %v675_v44, %v659_v57  ;;  %7278 = vst [vmem:[#allocation13_spill] sm:$0xff] %v5109_v21  ;;  %v5120_v44 = vunpack.c.l.b16 %v1048_v61 }
 0x23c   :  { %722 = vrot.lane.b32.xlu2 %v568_v59, %s4502_s5  ;;  %3988 = vmatmul.msk.bf16.gmra.mxu3 %vm50_vm0, %v568_v59  ;;  %7280 = vst [vmem:[#allocation15_spill] sm:$0xff] %v5114_v10 }
 0x23d   :  { %v969_v6 = vmul.f32 %v4984_v46, %v5088_v39  ;;  %v977_v11 = vmul.f32 %v4986_v47, %v5088_v39  ;;  %v985_v16 = vmul.f32 %v4998_v54, %v5088_v39  ;;  %7282 = vst [vmem:[#allocation17_spill] sm:$0xff] %v5120_v44 }
 0x23f   :  { %v532_v41 = vpop.f32.mrf.mxu2  ;;  %3992 = vmatmul.msk.bf16.gmra.mxu2 %vm50_vm0, %v715_v13  ;;  %v1033_v14 = vpack.c.bf16 %v969_v6, %v969_v6  ;;  %v1041_v19 = vpack.c.bf16 %v977_v11, %v977_v11  ;;  %v1049_v55 = vpack.c.bf16 %v985_v16, %v985_v16  ;;  %v5142_v11 = vld [vmem:[%s7189_s6 + $0x68] sm:$0xff] }
 0x240   :  { %v626_v20 = vpop.f32.mrf.mxu1  ;;  %v5150_v13 = vadd.f32 %v532_v41, %v4893_v58 }
 0x241   :  { %v676_v56 = vmul.f32 %v5101_v17, %v626_v20  ;;  %v5112_v34 = vunpack.c.l.b16 %v1033_v14  ;;  %v5116_v42 = vunpack.c.l.b16 %v1041_v19  ;;  %v5122_v57 = vunpack.c.l.b16 %v1049_v55 }
 0x243   :  { %7279 = vst [vmem:[#allocation14_spill] sm:$0xff] %v5112_v34  ;;  %v5135_v5 = vadd.f32 %v676_v56, %v660_v43  ;;  %v661_v56 = vmul.f32 %v5147_v63, %v4936_v2 }
 0x244   :  { %7281 = vst [vmem:[#allocation16_spill] sm:$0xff] %v5116_v42  ;;  %821 = vrot.lane.b32.xlu2 %v5127_v51, %s4503_s30 }
 0x245   :  { %7283 = vst [vmem:[#allocation18_spill] sm:$0xff] %v5122_v57  ;;  %v970_v19 = vmul.f32 %v4984_v46, %v5135_v5  ;;  %v978_v55 = vmul.f32 %v4986_v47, %v5135_v5  ;;  %v986_v43 = vmul.f32 %v4998_v54, %v5135_v5 }
 0x247   :  { %v534_v16 = vpop.f32.mrf.mxu2  ;;  %v1034_v6 = vpack.c.bf16 %v970_v19, %v970_v19  ;;  %v1042_v52 = vpack.c.bf16 %v978_v55, %v978_v55  ;;  %v1050_v59 = vpack.c.bf16 %v986_v43, %v986_v43  ;;  %v5192_v43 = vld [vmem:[%s7189_s6 + $0x38] sm:$0xff] }
 0x248   :  { %v5153_v61 = vadd.f32 %v534_v16, %v4893_v58  ;;  %v628_v14 = vpop.f32.mrf.mxu1 }
 0x249   :  { %v677_v20 = vmul.f32 %v5142_v11, %v628_v14  ;;  %v5177_v44 = vunpack.c.l.b16 %v1034_v6  ;;  %v5179_v19 = vunpack.c.l.b16 %v1042_v52  ;;  %v5185_v57 = vunpack.c.l.b16 %v1050_v59  ;;  %v5208_v59 = vld [vmem:[%s7189_s6 + $0x70] sm:$0xff] }
 0x24a   :  { %v569_v41 = vpack.c.bf16 %v5153_v61, %v5150_v13 }
 0x24b   :  { %v5166_v16 = vadd.f32 %v677_v20, %v661_v56  ;;  %7284 = vst [vmem:[#allocation19_spill] sm:$0xff] %v5177_v44 }
 0x24c   :  { %724 = vrot.lane.b32.xlu1 %v569_v41, %s4502_s5  ;;  %3989 = vmatmul.msk.bf16.gmra.mxu3 %vm50_vm0, %v569_v41  ;;  %7285 = vst [vmem:[#allocation20_spill] sm:$0xff] %v5179_v19 }
 0x24d   :  { %v971_v14 = vmul.f32 %v4984_v46, %v5166_v16  ;;  %v979_v62 = vmul.f32 %v4986_v47, %v5166_v16  ;;  %v987_v7 = vmul.f32 %v4998_v54, %v5166_v16  ;;  %7288 = vst [vmem:[#allocation23_spill] sm:$0xff] %v5185_v57 }
 0x24f   :  { %3993 = vmatmul.msk.bf16.gmra.mxu2 %vm50_vm0, %v717_v26  ;;  %v1035_v20 = vpack.c.bf16 %v971_v14, %v971_v14  ;;  %v1043_v56 = vpack.c.bf16 %v979_v62, %v979_v62  ;;  %v1051_v24 = vpack.c.bf16 %v987_v7, %v987_v7  ;;  %v662_v14 = vmul.f32 %v5127_v51, %v4948_v36 }
 0x250   :  { %v663_v26 = vmul.f32 %v5192_v43, %v4951_v28 }
 0x251   :  { %v5181_v55 = vunpack.c.l.b16 %v1035_v20  ;;  %v5183_v41 = vunpack.c.l.b16 %v1043_v56  ;;  %v5187_v35 = vunpack.c.l.b16 %v1051_v24 }
 0x253   :  { %7286 = vst [vmem:[#allocation21_spill] sm:$0xff] %v5181_v55 }
 0x254   :  { %7287 = vst [vmem:[#allocation22_spill] sm:$0xff] %v5183_v41  ;;  %823 = vrot.lane.b32.xlu1 %v5192_v43, %s4503_s30 }
 0x255   :  { %7289 = vst [vmem:[#allocation24_spill] sm:$0xff] %v5187_v35 }
 0x25c   :  { %817 = vrot.lane.b32.xlu1 %v5107_v48, %s4503_s30 }
 0x278   :  { %v719_v24 = vpop.permute.xlu2 %718 }
 0x279   :  { %3994 = vmatmul.msk.bf16.gmra.mxu2 %vm50_vm0, %v719_v24  ;;  %v5219_v24 = vld [vmem:[%s7189_s6 + $0x78] sm:$0xff]  ;;  %s4504_s6 = smov 64  }
 0x29b   :  { %v631_v62 = vpop.f32.mrf.mxu1 }
 0x29c   :  { %v678_v6 = vmul.f32 %v5208_v59, %v631_v62 }
 0x29e   :  { %v721_v20 = vpop.permute.xlu0 %720  ;;  %v5214_v56 = vadd.f32 %v678_v6, %v662_v14 }
 0x29f   :  { %3995 = vmatmul.msk.bf16.gmra.mxu2 %vm50_vm0, %v721_v20 }
 0x2a0   :  { %7290 = vst [vmem:[#allocation25_spill] sm:$0xff] %v5214_v56  ;;  %v972_v57 = vmul.f32 %v4984_v46, %v5214_v56  ;;  %v980_v20 = vmul.f32 %v4986_v47, %v5214_v56  ;;  %v988_v6 = vmul.f32 %v4998_v54, %v5214_v56 }
 0x2a2   :  { %v537_v52 = vpop.f32.mrf.mxu2  ;;  %v1036_v19 = vpack.c.bf16 %v972_v57, %v972_v57  ;;  %v1044_v41 = vpack.c.bf16 %v980_v20, %v980_v20  ;;  %v1052_v42 = vpack.c.bf16 %v988_v6, %v988_v6 }
 0x2a3   :  { %v633_v7 = vpop.f32.mrf.mxu1  ;;  %v5233_v35 = vadd.f32 %v537_v52, %v4893_v58 }
 0x2a4   :  { %v679_v62 = vmul.f32 %v5219_v24, %v633_v7  ;;  %v5250_v57 = vunpack.c.l.b16 %v1036_v19  ;;  %v5252_v20 = vunpack.c.l.b16 %v1044_v41  ;;  %v5254_v34 = vunpack.c.l.b16 %v1052_v42  ;;  %v723_v19 = vpop.permute.xlu2 %722 }
 0x2a5   :  { %v2399_v52 = vpack.c.bf16 %v5233_v35, %v5233_v35 }
 0x2a6   :  { %v5230_v14 = vadd.f32 %v679_v62, %v663_v26  ;;  %7294 = vst [vmem:[#allocation29_spill] sm:$0xff] %v5250_v57 }
 0x2a7   :  { %7295 = vst [vmem:[#allocation30_spill] sm:$0xff] %v5252_v20  ;;  %v5270_v41 = vunpack.c.l.b16 %v2399_v52 }
 0x2a8   :  { %7291 = vst [vmem:[#allocation26_spill] sm:$0xff] %v5230_v14  ;;  %v973_v4 = vmul.f32 %v4984_v46, %v5230_v14  ;;  %v981_v7 = vmul.f32 %v4986_v47, %v5230_v14  ;;  %v989_v10 = vmul.f32 %v4998_v54, %v5230_v14 }
 0x2a9   :  { %7296 = vst [vmem:[#allocation31_spill] sm:$0xff] %v5254_v34 }
 0x2aa   :  { %v1037_v29 = vpack.c.bf16 %v973_v4, %v973_v4  ;;  %v1045_v33 = vpack.c.bf16 %v981_v7, %v981_v7  ;;  %v539_v44 = vpop.f32.mrf.mxu2  ;;  %v1053_v26 = vpack.c.bf16 %v989_v10, %v989_v10  ;;  %7298 = vst [vmem:[#allocation33_spill] sm:$0xff] %v5270_v41 }
 0x2ab   :  { %v5242_v62 = vadd.f32 %v539_v44, %v4893_v58 }
 0x2ac   :  { %v5246_v55 = vunpack.c.l.b16 %v1037_v29  ;;  %v5248_v21 = vunpack.c.l.b16 %v1045_v33  ;;  %v5256_v4 = vunpack.c.l.b16 %v1053_v26  ;;  %v664_v26 = vmul.f32 %v4974_v25, %v5001_v8 }
 0x2ad   :  { %v570_v10 = vpack.c.bf16 %v5242_v62, %v5233_v35  ;;  %v2400_v58 = vpack.c.bf16 %v5242_v62, %v5242_v62 }
 0x2ae   :  { %7292 = vst [vmem:[#allocation27_spill] sm:$0xff] %v5246_v55 }
 0x2af   :  { %7293 = vst [vmem:[#allocation28_spill] sm:$0xff] %v5248_v21  ;;  %v636_v42 = vpop.f32.mrf.mxu3  ;;  %726 = vrot.lane.b32.xlu0 %v570_v10, %s4502_s5  ;;  %3990 = vmatmul.msk.bf16.gmra.mxu3 %vm50_vm0, %v570_v10  ;;  %v5272_v6 = vunpack.c.l.b16 %v2400_v58  ;;  %v665_v58 = vmul.f32 %v4996_v53, %v5004_v60 }
 0x2b0   :  { %7297 = vst [vmem:[#allocation32_spill] sm:$0xff] %v5256_v4  ;;  %v680_v7 = vmul.f32 %v4968_v15, %v636_v42  ;;  %3996 = vmatmul.msk.bf16.gmra.mxu2 %vm50_vm0, %v723_v19 }
 0x2b1   :  { %7299 = vst [vmem:[#allocation34_spill] sm:$0xff] %v5272_v6 }
 0x2b2   :  { %v5280_v33 = vpop.f32.mrf.mxu2  ;;  %v5282_v29 = vadd.f32 %v680_v7, %v664_v26 }
 0x2b4   :  { %7300 = vst [vmem:[#allocation35_spill] sm:$0xff] %v5282_v29  ;;  %v998_v52 = vmul.f32 %v4984_v46, %v5282_v29  ;;  %v1006_v19 = vmul.f32 %v4986_v47, %v5282_v29  ;;  %v1014_v42 = vmul.f32 %v4998_v54, %v5282_v29 }
 0x2b6   :  { %v1062_v44 = vpack.c.bf16 %v998_v52, %v998_v52  ;;  %v1070_v20 = vpack.c.bf16 %v1006_v19, %v1006_v19  ;;  %v1078_v57 = vpack.c.bf16 %v1014_v42, %v1014_v42  ;;  %v666_v42 = vmul.f32 %v5036_v18, %v5072_v38 }
 0x2b7   :  { %v638_v34 = vpop.f32.mrf.mxu3  ;;  %819 = vrot.lane.b32.xlu0 %v5147_v63, %s4503_s30 }
 0x2b8   :  { %v681_v10 = vmul.f32 %v4991_v49, %v638_v34  ;;  %v5305_v6 = vunpack.c.l.b16 %v1062_v44 }
 0x2ba   :  { %v5295_v7 = vpop.f32.mrf.mxu2  ;;  %v5297_v26 = vadd.f32 %v681_v10, %v665_v58  ;;  %7302 = vst [vmem:[#allocation37_spill] sm:$0xff] %v5305_v6  ;;  %v5311_v58 = vunpack.c.l.b16 %v1070_v20 }
 0x2bc   :  { %7301 = vst [vmem:[#allocation36_spill] sm:$0xff] %v5297_v26  ;;  %v999_v4 = vmul.f32 %v4984_v46, %v5297_v26  ;;  %v1007_v34 = vmul.f32 %v4986_v47, %v5297_v26  ;;  %v1015_v21 = vmul.f32 %v4998_v54, %v5297_v26  ;;  %v5317_v26 = vunpack.c.l.b16 %v1078_v57 }
 0x2bd   :  { %7304 = vst [vmem:[#allocation39_spill] sm:$0xff] %v5311_v58 }
 0x2be   :  { %v725_v55 = vpop.permute.xlu1 %724  ;;  %v1063_v22 = vpack.c.bf16 %v999_v4, %v999_v4  ;;  %v1071_v23 = vpack.c.bf16 %v1007_v34, %v1007_v34  ;;  %v1079_v29 = vpack.c.bf16 %v1015_v21, %v1015_v21  ;;  %7306 = vst [vmem:[#allocation41_spill] sm:$0xff] %v5317_v26 }
 0x2bf   :  { %v641_v41 = vpop.f32.mrf.mxu3 }
 0x2c0   :  { %v682_v52 = vmul.f32 %v5030_v37, %v641_v41  ;;  %3997 = vmatmul.msk.bf16.gmra.mxu2 %vm50_vm0, %v725_v55  ;;  %v5309_v10 = vunpack.c.l.b16 %v1063_v22  ;;  %v5313_v19 = vunpack.c.l.b16 %v1071_v23  ;;  %v5319_v4 = vunpack.c.l.b16 %v1079_v29 }
 0x2c1   :  { %v667_v41 = vmul.f32 %v5069_v0, %v5075_v40 }
 0x2c2   :  { %7303 = vst [vmem:[#allocation38_spill] sm:$0xff] %v5309_v10  ;;  %v5321_v21 = vpop.f32.mrf.mxu2  ;;  %v5327_v55 = vadd.f32 %v682_v52, %v666_v42 }
 0x2c3   :  { %7305 = vst [vmem:[#allocation40_spill] sm:$0xff] %v5313_v19 }
 0x2c4   :  { %7307 = vst [vmem:[#allocation42_spill] sm:$0xff] %v5319_v4  ;;  %v1000_v57 = vmul.f32 %v4984_v46, %v5327_v55  ;;  %v1008_v34 = vmul.f32 %v4986_v47, %v5327_v55  ;;  %v1016_v22 = vmul.f32 %v4998_v54, %v5327_v55 }
 0x2c5   :  { %7308 = vst [vmem:[#allocation43_spill] sm:$0xff] %v5327_v55 }
 0x2c6   :  { %v1064_v23 = vpack.c.bf16 %v1000_v57, %v1000_v57  ;;  %v1072_v26 = vpack.c.bf16 %v1008_v34, %v1008_v34  ;;  %v1080_v58 = vpack.c.bf16 %v1016_v22, %v1016_v22  ;;  %v668_v34 = vmul.f32 %v5107_v48, %v5150_v13 }
 0x2c7   :  { %v643_v20 = vpop.f32.mrf.mxu3 }
 0x2c8   :  { %v683_v29 = vmul.f32 %v5064_v32, %v643_v20  ;;  %v5350_v8 = vunpack.c.l.b16 %v1064_v23  ;;  %v5361_v14 = vunpack.c.l.b16 %v1080_v58  ;;  %v669_v23 = vmul.f32 %v5147_v63, %v5153_v61 }
 0x2ca   :  { %v5340_v52 = vpop.f32.mrf.mxu2  ;;  %v5342_v42 = vadd.f32 %v683_v29, %v667_v41  ;;  %7309 = vst [vmem:[#allocation44_spill] sm:$0xff] %v5350_v8  ;;  %v5355_v41 = vunpack.c.l.b16 %v1072_v26 }
 0x2cb   :  { %7313 = vst [vmem:[#allocation48_spill] sm:$0xff] %v5361_v14 }
 0x2cc   :  { %v1001_v44 = vmul.f32 %v4984_v46, %v5342_v42  ;;  %v1009_v20 = vmul.f32 %v4986_v47, %v5342_v42  ;;  %v1017_v4 = vmul.f32 %v4998_v54, %v5342_v42  ;;  %7311 = vst [vmem:[#allocation46_spill] sm:$0xff] %v5355_v41 }
 0x2ce   :  { %v1065_v19 = vpack.c.bf16 %v1001_v44, %v1001_v44  ;;  %v1073_v6 = vpack.c.bf16 %v1009_v20, %v1009_v20  ;;  %v1081_v10 = vpack.c.bf16 %v1017_v4, %v1017_v4 }
 0x2cf   :  { %v646_v55 = vpop.f32.mrf.mxu3 }
 0x2d0   :  { %v684_v29 = vmul.f32 %v5101_v17, %v646_v55  ;;  %v5353_v57 = vunpack.c.l.b16 %v1065_v19  ;;  %v5357_v56 = vunpack.c.l.b16 %v1073_v6  ;;  %v5363_v22 = vunpack.c.l.b16 %v1081_v10 }
 0x2d2   :  { %7310 = vst [vmem:[#allocation45_spill] sm:$0xff] %v5353_v57  ;;  %v771_v44 = vpop.f32.mrf.mxu2  ;;  %v5369_v19 = vadd.f32 %v684_v29, %v668_v34 }
 0x2d3   :  { %7312 = vst [vmem:[#allocation47_spill] sm:$0xff] %v5357_v56  ;;  %v853_v26 = vmul.f32 %v5101_v17, %v771_v44 }
 0x2d4   :  { %7314 = vst [vmem:[#allocation49_spill] sm:$0xff] %v5363_v22  ;;  %v1002_v10 = vmul.f32 %v4984_v46, %v5369_v19  ;;  %v1010_v58 = vmul.f32 %v4986_v47, %v5369_v19  ;;  %v1018_v29 = vmul.f32 %v4998_v54, %v5369_v19 }
 0x2d5   :  { %889 = vrot.lane.b32.xlu2 %v853_v26, %s4503_s30 }
 0x2d6   :  { %v1066_v6 = vpack.c.bf16 %v1002_v10, %v1002_v10  ;;  %v1074_v55 = vpack.c.bf16 %v1010_v58, %v1010_v58 }
 0x2d7   :  { %v648_v48 = vpop.f32.mrf.mxu3 }
 0x2d8   :  { %v685_v20 = vmul.f32 %v5142_v11, %v648_v48  ;;  %v1082_v48 = vpack.c.bf16 %v1018_v29, %v1018_v29  ;;  %v5394_v41 = vunpack.c.l.b16 %v1066_v6 }
 0x2da   :  { %v5384_v34 = vadd.f32 %v685_v20, %v669_v23  ;;  %v773_v44 = vpop.f32.mrf.mxu2  ;;  %7315 = vst [vmem:[#allocation50_spill] sm:$0xff] %v5394_v41  ;;  %v5402_v56 = vunpack.c.l.b16 %v1082_v48 }
 0x2db   :  { %v854_v26 = vmul.f32 %v5142_v11, %v773_v44  ;;  %v5396_v44 = vunpack.c.l.b16 %v1074_v55  ;;  %v851_v55 = vmul.f32 %v5030_v37, %v5321_v21  ;;  %v852_v21 = vmul.f32 %v5064_v32, %v5340_v52 }
 0x2dc   :  { %v1003_v4 = vmul.f32 %v4984_v46, %v5384_v34  ;;  %v1011_v14 = vmul.f32 %v4986_v47, %v5384_v34  ;;  %v1019_v63 = vmul.f32 %v4998_v54, %v5384_v34  ;;  %7319 = vst [vmem:[#allocation54_spill] sm:$0xff] %v5402_v56 }
 0x2dd   :  { %891 = vrot.lane.b32.xlu1 %v854_v26, %s4503_s30  ;;  %7316 = vst [vmem:[#allocation51_spill] sm:$0xff] %v5396_v44 }
 0x2de   :  { %v1067_v22 = vpack.c.bf16 %v1003_v4, %v1003_v4  ;;  %v1075_v23 = vpack.c.bf16 %v1011_v14, %v1011_v14  ;;  %v1083_v20 = vpack.c.bf16 %v1019_v63, %v1019_v63  ;;  %v5456_v14 = vpop.permute.xlu2 %821 }
 0x2e0   :  { %v5398_v10 = vunpack.c.l.b16 %v1067_v22  ;;  %v5400_v58 = vunpack.c.l.b16 %v1075_v23  ;;  %v5404_v8 = vunpack.c.l.b16 %v1083_v20  ;;  %v5441_v20 = vperm.slane %v4963_v3, 0 }
 0x2e2   :  { %7317 = vst [vmem:[#allocation52_spill] sm:$0xff] %v5398_v10 }
 0x2e3   :  { %7318 = vst [vmem:[#allocation53_spill] sm:$0xff] %v5400_v58 }
 0x2e4   :  { %7320 = vst [vmem:[#allocation55_spill] sm:$0xff] %v5404_v8 }
 0x2e5   :  { %885 = vrot.lane.b32.xlu1 %v851_v55, %s4503_s30 }
 0x2ed   :  { %811 = vrot.lane.b32.xlu1 %v4996_v53, %s4503_s30  ;;  %v849_v53 = vmul.f32 %v4968_v15, %v5280_v33 }
 0x2fc   :  { %v776_v22 = vpop.f32.mrf.mxu2 }
 0x2fd   :  { %v855_v6 = vmul.f32 %v5208_v59, %v776_v22 }
 0x2ff   :  { %893 = vrot.lane.b32.xlu0 %v855_v6, %s4503_s30 }
 0x304   :  { %v778_v26 = vpop.f32.mrf.mxu2 }
 0x305   :  { %v856_v63 = vmul.f32 %v5219_v24, %v778_v26  ;;  %v671_v26 = vmul.f32 %v5192_v43, %v5242_v62 }
 0x307   :  { %813 = vrot.lane.b32.xlu0 %v5036_v18, %s4503_s30  ;;  %895 = vrot.lane.b32.xlu2 %v856_v63, %s4503_s30  ;;  %v850_v18 = vmul.f32 %v4991_v49, %v5295_v7  ;;  %v5450_v63 = vpop.permute.xlu1 %823 }
 0x30f   :  { %887 = vrot.lane.b32.xlu0 %v852_v21, %s4503_s30  ;;  %815 = vrot.lane.b32.xlu2 %v5069_v0, %s4503_s30  ;;  %v670_v0 = vmul.f32 %v5127_v51, %v5233_v35 }
 0x317   :  { %881 = vrot.lane.b32.xlu0 %v849_v53, %s4503_s30  ;;  %809 = vrot.lane.b32.xlu2 %v4974_v25, %s4503_s30 }
 0x31f   :  { %883 = vrot.lane.b32.xlu2 %v850_v18, %s4503_s30 }
 0x321   :  { %v727_v48 = vpop.permute.xlu0 %726 }
 0x322   :  { %3998 = vmatmul.msk.bf16.gmra.mxu2 %vm50_vm0, %v727_v48 }
 0x332   :  { %v651_v52 = vpop.f32.mrf.mxu3 }
 0x333   :  { %v686_v23 = vmul.f32 %v5208_v59, %v651_v52 }
 0x335   :  { %v702_v33 = vadd.f32 %v686_v23, %v670_v0 }
 0x337   :  { %v996_v25 = vmul.f32 %v5441_v20, %v702_v33  ;;  %v1004_v7 = vmul.f32 %v4984_v46, %v702_v33  ;;  %v1012_v22 = vmul.f32 %v4986_v47, %v702_v33  ;;  %v1020_v6 = vmul.f32 %v4998_v54, %v702_v33 }
 0x339   :  { %v1060_v53 = vpack.c.bf16 %v996_v25, %v996_v25  ;;  %v1068_v3 = vpack.c.bf16 %v1004_v7, %v1004_v7  ;;  %v1076_v18 = vpack.c.bf16 %v1012_v22, %v1012_v22  ;;  %v1084_v48 = vpack.c.bf16 %v1020_v6, %v1020_v6 }
 0x33a   :  { %v653_v55 = vpop.f32.mrf.mxu3 }
 0x33b   :  { %v687_v51 = vmul.f32 %v5219_v24, %v653_v55  ;;  %v5458_v56 = vunpack.c.l.b16 %v1060_v53  ;;  %v5460_v25 = vunpack.c.l.b16 %v1068_v3  ;;  %v5462_v7 = vunpack.c.l.b16 %v1076_v18 }
 0x33c   :  { %v5464_v22 = vunpack.c.l.b16 %v1084_v48  ;;  %v5482_v48 = vpop.permute.xlu1 %817 }
 0x33d   :  { %v703_v21 = vadd.f32 %v687_v51, %v671_v26  ;;  %7321 = vst [vmem:[#allocation56_spill] sm:$0xff] %v5460_v25 }
 0x33e   :  { %7322 = vst [vmem:[#allocation57_spill] sm:$0xff] %v5462_v7 }
 0x33f   :  { %v997_v52 = vmul.f32 %v5441_v20, %v703_v21  ;;  %v1005_v0 = vmul.f32 %v4984_v46, %v703_v21  ;;  %v1013_v23 = vmul.f32 %v4986_v47, %v703_v21  ;;  %v1021_v33 = vmul.f32 %v4998_v54, %v703_v21  ;;  %7323 = vst [vmem:[#allocation58_spill] sm:$0xff] %v5464_v22  ;;  %v781_v22 = vpop.f32.mrf.mxu2 }
 0x340   :  { %v840_v46 = vmul.f32 %v5450_v63, %v4951_v28 }
 0x341   :  { %v1061_v43 = vpack.c.bf16 %v997_v52, %v997_v52  ;;  %v1069_v4 = vpack.c.bf16 %v1005_v0, %v1005_v0  ;;  %v1077_v55 = vpack.c.bf16 %v1013_v23, %v1013_v23  ;;  %v1085_v29 = vpack.c.bf16 %v1021_v33, %v1021_v33 }
 0x342   :  { %v837_v0 = vmul.f32 %v5482_v48, %v4933_v1 }
 0x343   :  { %v5466_v6 = vunpack.c.l.b16 %v1061_v43  ;;  %v5468_v26 = vunpack.c.l.b16 %v1069_v4  ;;  %v5470_v51 = vunpack.c.l.b16 %v1077_v55  ;;  %v5472_v21 = vunpack.c.l.b16 %v1085_v29  ;;  %v890_v4 = vpop.permute.xlu2 %889  ;;  %v5486_v29 = vpop.permute.xlu0 %819 }
 0x344   :  { %v933_v23 = vadd.f32 %v890_v4, %v837_v0  ;;  %v838_v33 = vmul.f32 %v5486_v29, %v4936_v2  ;;  %v839_v4 = vmul.f32 %v5456_v14, %v4948_v36 }
 0x345   :  { %7324 = vst [vmem:[#allocation59_spill] sm:$0xff] %v5468_v26 }
 0x346   :  { %7325 = vst [vmem:[#allocation60_spill] sm:$0xff] %v5470_v51  ;;  %v1090_v55 = vpack.c.bf16 %v933_v23, %v933_v23 }
 0x347   :  { %7326 = vst [vmem:[#allocation61_spill] sm:$0xff] %v5472_v21 }
 0x348   :  { %v1194_v3 = vunpack.c.l.b16 %v1090_v55 }
 0x34f   :  { %v892_v43 = vpop.permute.xlu1 %891 }
 0x350   :  { %v934_v53 = vadd.f32 %v892_v43, %v838_v33  ;;  %v783_v43 = vpop.f32.mrf.mxu2 }
 0x352   :  { %v1091_v52 = vpack.c.bf16 %v934_v53, %v934_v53 }
 0x354   :  { %v1195_v54 = vunpack.c.l.b16 %v1091_v52 }
 0x356   :  { %v1200_v47 = vpack.c.b16 %v1195_v54, %v1194_v3 }
 0x357   :  { %v886_v3 = vpop.permute.xlu1 %885 }
 0x358   :  { %1206 = vrot.lane.b32.xlu0 %v1200_v47, %s4502_s5  ;;  %v786_v51 = vpop.f32.mrf.mxu2 }
 0x360   :  { %v788_v26 = vpop.f32.mrf.mxu2 }
 0x361   :  { %v896_v18 = vpop.permute.xlu2 %895 }
 0x362   :  { %v936_v21 = vadd.f32 %v896_v18, %v840_v46 }
 0x364   :  { %v1093_v23 = vpack.c.bf16 %v936_v21, %v936_v21 }
 0x366   :  { %v1197_v52 = vunpack.c.l.b16 %v1093_v23 }
 0x369   :  { %v5493_v8 = vpop.permute.xlu2 %815 }
 0x36a   :  { %v836_v21 = vmul.f32 %v5493_v8, %v4920_v27 }
 0x371   :  { %v894_v0 = vpop.permute.xlu0 %893  ;;  %v5497_v55 = vpop.permute.xlu2 %809 }
 0x372   :  { %v935_v33 = vadd.f32 %v894_v0, %v839_v4  ;;  %v5506_v4 = vpop.permute.xlu1 %811 }
 0x374   :  { %v1092_v53 = vpack.c.bf16 %v935_v33, %v935_v33 }
 0x376   :  { %v1196_v54 = vunpack.c.l.b16 %v1092_v53 }
 0x378   :  { %v1201_v47 = vpack.c.b16 %v1197_v52, %v1196_v54  ;;  %v834_v52 = vmul.f32 %v5506_v4, %v4902_v31 }
 0x379   :  { %v5499_v7 = vpop.permute.xlu0 %813  ;;  %v884_v53 = vpop.permute.xlu2 %883 }
 0x37a   :  { %v835_v46 = vmul.f32 %v5499_v7, %v4917_v50  ;;  %1208 = vrot.lane.b32.xlu1 %v1201_v47, %s4502_s5  ;;  %v930_v44 = vadd.f32 %v884_v53, %v834_v52  ;;  %v859_v53 = vmul.f32 %v5030_v37, %v786_v51  ;;  %v860_v37 = vmul.f32 %v5064_v32, %v788_v26 }
 0x37c   :  { %v931_v18 = vadd.f32 %v886_v3, %v835_v46  ;;  %v833_v3 = vmul.f32 %v5497_v55, %v4899_v30  ;;  %v1087_v41 = vpack.c.bf16 %v930_v44, %v930_v44 }
 0x37e   :  { %v1088_v23 = vpack.c.bf16 %v931_v18, %v931_v18 }
 0x380   :  { %v1192_v25 = vunpack.c.l.b16 %v1088_v23 }
 0x381   :  { %v888_v0 = vpop.permute.xlu0 %887 }
 0x382   :  { %v932_v33 = vadd.f32 %v888_v0, %v836_v21  ;;  %v1191_v21 = vunpack.c.l.b16 %v1087_v41 }
 0x384   :  { %v1089_v54 = vpack.c.bf16 %v932_v33, %v932_v33  ;;  %v791_v33 = vpop.f32.mrf.mxu2 }
 0x386   :  { %v1193_v58 = vunpack.c.l.b16 %v1089_v54 }
 0x388   :  { %v1199_v47 = vpack.c.b16 %v1193_v58, %v1192_v25  ;;  %v858_v58 = vmul.f32 %v4991_v49, %v783_v43 }
 0x389   :  { %v882_v46 = vpop.permute.xlu0 %881 }
 0x38a   :  { %v929_v10 = vadd.f32 %v882_v46, %v833_v3  ;;  %1204 = vrot.lane.b32.xlu2 %v1199_v47, %s4502_s5 }
 0x38c   :  { %v1086_v18 = vpack.c.bf16 %v929_v10, %v929_v10  ;;  %v793_v23 = vpop.f32.mrf.mxu2  ;;  %v861_v10 = vmul.f32 %v5101_v17, %v791_v33 }
 0x38d   :  { %v862_v49 = vmul.f32 %v5142_v11, %v793_v23  ;;  %v959_v11 = vmul.f32 %v5441_v20, %v5017_v12  ;;  %v960_v12 = vmul.f32 %v5441_v20, %v5057_v9  ;;  %v848_v9 = vmul.f32 %v5450_v63, %v5242_v62 }
 0x38e   :  { %v1190_v0 = vunpack.c.l.b16 %v1086_v18  ;;  %v846_v63 = vmul.f32 %v5486_v29, %v5153_v61 }
 0x38f   :  { %v1023_v26 = vpack.c.bf16 %v959_v11, %v959_v11  ;;  %v1024_v33 = vpack.c.bf16 %v960_v12, %v960_v12  ;;  %v844_v11 = vmul.f32 %v5493_v8, %v5075_v40  ;;  %v7327_v8 = vld [vmem:[#allocation26_spill] sm:$0xff] }
 0x390   :  { %v1198_v57 = vpack.c.b16 %v1191_v21, %v1190_v0  ;;  %v961_v21 = vmul.f32 %v5441_v20, %v5088_v39  ;;  %v962_v39 = vmul.f32 %v5441_v20, %v5135_v5 }
 0x391   :  { %v1135_v47 = vunpack.c.l.b16 %v1023_v26 }
 0x392   :  { %1202 = vrot.lane.b32.xlu2 %v1198_v57, %s4502_s5  ;;  %v1025_v0 = vpack.c.bf16 %v961_v21, %v961_v21 }
 0x39a   :  { %901 = vrot.lane.b32.xlu2 %v859_v53, %s4503_s30  ;;  %v1136_v53 = vunpack.c.l.b16 %v1024_v33 }
 0x3a2   :  { %899 = vrot.lane.b32.xlu2 %v858_v58, %s4503_s30 }
 0x3a5   :  { %v796_v44 = vpop.f32.mrf.mxu2 }
 0x3a6   :  { %v863_v25 = vmul.f32 %v5208_v59, %v796_v44  ;;  %v857_v59 = vmul.f32 %v4968_v15, %v781_v22  ;;  %v958_v15 = vmul.f32 %v5441_v20, %v4982_v45  ;;  %v1137_v45 = vunpack.c.l.b16 %v1025_v0 }
 0x3a7   :  { %v847_v44 = vmul.f32 %v5456_v14, %v5233_v35  ;;  %v1026_v35 = vpack.c.bf16 %v962_v39, %v962_v39  ;;  %v965_v0 = vmul.f32 %v5441_v20, %v7327_v8  ;;  %v7336_v8 = vld [vmem:[#allocation14_spill] sm:$0xff] }
 0x3a8   :  { %909 = vrot.lane.b32.xlu1 %v863_v25, %s4503_s30  ;;  %v1022_v3 = vpack.c.bf16 %v958_v15, %v958_v15  ;;  %v1167_v58 = vpack.c.b16 %v1137_v45, %v1136_v53  ;;  %v963_v25 = vmul.f32 %v5441_v20, %v5166_v16  ;;  %v845_v16 = vmul.f32 %v5482_v48, %v5150_v13 }
 0x3a9   :  { %v1138_v62 = vunpack.c.l.b16 %v1026_v35 }
 0x3aa   :  { %v1134_v46 = vunpack.c.l.b16 %v1022_v3 }
 0x3ac   :  { %v1166_v18 = vpack.c.b16 %v1135_v47, %v1134_v46 }
 0x3ad   :  { %v798_v41 = vpop.f32.mrf.mxu2 }
 0x3ae   :  { %v864_v57 = vmul.f32 %v5219_v24, %v798_v41 }
 0x3b0   :  { %911 = vrot.lane.b32.xlu0 %v864_v57, %s4503_s30  ;;  %905 = vrot.lane.b32.xlu1 %v861_v10, %s4503_s30 }
 0x3b8   :  { %907 = vrot.lane.b32.xlu0 %v862_v49, %s4503_s30  ;;  %903 = vrot.lane.b32.xlu1 %v860_v37, %s4503_s30  ;;  %v1027_v49 = vpack.c.bf16 %v963_v25, %v963_v25 }
 0x3c0   :  { %897 = vrot.lane.b32.xlu0 %v857_v59, %s4503_s30 }
 0x3ca   :  { %v1207_v24 = vpop.permute.xlu0 %1206 }
 0x3cb   :  { %v1265_v43 = vsel %vm50_vm0, %v1207_v24, 0 }
 0x3e4   :  { %v1205_v52 = vpop.permute.xlu2 %1204 }
 0x3e5   :  { %v1262_v32 = vsel %vm50_vm0, %v1205_v52, 0 }
 0x3ec   :  { %v1209_v51 = vpop.permute.xlu1 %1208  ;;  %v1203_v22 = vpop.permute.xlu2 %1202 }
 0x3ed   :  { %v1268_v17 = vsel %vm50_vm0, %v1209_v51, 0  ;;  %v1259_v54 = vsel %vm50_vm0, %v1203_v22, 0 }
 0x3ee   :  { %1274 = vmatpush.bf16.xpose.msrb.mxu3 %v1268_v17  ;;  %v843_v17 = vmul.f32 %v5499_v7, %v5072_v38 }
 0x3f4   :  { %v902_v10 = vpop.permute.xlu2 %901 }
 0x3f5   :  { %v939_v24 = vadd.f32 %v902_v10, %v843_v17  ;;  %v2392_v10 = vpack.c.bf16 %v4951_v28, %v4951_v28 }
 0x3f6   :  { %1275 = vmatpush.bf16.xpose.msrb.mxu3 %v1265_v43  ;;  %v1139_v43 = vunpack.c.l.b16 %v1027_v49  ;;  %v1029_v49 = vpack.c.bf16 %v965_v0, %v965_v0  ;;  %v7337_v0 = vld [vmem:[#allocation13_spill] sm:$0xff] }
 0x3f7   :  { %v1096_v22 = vpack.c.bf16 %v939_v24, %v939_v24  ;;  %v2496_v35 = vunpack.c.l.b16 %v2392_v10 }
 0x3f9   :  { %v1449_v12 = vunpack.c.l.b16 %v1096_v22  ;;  %v2397_v22 = vpack.c.bf16 %v5150_v13, %v5150_v13  ;;  %v7331_v13 = vld [vmem:[#allocation33_spill] sm:$0xff] }
 0x3fc   :  { %v900_v46 = vpop.permute.xlu2 %899 }
 0x3fe   :  { %1276 = vmatpush.bf16.xpose.msrb.mxu3 %v1262_v32 }
 0x406   :  { %1277 = vmatpush.bf16.xpose.msrb.mxu3 %v1259_v54  ;;  %v1168_v54 = vpack.c.b16 %v1139_v43, %v1138_v62 }
 0x40d   :  { %3999 = vmatmul.msk.bf16.vlgmr.msrb.gmra.mxu3 %vm50_vm0, %v1166_v18  ;;  %v842_v18 = vmul.f32 %v5506_v4, %v5004_v60 }
 0x40f   :  { %v938_v33 = vadd.f32 %v900_v46, %v842_v18 }
 0x41a   :  { %v910_v23 = vpop.permute.xlu1 %909 }
 0x41b   :  { %v943_v41 = vadd.f32 %v910_v23, %v847_v44  ;;  %v7328_v44 = vld [vmem:[#allocation25_spill] sm:$0xff] }
 0x41c   :  { %v964_v25 = vmul.f32 %v5441_v20, %v7328_v44  ;;  %v7343_v44 = vld [vmem:[#allocation29_spill] sm:$0xff] }
 0x41d   :  { %4000 = vmatmul.msk.bf16.gmra.mxu3 %vm50_vm0, %v1167_v58  ;;  %v1100_v59 = vpack.c.bf16 %v943_v41, %v943_v41  ;;  %v2388_v58 = vpack.c.bf16 %v4920_v27, %v4920_v27  ;;  %v7329_v41 = vld [vmem:[#allocation6_spill] sm:$0xff]  ;;  %v2391_v27 = vpack.c.bf16 %v4948_v36, %v4948_v36 }
 0x41e   :  { %v841_v39 = vmul.f32 %v5497_v55, %v7329_v41  ;;  %v1028_v55 = vpack.c.bf16 %v964_v25, %v964_v25 }
 0x41f   :  { %v1453_v5 = vunpack.c.l.b16 %v1100_v59  ;;  %v1095_v59 = vpack.c.bf16 %v938_v33, %v938_v33  ;;  %v2495_v43 = vunpack.c.l.b16 %v2391_v27  ;;  %v7338_v33 = vpack.c.b16 %v7336_v8, %v7337_v0  ;;  %v7348_v27 = vld [vmem:[#allocation16_spill] sm:$0xff] }
 0x421   :  { %v1448_v28 = vunpack.c.l.b16 %v1095_v59 }
 0x422   :  { %v906_v57 = vpop.permute.xlu1 %905  ;;  %v912_v37 = vpop.permute.xlu0 %911 }
 0x423   :  { %v944_v51 = vadd.f32 %v912_v37, %v848_v9  ;;  %v941_v52 = vadd.f32 %v906_v57, %v845_v16  ;;  %v2387_v37 = vpack.c.bf16 %v4917_v50, %v4917_v50  ;;  %v2492_v16 = vunpack.c.l.b16 %v2388_v58  ;;  %v7342_v58 = vld [vmem:[#allocation27_spill] sm:$0xff] }
 0x424   :  { %v1140_v50 = vunpack.c.l.b16 %v1028_v55  ;;  %v7344_v25 = vpack.c.b16 %v7342_v58, %v7343_v44  ;;  %v7349_v55 = vld [vmem:[#allocation15_spill] sm:$0xff] }
 0x425   :  { %v1101_v14 = vpack.c.bf16 %v944_v51, %v944_v51  ;;  %v1098_v3 = vpack.c.bf16 %v941_v52, %v941_v52  ;;  %v2386_v52 = vpack.c.bf16 %v4902_v31, %v4902_v31  ;;  %v2385_v31 = vpack.c.bf16 %v4899_v30, %v4899_v30  ;;  %v7330_v30 = vld [vmem:[#allocation34_spill] sm:$0xff] }
 0x427   :  { %v1454_v32 = vunpack.c.l.b16 %v1101_v14  ;;  %v1451_v45 = vunpack.c.l.b16 %v1098_v3  ;;  %v1141_v14 = vunpack.c.l.b16 %v1029_v49  ;;  %v2489_v3 = vunpack.c.l.b16 %v2385_v31 }
 0x429   :  { %v1458_v15 = vpack.c.b16 %v1454_v32, %v1453_v5  ;;  %v2491_v5 = vunpack.c.l.b16 %v2387_v37  ;;  %v2500_v32 = vpack.c.b16 %v2496_v35, %v2495_v43  ;;  %v1169_v36 = vpack.c.b16 %v1141_v14, %v1140_v50 }
 0x42a   :  { %v904_v7 = vpop.permute.xlu1 %903  ;;  %v908_v26 = vpop.permute.xlu0 %907 }
 0x42b   :  { %v940_v48 = vadd.f32 %v904_v7, %v844_v11  ;;  %v942_v47 = vadd.f32 %v908_v26, %v846_v63  ;;  %1465 = vrot.lane.b32.xlu1 %v1458_v15, %s4502_s5  ;;  %v2498_v62 = vpack.c.b16 %v2492_v16, %v2491_v5  ;;  %v2398_v11 = vpack.c.bf16 %v5153_v61, %v5153_v61 }
 0x42c   :  { %v2390_v15 = vpack.c.bf16 %v4936_v2, %v4936_v2  ;;  %v2389_v61 = vpack.c.bf16 %v4933_v1, %v4933_v1  ;;  %v2490_v2 = vunpack.c.l.b16 %v2386_v52  ;;  %v7333_v1 = vld [vmem:[#allocation8_spill] sm:$0xff]  ;;  %v7351_v52 = vld [vmem:[#allocation22_spill] sm:$0xff] }
 0x42d   :  { %4001 = vmatmul.msk.bf16.gmra.mxu3 %vm50_vm0, %v1168_v54  ;;  %v1097_v29 = vpack.c.bf16 %v940_v48, %v940_v48  ;;  %v1099_v21 = vpack.c.bf16 %v942_v47, %v942_v47  ;;  %v2743_v7 = vunpack.c.l.b16 %v2398_v11  ;;  %v2742_v54 = vunpack.c.l.b16 %v2397_v22  ;;  %v7354_v22 = vld [vmem:[#allocation36_spill] sm:$0xff] }
 0x42e   :  { %v2494_v26 = vunpack.c.l.b16 %v2390_v15  ;;  %v2493_v48 = vunpack.c.l.b16 %v2389_v61  ;;  %v2497_v46 = vpack.c.b16 %v2490_v2, %v2489_v3  ;;  %v991_v31 = vmul.f32 %v5441_v20, %v7354_v22  ;;  %v7355_v61 = vld [vmem:[#allocation35_spill] sm:$0xff] }
 0x42f   :  { %v1450_v53 = vunpack.c.l.b16 %v1097_v29  ;;  %v1452_v23 = vunpack.c.l.b16 %v1099_v21  ;;  %v2748_v47 = vpack.c.b16 %v2743_v7, %v2742_v54  ;;  %v7332_v29 = vpack.c.b16 %v7330_v30, %v7331_v13  ;;  %v7334_v21 = vld [vmem:[#allocation7_spill] sm:$0xff]  ;;  %v7356_v13 = vld [vmem:[#allocation28_spill] sm:$0xff] }
 0x430   :  { %v2499_v18 = vpack.c.b16 %v2494_v26, %v2493_v48  ;;  %v990_v7 = vmul.f32 %v5441_v20, %v7355_v61  ;;  %v1055_v26 = vpack.c.bf16 %v991_v31, %v991_v31  ;;  %v7369_v22 = vpack.c.b16 %v5466_v6, %v5458_v56  ;;  %v7370_v31 = vld [vmem:[#allocation32_spill] sm:$0xff]  ;;  %v7371_v61 = vld [vmem:[#allocation31_spill] sm:$0xff] }
 0x431   :  { %v1456_v4 = vpack.c.b16 %v1450_v53, %v1449_v12  ;;  %v1457_v9 = vpack.c.b16 %v1452_v23, %v1451_v45  ;;  %v7335_v12 = vpack.c.b16 %v7333_v1, %v7334_v21  ;;  %v7339_v45 = vld [vmem:[#allocation21_spill] sm:$0xff]  ;;  %v7340_v53 = vld [vmem:[#allocation19_spill] sm:$0xff] }
 0x432   :  { %v898_v57 = vpop.permute.xlu0 %897  ;;  %v7341_v23 = vpack.c.b16 %v7339_v45, %v7340_v53  ;;  %v1054_v48 = vpack.c.bf16 %v990_v7, %v990_v7  ;;  %v993_v45 = vmul.f32 %v5441_v20, %v5342_v42  ;;  %v7372_v7 = vpack.c.b16 %v7370_v31, %v7371_v61  ;;  %v7382_v6 = vld [vmem:[#allocation59_spill] sm:$0xff]  ;;  %v7394_v61 = vld [vmem:[#allocation60_spill] sm:$0xff] }
 0x433   :  { %v937_v51 = vadd.f32 %v898_v57, %v841_v39  ;;  %1461 = vrot.lane.b32.xlu2 %v1456_v4, %s4502_s5  ;;  %1463 = vrot.lane.b32.xlu0 %v1457_v9, %s4502_s5  ;;  %v7345_v39 = vld [vmem:[#allocation10_spill] sm:$0xff]  ;;  %v7346_v4 = vld [vmem:[#allocation9_spill] sm:$0xff] }
 0x434   :  { %v7347_v9 = vpack.c.b16 %v7345_v39, %v7346_v4  ;;  %v1391_v30 = vunpack.c.l.b16 %v1054_v48  ;;  %v1057_v44 = vpack.c.bf16 %v993_v45, %v993_v45  ;;  %v7377_v48 = vld [vmem:[#allocation44_spill] sm:$0xff] }
 0x435   :  { %v1094_v17 = vpack.c.bf16 %v937_v51, %v937_v51 }
 0x437   :  { %v1447_v24 = vunpack.c.l.b16 %v1094_v17  ;;  %v7350_v17 = vpack.c.b16 %v7348_v27, %v7349_v55 }
 0x439   :  { %v1455_v63 = vpack.c.b16 %v1448_v28, %v1447_v24 }
 0x43b   :  { %2507 = vrot.lane.b32.xlu2 %v2500_v32, %s4504_s6  ;;  %2503 = vrot.lane.b32.xlu0 %v2498_v62, %s4504_s6  ;;  %v7352_v32 = vld [vmem:[#allocation20_spill] sm:$0xff] }
 0x43c   :  { %1459 = vrot.lane.b32.xlu1 %v1455_v63, %s4502_s5  ;;  %v7353_v62 = vpack.c.b16 %v7351_v52, %v7352_v32  ;;  %v7363_v32 = vld [vmem:[#allocation18_spill] sm:$0xff] }
 0x43d   :  { %4002 = vmatmul.msk.bf16.gmra.mxu3 %vm50_vm0, %v1169_v36 }
 0x443   :  { %2754 = vrot.lane.b32.xlu2 %v2748_v47, %s4504_s6  ;;  %2501 = vrot.lane.b32.xlu0 %v2497_v46, %s4504_s6 }
 0x444   :  { %2505 = vrot.lane.b32.xlu1 %v2499_v18, %s4504_s6  ;;  %v1392_v18 = vunpack.c.l.b16 %v1055_v26  ;;  %v7374_v26 = vld [vmem:[#allocation37_spill] sm:$0xff] }
 0x446   :  { %v1423_v21 = vpack.c.b16 %v1392_v18, %v1391_v30  ;;  %v7379_v18 = vld [vmem:[#allocation52_spill] sm:$0xff]  ;;  %v7380_v30 = vld [vmem:[#allocation50_spill] sm:$0xff] }
 0x447   :  { %v7381_v56 = vpack.c.b16 %v7379_v18, %v7380_v30 }
 0x44c   :  { %2756 = vrot.lane.b32.xlu1 %v7332_v29, %s4504_s6  ;;  %v7357_v29 = vld [vmem:[#allocation30_spill] sm:$0xff] }
 0x44d   :  { %4003 = vmatmul.msk.bf16.gmra.mxu3 %vm50_vm0, %v7335_v12  ;;  %v7358_v1 = vpack.c.b16 %v7356_v13, %v7357_v29  ;;  %v7383_v13 = vld [vmem:[#allocation56_spill] sm:$0xff] }
 0x44e   :  { %v7384_v29 = vpack.c.b16 %v7382_v6, %v7383_v13  ;;  %v2394_v6 = vpack.c.bf16 %v5004_v60, %v5004_v60 }
 0x450   :  { %v2739_v60 = vunpack.c.l.b16 %v2394_v6 }
 0x45d   :  { %4004 = vmatmul.msk.bf16.gmra.mxu3 %vm50_vm0, %v7338_v33 }
 0x46d   :  { %4005 = vmatmul.msk.bf16.gmra.mxu3 %vm50_vm0, %v7341_v23  ;;  %v7359_v23 = vld [vmem:[#allocation43_spill] sm:$0xff] }
 0x46e   :  { %v992_v58 = vmul.f32 %v5441_v20, %v7359_v23 }
 0x47d   :  { %4006 = vmatmul.msk.bf16.gmra.mxu3 %vm50_vm0, %v7344_v25  ;;  %v1056_v25 = vpack.c.bf16 %v992_v58, %v992_v58 }
 0x48d   :  { %4007 = vmatmul.msk.bf16.gmra.mxu3 %vm50_vm0, %v7347_v9  ;;  %v1462_v10 = vpop.permute.xlu2 %1461  ;;  %v1394_v9 = vunpack.c.l.b16 %v1057_v44 }
 0x48e   :  { %v1519_v11 = vsel %vm50_vm0, %v1462_v10, 0  ;;  %v1393_v10 = vunpack.c.l.b16 %v1056_v25 }
 0x490   :  { %v5623_v57 = vpop.f32.mrf.mxu3  ;;  %v1424_v42 = vpack.c.b16 %v1394_v9, %v1393_v10  ;;  %v7389_v9 = vld [vmem:[#allocation46_spill] sm:$0xff] }
 0x491   :  { %v1617_v37 = vsel %vm1616_vm5, %v5623_v57, -inf }
 0x492   :  { %1618 = vmax.xlane.f32.xlu0 %v1617_v37  ;;  %v7360_v37 = vld [vmem:[#allocation12_spill] sm:$0xff] }
 0x495   :  { %v2508_v49 = vpop.permute.xlu2 %2507 }
 0x496   :  { %2565 = vmatpush.bf16.msrb.mxu1 %v2508_v49  ;;  %v7361_v49 = vld [vmem:[#allocation11_spill] sm:$0xff] }
 0x498   :  { %v5627_v59 = vpop.f32.mrf.mxu3 }
 0x499   :  { %v1620_v51 = vsel %vm1616_vm5, %v5627_v59, -inf }
 0x49a   :  { %1621 = vmax.xlane.f32.xlu2 %v1620_v51  ;;  %v7362_v51 = vpack.c.b16 %v7360_v37, %v7361_v49 }
 0x49d   :  { %4008 = vmatmul.msk.bf16.gmra.mxu3 %vm50_vm0, %v7350_v17  ;;  %v1466_v35 = vpop.permute.xlu1 %1465  ;;  %v2755_v53 = vpop.permute.xlu2 %2754  ;;  %v995_v17 = vmul.f32 %v5441_v20, %v5384_v34 }
 0x49e   :  { %v1525_v16 = vsel %vm50_vm0, %v1466_v35, 0  ;;  %v994_v35 = vmul.f32 %v5441_v20, %v5369_v19  ;;  %v7367_v19 = vld [vmem:[#allocation23_spill] sm:$0xff] }
 0x49f   :  { %1531 = vmatpush.bf16.xpose.msrb.mxu0 %v1525_v16  ;;  %v1059_v16 = vpack.c.bf16 %v995_v17, %v995_v17 }
 0x4a0   :  { %v5636_v14 = vpop.f32.mrf.mxu3 }
 0x4a1   :  { %v1623_v28 = vsel %vm1616_vm5, %v5636_v14, -inf }
 0x4a2   :  { %1624 = vmax.xlane.f32.xlu1 %v1623_v28  ;;  %v1058_v28 = vpack.c.bf16 %v994_v35, %v994_v35 }
 0x4a4   :  { %v1395_v52 = vunpack.c.l.b16 %v1058_v28  ;;  %v7391_v28 = vld [vmem:[#allocation53_spill] sm:$0xff] }
 0x4a5   :  { %v1464_v24 = vpop.permute.xlu0 %1463 }
 0x4a6   :  { %v1522_v43 = vsel %vm50_vm0, %v1464_v24, 0 }
 0x4a7   :  { %1532 = vmatpush.bf16.xpose.msrb.mxu0 %v1522_v43 }
 0x4a8   :  { %v5641_v5 = vpop.f32.mrf.mxu3 }
 0x4a9   :  { %v1626_v50 = vsel %vm1616_vm5, %v5641_v5, -inf }
 0x4aa   :  { %1627 = vmax.xlane.f32.xlu0 %v1626_v50  ;;  %v1396_v50 = vunpack.c.l.b16 %v1059_v16 }
 0x4ac   :  { %v1425_v34 = vpack.c.b16 %v1396_v50, %v1395_v52 }
 0x4ad   :  { %4009 = vmatmul.msk.bf16.gmra.mxu3 %vm50_vm0, %v7353_v62  ;;  %v2504_v2 = vpop.permute.xlu0 %2503  ;;  %v7364_v62 = vld [vmem:[#allocation17_spill] sm:$0xff] }
 0x4ae   :  { %v1460_v63 = vpop.permute.xlu1 %1459 }
 0x4af   :  { %1533 = vmatpush.bf16.xpose.msrb.mxu0 %v1519_v11  ;;  %v1516_v3 = vsel %vm50_vm0, %v1460_v63, 0  ;;  %v7365_v63 = vpack.c.b16 %v7363_v32, %v7364_v62  ;;  %v7366_v11 = vld [vmem:[#allocation24_spill] sm:$0xff] }
 0x4b0   :  { %v5650_v36 = vpop.f32.mrf.mxu3 }
 0x4b1   :  { %v1629_v15 = vsel %vm1616_vm5, %v5650_v36, -inf }
 0x4b2   :  { %1630 = vmax.xlane.f32.xlu2 %v1629_v15  ;;  %v7368_v15 = vpack.c.b16 %v7366_v11, %v7367_v19 }
 0x4b5   :  { %v2502_v12 = vpop.permute.xlu0 %2501 }
 0x4b6   :  { %v2506_v54 = vpop.permute.xlu1 %2505 }
 0x4b7   :  { %2566 = vmatpush.bf16.msrb.mxu1 %v2506_v54  ;;  %1534 = vmatpush.bf16.xpose.msrb.mxu0 %v1516_v3  ;;  %v7376_v3 = vld [vmem:[#allocation45_spill] sm:$0xff] }
 0x4b8   :  { %v5659_v47 = vpop.f32.mrf.mxu3 }
 0x4b9   :  { %v1632_v46 = vsel %vm1616_vm5, %v5659_v47, -inf }
 0x4ba   :  { %1633 = vmax.xlane.f32.xlu1 %v1632_v46  ;;  %v7378_v46 = vpack.c.b16 %v7376_v3, %v7377_v48 }
 0x4bb   :  { %2567 = vmatpush.bf16.msrb.mxu1 %v2504_v2  ;;  %v7373_v2 = vld [vmem:[#allocation38_spill] sm:$0xff] }
 0x4bc   :  { %v7375_v54 = vpack.c.b16 %v7373_v2, %v7374_v26 }
 0x4bd   :  { %4010 = vmatmul.msk.bf16.gmra.mxu3 %vm50_vm0, %v7358_v1 }
 0x4be   :  { %v2757_v8 = vpop.permute.xlu1 %2756  ;;  %4015 = vmatmul.msk.bf16.vlgmr.msrb.gmra.mxu0 %vm50_vm0, %v1423_v21 }
 0x4bf   :  { %2568 = vmatpush.bf16.msrb.mxu1 %v2502_v12  ;;  %2814 = vmatpush.bf16.msra.mxu2 %v2757_v8  ;;  %v7385_v12 = vld [vmem:[#allocation40_spill] sm:$0xff]  ;;  %v7386_v8 = vld [vmem:[#allocation39_spill] sm:$0xff] }
 0x4c0   :  { %v5668_v0 = vpop.f32.mrf.mxu3 }
 0x4c1   :  { %v1635_v33 = vsel %vm1616_vm5, %v5668_v0, -inf }
 0x4c2   :  { %1636 = vmax.xlane.f32.xlu0 %v1635_v33  ;;  %v7387_v33 = vpack.c.b16 %v7385_v12, %v7386_v8  ;;  %v7397_v12 = vld [vmem:[#allocation42_spill] sm:$0xff]  ;;  %v7398_v8 = vld [vmem:[#allocation41_spill] sm:$0xff] }
 0x4c3   :  { %2815 = vmatpush.bf16.msra.mxu2 %v2755_v53 }
 0x4c8   :  { %v5676_v39 = vpop.f32.mrf.mxu3 }
 0x4c9   :  { %v1638_v4 = vsel %vm1616_vm5, %v5676_v39, -inf }
 0x4ca   :  { %1639 = vmax.xlane.f32.xlu2 %v1638_v4  ;;  %v7388_v4 = vld [vmem:[#allocation47_spill] sm:$0xff] }
 0x4cb   :  { %v7390_v10 = vpack.c.b16 %v7388_v4, %v7389_v9 }
 0x4cd   :  { %4011 = vmatmul.msk.bf16.gmra.mxu3 %vm50_vm0, %v7362_v51 }
 0x4ce   :  { %4016 = vmatmul.msk.bf16.gmra.mxu0 %vm50_vm0, %v1424_v42 }
 0x4d0   :  { %v5685_v27 = vpop.f32.mrf.mxu3 }
 0x4d1   :  { %v1641_v55 = vsel %vm1616_vm5, %v5685_v27, -inf }
 0x4d2   :  { %1642 = vmax.xlane.f32.xlu2 %v1641_v55 }
 0x4d8   :  { %v5693_v24 = vpop.f32.mrf.mxu3 }
 0x4d9   :  { %v1644_v43 = vsel %vm1616_vm5, %v5693_v24, -inf }
 0x4da   :  { %1645 = vmax.xlane.f32.xlu1 %v1644_v43  ;;  %v7392_v43 = vld [vmem:[#allocation51_spill] sm:$0xff] }
 0x4db   :  { %v7393_v50 = vpack.c.b16 %v7391_v28, %v7392_v43  ;;  %v2396_v28 = vpack.c.bf16 %v5075_v40, %v5075_v40  ;;  %v7400_v43 = vld [vmem:[#allocation49_spill] sm:$0xff] }
 0x4dd   :  { %4012 = vmatmul.msk.bf16.gmra.mxu3 %vm50_vm0, %v7365_v63 }
 0x4de   :  { %4017 = vmatmul.msk.bf16.gmra.mxu0 %vm50_vm0, %v1425_v34 }
 0x4e0   :  { %v5738_v45 = vpop.f32.mrf.mxu3 }
 0x4e1   :  { %v1647_v51 = vsel %vm1616_vm5, %v5738_v45, -inf }
 0x4e8   :  { %v5744_v58 = vpop.f32.mrf.mxu3 }
 0x4e9   :  { %v1650_v17 = vsel %vm1616_vm5, %v5744_v58, -inf }
 0x4ed   :  { %4013 = vmatmul.msk.bf16.gmra.mxu3 %vm50_vm0, %v7368_v15 }
 0x4ee   :  { %4018 = vmatmul.msk.bf16.gmra.mxu0 %vm50_vm0, %v7369_v22 }
 0x4f0   :  { %v5754_v37 = vpop.f32.mrf.mxu3 }
 0x4f1   :  { %v1653_v32 = vsel %vm1616_vm5, %v5754_v37, -inf }
 0x4f8   :  { %v5768_v16 = vpop.f32.mrf.mxu3 }
 0x4f9   :  { %v1656_v62 = vsel %vm1616_vm5, %v5768_v16, -inf }
 0x4fd   :  { %4014 = vmatmul.msk.bf16.gmra.mxu3 %vm50_vm0, %v7372_v7  ;;  %v7395_v7 = vld [vmem:[#allocation57_spill] sm:$0xff] }
 0x4fe   :  { %4019 = vmatmul.msk.bf16.gmra.mxu0 %vm50_vm0, %v7375_v54  ;;  %v7396_v2 = vpack.c.b16 %v7394_v61, %v7395_v7 }
 0x500   :  { %v5782_v34 = vpop.f32.mrf.mxu3 }
 0x501   :  { %v1659_v22 = vsel %vm1616_vm5, %v5782_v34, -inf }
 0x505   :  { %v1619_v11 = vpop.xlane.xlu0 %1618 }
 0x506   :  { %v1809_v19 = vsub.f32 %v5623_v57, %v1619_v11  ;;  %v2741_v11 = vunpack.c.l.b16 %v2396_v28 }
 0x508   :  { %v1873_v26 = vmul.f32 1.442695, %v1809_v19  ;;  %v5795_v54 = vpop.f32.mrf.mxu3 }
 0x509   :  { %v1662_v3 = vsel %vm1616_vm5, %v5795_v54, -inf }
 0x50a   :  { %4163 = vpow2.f32 %v1873_v26 }
 0x50e   :  { %4020 = vmatmul.msk.bf16.gmra.mxu0 %vm50_vm0, %v7378_v46  ;;  %v1622_v46 = vpop.xlane.xlu2 %1621 }
 0x50f   :  { %v1810_v30 = vsub.f32 %v5627_v59, %v1622_v46  ;;  %v7403_v46 = vld [vmem:[#allocation55_spill] sm:$0xff] }
 0x510   :  { %v5803_v18 = vpop.eup %4163 }
 0x511   :  { %v1875_v59 = vmul.f32 1.442695, %v1810_v30  ;;  %v7404_v30 = vld [vmem:[#allocation54_spill] sm:$0xff] }
 0x512   :  { %v7405_v6 = vpack.c.b16 %v7403_v46, %v7404_v30 }
 0x513   :  { %4165 = vpow2.f32 %v1875_v59 }
 0x51d   :  { %v1628_v7 = vpop.xlane.xlu0 %1627 }
 0x51e   :  { %4021 = vmatmul.msk.bf16.gmra.mxu0 %vm50_vm0, %v7381_v56 }
 0x52e   :  { %4022 = vmatmul.msk.bf16.gmra.mxu0 %vm50_vm0, %v7384_v29  ;;  %v2001_v29 = vsel %vm1616_vm5, %v5803_v18, 0.0 }
 0x53b   :  { %v5730_v1 = vpop.f32.mrf.mxu0 }
 0x53c   :  { %v1713_v21 = vsel %vm1616_vm5, %v5730_v1, -inf }
 0x53d   :  { %1714 = vmax.xlane.f32.xlu0 %v1713_v21  ;;  %v2393_v21 = vpack.c.bf16 %v7329_v41, %v7329_v41  ;;  %v1625_v41 = vpop.xlane.xlu1 %1624 }
 0x53e   :  { %4023 = vmatmul.msk.bf16.gmra.mxu0 %vm50_vm0, %v7387_v33  ;;  %v7399_v33 = vpack.c.b16 %v7397_v12, %v7398_v8 }
 0x543   :  { %v5740_v53 = vpop.f32.mrf.mxu0 }
 0x544   :  { %v1716_v23 = vsel %vm1616_vm5, %v5740_v53, -inf }
 0x545   :  { %1717 = vmax.xlane.f32.xlu0 %v1716_v23  ;;  %v5820_v23 = vpop.f32.mrf.mxu3 }
 0x546   :  { %v1665_v9 = vsel %vm1616_vm5, %v5820_v23, -inf }
 0x54b   :  { %v5746_v44 = vpop.f32.mrf.mxu0 }
 0x54c   :  { %v1719_v25 = vsel %vm1616_vm5, %v5746_v44, -inf }
 0x54d   :  { %1720 = vmax.xlane.f32.xlu1 %v1719_v25  ;;  %v2738_v25 = vunpack.c.l.b16 %v2393_v21 }
 0x54e   :  { %4024 = vmatmul.msk.bf16.gmra.mxu0 %vm50_vm0, %v7390_v10 }
 0x54f   :  { %v2746_v4 = vpack.c.b16 %v2739_v60, %v2738_v25  ;;  %v1637_v60 = vpop.xlane.xlu0 %1636 }
 0x553   :  { %v5756_v49 = vpop.f32.mrf.mxu0 }
 0x554   :  { %v1722_v42 = vsel %vm1616_vm5, %v5756_v49, -inf }
 0x555   :  { %1648 = vmax.xlane.f32.xlu1 %v1647_v51  ;;  %1723 = vmax.xlane.f32.xlu2 %v1722_v42  ;;  %v5827_v51 = vpop.eup %4165  ;;  %v5829_v42 = vpop.f32.mrf.mxu3 }
 0x556   :  { %v1668_v40 = vsel %vm1616_vm5, %v5829_v42, -inf }
 0x55b   :  { %v5762_v55 = vpop.f32.mrf.mxu0 }
 0x55c   :  { %v1725_v35 = vsel %vm1616_vm5, %v5762_v55, -inf }
 0x55d   :  { %1651 = vmax.xlane.f32.xlu2 %v1650_v17  ;;  %1726 = vmax.xlane.f32.xlu0 %v1725_v35  ;;  %v1811_v17 = vsub.f32 %v5636_v14, %v1625_v41  ;;  %v2004_v35 = vsel %vm1616_vm5, %v5827_v51, 0.0  ;;  %v7407_v41 = vld [vmem:[#allocation58_spill] sm:$0xff] }
 0x55e   :  { %4025 = vmatmul.msk.bf16.gmra.mxu0 %vm50_vm0, %v7393_v50  ;;  %v7401_v50 = vld [vmem:[#allocation48_spill] sm:$0xff] }
 0x563   :  { %v5774_v52 = vpop.f32.mrf.mxu0 }
 0x564   :  { %v1728_v63 = vsel %vm1616_vm5, %v5774_v52, -inf }
 0x565   :  { %1654 = vmax.xlane.f32.xlu2 %v1653_v32  ;;  %1657 = vmax.xlane.f32.xlu0 %v1656_v62  ;;  %v7402_v32 = vpack.c.b16 %v7400_v43, %v7401_v50  ;;  %v2395_v62 = vpack.c.bf16 %v5072_v38, %v5072_v38  ;;  %v1812_v38 = vsub.f32 %v5641_v5, %v1628_v7 }
 0x566   :  { %1729 = vmax.xlane.f32.xlu1 %v1728_v63  ;;  %v1877_v63 = vmul.f32 1.442695, %v1811_v17 }
 0x567   :  { %v2740_v14 = vunpack.c.l.b16 %v2395_v62 }
 0x568   :  { %4167 = vpow2.f32 %v1877_v63 }
 0x56b   :  { %v5785_v15 = vpop.f32.mrf.mxu0 }
 0x56c   :  { %v1731_v31 = vsel %vm1616_vm5, %v5785_v15, -inf }
 0x56d   :  { %1660 = vmax.xlane.f32.xlu2 %v1659_v22  ;;  %1732 = vmax.xlane.f32.xlu0 %v1731_v31  ;;  %v5844_v22 = vpop.f32.mrf.mxu3  ;;  %v2747_v31 = vpack.c.b16 %v2741_v11, %v2740_v14 }
 0x56e   :  { %4026 = vmatmul.msk.bf16.gmra.mxu0 %vm50_vm0, %v7396_v2  ;;  %v5849_v61 = vpop.eup %4167 }
 0x56f   :  { %v2007_v26 = vsel %vm1616_vm5, %v5849_v61, 0.0 }
 0x573   :  { %v5797_v57 = vpop.f32.mrf.mxu0 }
 0x574   :  { %v1734_v48 = vsel %vm1616_vm5, %v5797_v57, -inf }
 0x575   :  { %1663 = vmax.xlane.f32.xlu0 %v1662_v3  ;;  %1735 = vmax.xlane.f32.xlu1 %v1734_v48  ;;  %v5856_v3 = vpop.f32.mrf.mxu3  ;;  %v1631_v48 = vpop.xlane.xlu2 %1630 }
 0x576   :  { %v1813_v14 = vsub.f32 %v5650_v36, %v1631_v48 }
 0x57b   :  { %v5806_v56 = vpop.f32.mrf.mxu0 }
 0x57c   :  { %v1737_v13 = vsel %vm1616_vm5, %v5806_v56, -inf }
 0x57d   :  { %1738 = vmax.xlane.f32.xlu0 %v1737_v13  ;;  %2002 = vadd.xlane.f32.xlu1 %v2001_v29  ;;  %v1879_v13 = vmul.f32 1.442695, %v1812_v38  ;;  %v1634_v29 = vpop.xlane.xlu1 %1633  ;;  %v1640_v8 = vpop.xlane.xlu2 %1639  ;;  %v1881_v38 = vmul.f32 1.442695, %v1813_v14 }
 0x57e   :  { %4027 = vmatmul.msk.bf16.gmra.mxu0 %vm50_vm0, %v7399_v33  ;;  %v1814_v21 = vsub.f32 %v5659_v47, %v1634_v29  ;;  %v5867_v33 = vpop.f32.mrf.mxu3 }
 0x57f   :  { %4169 = vpow2.f32 %v1879_v13 }
 0x580   :  { %v1883_v59 = vmul.f32 1.442695, %v1814_v21 }
 0x582   :  { %4171 = vpow2.f32 %v1883_v59  ;;  %v1677_v59 = vsel %vm1616_vm5, %v5867_v33, -inf }
 0x583   :  { %v5825_v10 = vpop.f32.mrf.mxu0 }
 0x584   :  { %v1740_v48 = vsel %vm1616_vm5, %v5825_v10, -inf }
 0x585   :  { %2750 = vrot.lane.b32.xlu2 %v2746_v4, %s4504_s6  ;;  %1666 = vmax.xlane.f32.xlu0 %v1665_v9  ;;  %v5869_v25 = vpop.eup %4169  ;;  %v1671_v4 = vsel %vm1616_vm5, %v5844_v22, -inf  ;;  %v7406_v9 = vld [vmem:[#allocation61_spill] sm:$0xff]  ;;  %v1643_v28 = vpop.xlane.xlu2 %1642 }
 0x586   :  { %v2010_v47 = vsel %vm1616_vm5, %v5869_v25, 0.0  ;;  %v7408_v17 = vpack.c.b16 %v7406_v9, %v7407_v41  ;;  %v5881_v50 = vpop.f32.mrf.mxu3  ;;  %v1817_v62 = vsub.f32 %v5685_v27, %v1643_v28  ;;  %v1816_v27 = vsub.f32 %v5676_v39, %v1640_v8  ;;  %v1646_v30 = vpop.xlane.xlu1 %1645 }
 0x587   :  { %v1680_v63 = vsel %vm1616_vm5, %v5881_v50, -inf  ;;  %v1818_v39 = vsub.f32 %v5693_v24, %v1646_v30 }
 0x588   :  { %v1887_v13 = vmul.f32 1.442695, %v1816_v27 }
 0x58b   :  { %v5842_v19 = vpop.f32.mrf.mxu0 }
 0x58c   :  { %v1743_v14 = vsel %vm1616_vm5, %v5842_v19, -inf }
 0x58d   :  { %2005 = vadd.xlane.f32.xlu0 %v2004_v35 }
 0x58e   :  { %4028 = vmatmul.msk.bf16.gmra.mxu0 %vm50_vm0, %v7402_v32  ;;  %v5883_v32 = vpop.eup %4171 }
 0x58f   :  { %v2016_v11 = vsel %vm1616_vm5, %v5883_v32, 0.0 }
 0x593   :  { %v5851_v2 = vpop.f32.mrf.mxu0 }
 0x594   :  { %v1746_v5 = vsel %vm1616_vm5, %v5851_v2, -inf }
 0x595   :  { %1669 = vmax.xlane.f32.xlu0 %v1668_v40  ;;  %v1889_v40 = vmul.f32 1.442695, %v1817_v62  ;;  %v5923_v62 = vpop.f32.mrf.mxu3 }
 0x596   :  { %2752 = vrot.lane.b32.xlu1 %v2747_v31, %s4504_s6 }
 0x597   :  { %4173 = vpow2.f32 %v1889_v40 }
 0x598   :  { %4175 = vpow2.f32 %v1881_v38 }
 0x59b   :  { %v5865_v12 = vpop.f32.mrf.mxu0 }
 0x59d   :  { %2008 = vadd.xlane.f32.xlu0 %v2007_v26  ;;  %v5901_v29 = vpop.eup %4173 }
 0x59e   :  { %4029 = vmatmul.msk.bf16.gmra.mxu0 %vm50_vm0, %v7405_v6 }
 0x5a3   :  { %v5879_v35 = vpop.f32.mrf.mxu0 }
 0x5a4   :  { %v1752_v6 = vsel %vm1616_vm5, %v5879_v35, -inf }
 0x5a5   :  { %1747 = vmax.xlane.f32.xlu0 %v1746_v5  ;;  %v2025_v5 = vsel %vm1616_vm5, %v5901_v29, 0.0 }
 0x5ab   :  { %v5891_v7 = vpop.f32.mrf.mxu0 }
 0x5ac   :  { %v1755_v46 = vsel %vm1616_vm5, %v5891_v7, -inf }
 0x5ad   :  { %1672 = vmax.xlane.f32.xlu0 %v1671_v4  ;;  %v1815_v4 = vsub.f32 %v5668_v0, %v1637_v60 }
 0x5ae   :  { %4030 = vmatmul.msk.bf16.gmra.mxu0 %vm50_vm0, %v7408_v17  ;;  %2011 = vadd.xlane.f32.xlu2 %v2010_v47  ;;  %v1891_v47 = vmul.f32 1.442695, %v1818_v39 }
 0x5af   :  { %v1885_v28 = vmul.f32 1.442695, %v1815_v4 }
 0x5b0   :  { %v1715_v43 = vpop.xlane.xlu0 %1714 }
 0x5b1   :  { %v1841_v21 = vsub.f32 %v5730_v1, %v1715_v43 }
 0x5b3   :  { %v1937_v9 = vmul.f32 1.442695, %v1841_v21 }
 0x5b5   :  { %1681 = vmax.xlane.f32.xlu0 %v1680_v63 }
 0x5b6   :  { %2017 = vadd.xlane.f32.xlu2 %v2016_v11 }
 0x5b8   :  { %v1718_v31 = vpop.xlane.xlu0 %1717 }
 0x5b9   :  { %v1842_v26 = vsub.f32 %v5740_v53, %v1718_v31  ;;  %v5904_v53 = vpop.eup %4175 }
 0x5ba   :  { %v2013_v24 = vsel %vm1616_vm5, %v5904_v53, 0.0 }
 0x5bb   :  { %v1939_v36 = vmul.f32 1.442695, %v1842_v26 }
 0x5bd   :  { %1756 = vmax.xlane.f32.xlu0 %v1755_v46  ;;  %4177 = vpow2.f32 %v1939_v36 }
 0x5be   :  { %1753 = vmax.xlane.f32.xlu2 %v1752_v6  ;;  %4179 = vpow2.f32 %v1887_v13 }
 0x5bf   :  { %4181 = vpow2.f32 %v1891_v47 }
 0x5c0   :  { %1741 = vmax.xlane.f32.xlu1 %v1740_v48  ;;  %v1721_v8 = vpop.xlane.xlu1 %1720  ;;  %4183 = vpow2.f32 %v1937_v9  ;;  %v1674_v9 = vsel %vm1616_vm5, %v5856_v3, -inf }
 0x5c1   :  { %v1843_v43 = vsub.f32 %v5746_v44, %v1721_v8  ;;  %4185 = vpow2.f32 %v1885_v28 }
 0x5c3   :  { %v5914_v17 = vpop.eup %4177  ;;  %v1941_v63 = vmul.f32 1.442695, %v1843_v43 }
 0x5c4   :  { %v5916_v1 = vpop.eup %4179  ;;  %v2100_v0 = vsel %vm1616_vm5, %v5914_v17, 0.0 }
 0x5c5   :  { %2026 = vadd.xlane.f32.xlu0 %v2025_v5  ;;  %v2022_v60 = vsel %vm1616_vm5, %v5916_v1, 0.0  ;;  %v5927_v31 = vpop.eup %4181  ;;  %4187 = vpow2.f32 %v1941_v63  ;;  %v5943_v5 = vpop.f32.mrf.mxu3 }
 0x5c6   :  { %1678 = vmax.xlane.f32.xlu2 %v1677_v59  ;;  %v5929_v38 = vpop.eup %4183  ;;  %v2028_v30 = vsel %vm1616_vm5, %v5927_v31, 0.0  ;;  %v1686_v47 = vsel %vm1616_vm5, %v5943_v5, -inf }
 0x5c7   :  { %v5932_v27 = vpop.eup %4185  ;;  %v2097_v6 = vsel %vm1616_vm5, %v5929_v38, 0.0 }
 0x5c8   :  { %v1724_v41 = vpop.xlane.xlu2 %1723  ;;  %2014 = vadd.xlane.f32.xlu1 %v2013_v24  ;;  %v1649_v11 = vpop.xlane.xlu1 %1648  ;;  %v2019_v48 = vsel %vm1616_vm5, %v5932_v27, 0.0 }
 0x5c9   :  { %v1819_v26 = vsub.f32 %v5738_v45, %v1649_v11  ;;  %v1844_v46 = vsub.f32 %v5756_v49, %v1724_v41  ;;  %v5945_v49 = vpop.f32.mrf.mxu0 }
 0x5cb   :  { %v1893_v36 = vmul.f32 1.442695, %v1819_v26  ;;  %v1943_v13 = vmul.f32 1.442695, %v1844_v46  ;;  %v5941_v45 = vpop.eup %4187 }
 0x5cc   :  { %v2103_v4 = vsel %vm1616_vm5, %v5941_v45, 0.0 }
 0x5cd   :  { %2101 = vadd.xlane.f32.xlu0 %v2100_v0  ;;  %4189 = vpow2.f32 %v1893_v36 }
 0x5ce   :  { %2023 = vadd.xlane.f32.xlu2 %v2022_v60  ;;  %4191 = vpow2.f32 %v1943_v13 }
 0x5d0   :  { %v1652_v40 = vpop.xlane.xlu2 %1651  ;;  %1744 = vmax.xlane.f32.xlu1 %v1743_v14  ;;  %v1727_v44 = vpop.xlane.xlu0 %1726  ;;  %v1749_v14 = vsel %vm1616_vm5, %v5865_v12, -inf }
 0x5d1   :  { %v1820_v8 = vsub.f32 %v5744_v58, %v1652_v40 }
 0x5d3   :  { %v1895_v24 = vmul.f32 1.442695, %v1820_v8  ;;  %v5955_v43 = vpop.eup %4189 }
 0x5d4   :  { %v5957_v0 = vpop.eup %4191  ;;  %v2031_v63 = vsel %vm1616_vm5, %v5955_v43, 0.0 }
 0x5d5   :  { %2029 = vadd.xlane.f32.xlu0 %v2028_v30  ;;  %4193 = vpow2.f32 %v1895_v24  ;;  %v2106_v11 = vsel %vm1616_vm5, %v5957_v0, 0.0 }
 0x5d6   :  { %2098 = vadd.xlane.f32.xlu2 %v2097_v6 }
 0x5d8   :  { %2020 = vadd.xlane.f32.xlu1 %v2019_v48  ;;  %v1658_v39 = vpop.xlane.xlu0 %1657  ;;  %v1655_v21 = vpop.xlane.xlu2 %1654  ;;  %v1845_v48 = vsub.f32 %v5762_v55, %v1727_v44 }
 0x5d9   :  { %v1821_v59 = vsub.f32 %v5754_v37, %v1655_v21  ;;  %v1730_v58 = vpop.xlane.xlu1 %1729  ;;  %v5959_v37 = vpop.f32.mrf.mxu0  ;;  %v1683_v21 = vsel %vm1616_vm5, %v5923_v62, -inf }
 0x5da   :  { %v1846_v60 = vsub.f32 %v5774_v52, %v1730_v58 }
 0x5db   :  { %v1897_v41 = vmul.f32 1.442695, %v1821_v59  ;;  %v5968_v26 = vpop.eup %4193 }
 0x5dc   :  { %v1947_v40 = vmul.f32 1.442695, %v1846_v60  ;;  %v2034_v52 = vsel %vm1616_vm5, %v5968_v26, 0.0 }
 0x5dd   :  { %2104 = vadd.xlane.f32.xlu0 %v2103_v4  ;;  %4195 = vpow2.f32 %v1897_v41  ;;  %v1945_v4 = vmul.f32 1.442695, %v1845_v48  ;;  %v5992_v41 = vpop.f32.mrf.mxu3 }
 0x5de   :  { %1687 = vmax.xlane.f32.xlu2 %v1686_v47  ;;  %4197 = vpow2.f32 %v1947_v40  ;;  %v1822_v47 = vsub.f32 %v5768_v16, %v1658_v39  ;;  %v1689_v40 = vsel %vm1616_vm5, %v5992_v41, -inf }
 0x5df   :  { %4199 = vpow2.f32 %v1945_v4 }
 0x5e0   :  { %1675 = vmax.xlane.f32.xlu1 %v1674_v9  ;;  %v1733_v28 = vpop.xlane.xlu0 %1732  ;;  %v1899_v44 = vmul.f32 1.442695, %v1822_v47  ;;  %v1758_v9 = vsel %vm1616_vm5, %v5945_v49, -inf  ;;  %v1661_v39 = vpop.xlane.xlu2 %1660 }
 0x5e1   :  { %v5976_v36 = vpop.f32.mrf.mxu0 }
 0x5e2   :  { %v1764_v24 = vsel %vm1616_vm5, %v5976_v36, -inf  ;;  %4201 = vpow2.f32 %v1899_v44 }
 0x5e3   :  { %v5970_v30 = vpop.eup %4195 }
 0x5e4   :  { %v2037_v6 = vsel %vm1616_vm5, %v5970_v30, 0.0  ;;  %v5983_v59 = vpop.eup %4197 }
 0x5e5   :  { %2032 = vadd.xlane.f32.xlu0 %v2031_v63  ;;  %v2112_v55 = vsel %vm1616_vm5, %v5983_v59, 0.0  ;;  %v1847_v63 = vsub.f32 %v5785_v15, %v1733_v28 }
 0x5e6   :  { %2107 = vadd.xlane.f32.xlu2 %v2106_v11  ;;  %v5997_v11 = vpop.eup %4199 }
 0x5e7   :  { %v1949_v48 = vmul.f32 1.442695, %v1847_v63 }
 0x5e8   :  { %1750 = vmax.xlane.f32.xlu1 %v1749_v14  ;;  %v1664_v46 = vpop.xlane.xlu0 %1663  ;;  %v5979_v13 = vpop.xlane.xlu1 %1735 }
 0x5e9   :  { %v5994_v58 = vpop.f32.mrf.mxu0  ;;  %v1824_v14 = vsub.f32 %v5795_v54, %v1664_v46  ;;  %v6007_v28 = vpop.eup %4201 }
 0x5ea   :  { %v2040_v44 = vsel %vm1616_vm5, %v6007_v28, 0.0 }
 0x5eb   :  { %v1903_v15 = vmul.f32 1.442695, %v1824_v14 }
 0x5ed   :  { %2035 = vadd.xlane.f32.xlu0 %v2034_v52  ;;  %v1761_v52 = vsel %vm1616_vm5, %v5959_v37, -inf }
 0x5ee   :  { %2038 = vadd.xlane.f32.xlu2 %v2037_v6  ;;  %v1823_v6 = vsub.f32 %v5782_v34, %v1661_v39  ;;  %v1848_v39 = vsub.f32 %v5797_v57, %v5979_v13 }
 0x5f0   :  { %1684 = vmax.xlane.f32.xlu1 %v1683_v21  ;;  %v1739_v8 = vpop.xlane.xlu0 %1738  ;;  %v2003_v60 = vpop.xlane.xlu1 %2002  ;;  %v2109_v21 = vsel %vm1616_vm5, %v5997_v11, 0.0  ;;  %v1901_v47 = vmul.f32 1.442695, %v1823_v6 }
 0x5f1   :  { %4203 = vrcp.f32 %v2003_v60  ;;  %v6009_v4 = vpop.f32.mrf.mxu0  ;;  %v1849_v34 = vsub.f32 %v5806_v56, %v1739_v8 }
 0x5f2   :  { %v1770_v60 = vsel %vm1616_vm5, %v6009_v4, -inf }
 0x5f3   :  { %v1953_v56 = vmul.f32 1.442695, %v1849_v34 }
 0x5f5   :  { %1765 = vmax.xlane.f32.xlu0 %v1764_v24 }
 0x5f6   :  { %2113 = vadd.xlane.f32.xlu2 %v2112_v55  ;;  %v6012_v55 = vpop.f32.mrf.mxu3 }
 0x5f7   :  { %v4204_v46 = vpop.eup %4203 }
 0x5f8   :  { %1759 = vmax.xlane.f32.xlu1 %v1758_v9  ;;  %v1667_v16 = vpop.xlane.xlu0 %1666  ;;  %v2257_v9 = vmul.f32 %v4204_v46, %v5803_v18 }
 0x5f9   :  { %v1825_v24 = vsub.f32 %v5820_v23, %v1667_v16  ;;  %v1692_v16 = vsel %vm1616_vm5, %v6012_v55, -inf }
 0x5fa   :  { %v2321_v18 = vpack.c.bf16 %v2257_v9, %v2257_v9 }
 0x5fb   :  { %v1905_v23 = vmul.f32 1.442695, %v1825_v24 }
 0x5fd   :  { %1690 = vmax.xlane.f32.xlu0 %v1689_v40 }
 0x5fe   :  { %1762 = vmax.xlane.f32.xlu2 %v1761_v52 }
 0x600   :  { %2110 = vadd.xlane.f32.xlu1 %v2109_v21  ;;  %v2006_v54 = vpop.xlane.xlu0 %2005  ;;  %v2751_v21 = vpop.permute.xlu2 %2750 }
 0x601   :  { %4205 = vrcp.f32 %v2006_v54  ;;  %v2433_v54 = vunpack.c.l.b16 %v2321_v18  ;;  %v1767_v18 = vsel %vm1616_vm5, %v5994_v58, -inf }
 0x602   :  { %4207 = vpow2.f32 %v1949_v48  ;;  %v1951_v48 = vmul.f32 1.442695, %v1848_v39 }
 0x603   :  { %4209 = vpow2.f32 %v1903_v15 }
 0x604   :  { %4211 = vpow2.f32 %v1901_v47 }
 0x605   :  { %2041 = vadd.xlane.f32.xlu0 %v2040_v44  ;;  %4213 = vpow2.f32 %v1905_v23 }
 0x606   :  { %1771 = vmax.xlane.f32.xlu2 %v1770_v60  ;;  %4215 = vpow2.f32 %v1953_v56 }
 0x607   :  { %v4206_v63 = vpop.eup %4205  ;;  %4217 = vpow2.f32 %v1951_v48 }
 0x608   :  { %v2753_v8 = vpop.permute.xlu1 %2752  ;;  %1693 = vmax.xlane.f32.xlu1 %v1692_v16  ;;  %v6024_v14 = vpop.eup %4207  ;;  %v2258_v40 = vmul.f32 %v4206_v63, %v5827_v51 }
 0x609   :  { %v1670_v52 = vpop.xlane.xlu0 %1669  ;;  %2816 = vmatpush.bf16.msra.mxu2 %v2753_v8  ;;  %v6027_v6 = vpop.eup %4209  ;;  %v2115_v15 = vsel %vm1616_vm5, %v6024_v14, 0.0 }
 0x60a   :  { %v2322_v57 = vpack.c.bf16 %v2258_v40, %v2258_v40  ;;  %v6029_v13 = vpop.eup %4211  ;;  %v2046_v51 = vsel %vm1616_vm5, %v6027_v6, 0.0  ;;  %v1826_v16 = vsub.f32 %v5829_v42, %v1670_v52  ;;  %v6056_v52 = vpop.f32.mrf.mxu3 }
 0x60b   :  { %v2043_v47 = vsel %vm1616_vm5, %v6029_v13, 0.0  ;;  %v6037_v34 = vpop.eup %4213 }
 0x60c   :  { %v2434_v46 = vunpack.c.l.b16 %v2322_v57  ;;  %v6040_v9 = vpop.eup %4215  ;;  %v2049_v39 = vsel %vm1616_vm5, %v6037_v34, 0.0  ;;  %v1907_v8 = vmul.f32 1.442695, %v1826_v16 }
 0x60d   :  { %2817 = vmatpush.bf16.msra.mxu2 %v2751_v21  ;;  %2116 = vadd.xlane.f32.xlu0 %v2115_v15  ;;  %v6042_v60 = vpop.eup %4217  ;;  %v2121_v23 = vsel %vm1616_vm5, %v6040_v9, 0.0 }
 0x60e   :  { %2047 = vadd.xlane.f32.xlu2 %v2046_v51  ;;  %v2465_v24 = vpack.c.b16 %v2434_v46, %v2433_v54  ;;  %v2118_v63 = vsel %vm1616_vm5, %v6042_v60, 0.0 }
 0x610   :  { %2044 = vadd.xlane.f32.xlu1 %v2043_v47  ;;  %4031 = vmatmul.msk.bf16.vlgmr.msrb.gmra.mxu1 %vm1616_vm5, %v2465_v24 }
 0x611   :  { %v2009_v44 = vpop.xlane.xlu0 %2008 }
 0x612   :  { %4219 = vrcp.f32 %v2009_v44 }
 0x613   :  { %4221 = vpow2.f32 %v1907_v8  ;;  %v6067_v8 = vpop.f32.mrf.mxu3 }
 0x615   :  { %2050 = vadd.xlane.f32.xlu0 %v2049_v39 }
 0x616   :  { %2122 = vadd.xlane.f32.xlu2 %v2121_v23 }
 0x618   :  { %2119 = vadd.xlane.f32.xlu1 %v2118_v63  ;;  %v4220_v57 = vpop.eup %4219 }
 0x619   :  { %v1748_v56 = vpop.xlane.xlu0 %1747  ;;  %v6054_v42 = vpop.eup %4221  ;;  %v2259_v46 = vmul.f32 %v4220_v57, %v5849_v61 }
 0x61a   :  { %v1852_v15 = vsub.f32 %v5851_v2, %v1748_v56  ;;  %v2052_v51 = vsel %vm1616_vm5, %v6054_v42, 0.0 }
 0x61b   :  { %v2323_v23 = vpack.c.bf16 %v2259_v46, %v2259_v46  ;;  %v6077_v46 = vpop.f32.mrf.mxu3 }
 0x61c   :  { %v1959_v24 = vmul.f32 1.442695, %v1852_v15 }
 0x61d   :  { %v2435_v61 = vunpack.c.l.b16 %v2323_v23 }
 0x620   :  { %1768 = vmax.xlane.f32.xlu1 %v1767_v18 }
 0x621   :  { %v1673_v40 = vpop.xlane.xlu0 %1672  ;;  %v2012_v48 = vpop.xlane.xlu2 %2011 }
 0x622   :  { %v1827_v21 = vsub.f32 %v5844_v22, %v1673_v40  ;;  %4223 = vrcp.f32 %v2012_v48 }
 0x624   :  { %v1909_v54 = vmul.f32 1.442695, %v1827_v21 }
 0x626   :  { %4225 = vpow2.f32 %v1909_v54 }
 0x627   :  { %4227 = vpow2.f32 %v1959_v24 }
 0x628   :  { %v4224_v47 = vpop.eup %4223  ;;  %2053 = vadd.xlane.f32.xlu1 %v2052_v51 }
 0x629   :  { %v1682_v44 = vpop.xlane.xlu0 %1681  ;;  %v2018_v39 = vpop.xlane.xlu2 %2017  ;;  %v2260_v22 = vmul.f32 %v4224_v47, %v5869_v25 }
 0x62a   :  { %4229 = vrcp.f32 %v2018_v39  ;;  %v1830_v23 = vsub.f32 %v5881_v50, %v1682_v44 }
 0x62b   :  { %v2324_v16 = vpack.c.bf16 %v2260_v22, %v2260_v22 }
 0x62c   :  { %v6063_v63 = vpop.eup %4225 }
 0x62d   :  { %v2055_v2 = vsel %vm1616_vm5, %v6063_v63, 0.0  ;;  %v2436_v56 = vunpack.c.l.b16 %v2324_v16  ;;  %v6072_v25 = vpop.eup %4227 }
 0x62e   :  { %2056 = vadd.xlane.f32.xlu2 %v2055_v2  ;;  %v2130_v15 = vsel %vm1616_vm5, %v6072_v25, 0.0 }
 0x62f   :  { %v2466_v18 = vpack.c.b16 %v2436_v56, %v2435_v61  ;;  %v1915_v61 = vmul.f32 1.442695, %v1830_v23  ;;  %v6096_v23 = vpop.f32.mrf.mxu0 }
 0x630   :  { %v4230_v22 = vpop.eup %4229 }
 0x631   :  { %v1757_v40 = vpop.xlane.xlu0 %1756  ;;  %v6069_v48 = vpop.xlane.xlu2 %1753  ;;  %4032 = vmatmul.msk.bf16.gmra.mxu1 %vm1616_vm5, %v2466_v18  ;;  %v2262_v2 = vmul.f32 %v4230_v22, %v5883_v32 }
 0x632   :  { %v1855_v50 = vsub.f32 %v5891_v7, %v1757_v40  ;;  %v1698_v7 = vsel %vm1616_vm5, %v6067_v8, -inf }
 0x633   :  { %v1742_v57 = vpop.xlane.xlu1 %1741 }
 0x634   :  { %v1850_v21 = vsub.f32 %v5825_v10, %v1742_v57  ;;  %v1695_v10 = vsel %vm1616_vm5, %v6056_v52, -inf }
 0x636   :  { %v1955_v54 = vmul.f32 1.442695, %v1850_v21  ;;  %2131 = vadd.xlane.f32.xlu2 %v2130_v15  ;;  %v6089_v21 = vpop.f32.mrf.mxu3 }
 0x637   :  { %v1704_v32 = vsel %vm1616_vm5, %v6089_v21, -inf }
 0x638   :  { %4231 = vpow2.f32 %v1955_v54  ;;  %v2326_v54 = vpack.c.bf16 %v2262_v2, %v2262_v2 }
 0x639   :  { %v6079_v51 = vpop.xlane.xlu0 %2026  ;;  %v1679_v47 = vpop.xlane.xlu2 %1678 }
 0x63b   :  { %v2015_v24 = vpop.xlane.xlu1 %2014 }
 0x63c   :  { %4233 = vrcp.f32 %v2015_v24 }
 0x63d   :  { %4235 = vpow2.f32 %v1915_v61 }
 0x63e   :  { %v6084_v16 = vpop.eup %4231  ;;  %1696 = vmax.xlane.f32.xlu2 %v1695_v10  ;;  %v1965_v10 = vmul.f32 1.442695, %v1855_v50 }
 0x63f   :  { %v2124_v39 = vsel %vm1616_vm5, %v6084_v16, 0.0 }
 0x640   :  { %2125 = vadd.xlane.f32.xlu0 %v2124_v39 }
 0x641   :  { %v2102_v56 = vpop.xlane.xlu0 %2101  ;;  %v2024_v18 = vpop.xlane.xlu2 %2023 }
 0x642   :  { %v4234_v57 = vpop.eup %4233  ;;  %4237 = vrcp.f32 %v2102_v56 }
 0x643   :  { %v1745_v44 = vpop.xlane.xlu1 %1744  ;;  %v2261_v15 = vmul.f32 %v4234_v57, %v5904_v53  ;;  %4239 = vrcp.f32 %v2024_v18  ;;  %v2438_v53 = vunpack.c.l.b16 %v2326_v54  ;;  %v6100_v56 = vpop.eup %4235  ;;  %v1829_v54 = vsub.f32 %v5867_v33, %v1679_v47 }
 0x644   :  { %v1851_v24 = vsub.f32 %v5842_v19, %v1745_v44  ;;  %v2064_v50 = vsel %vm1616_vm5, %v6100_v56, 0.0 }
 0x645   :  { %v2325_v22 = vpack.c.bf16 %v2261_v15, %v2261_v15  ;;  %v1913_v47 = vmul.f32 1.442695, %v1829_v54 }
 0x646   :  { %v1957_v39 = vmul.f32 1.442695, %v1851_v24  ;;  %1705 = vmax.xlane.f32.xlu2 %v1704_v32  ;;  %v1773_v32 = vsel %vm1616_vm5, %v6096_v23, -inf }
 0x647   :  { %v2437_v40 = vunpack.c.l.b16 %v2325_v22 }
 0x648   :  { %4241 = vpow2.f32 %v1957_v39  ;;  %1699 = vmax.xlane.f32.xlu0 %v1698_v7  ;;  %v4238_v57 = vpop.eup %4237  ;;  %v6116_v7 = vpop.f32.mrf.mxu0 }
 0x649   :  { %v2030_v2 = vpop.xlane.xlu0 %2029  ;;  %v2099_v19 = vpop.xlane.xlu2 %2098  ;;  %v2467_v61 = vpack.c.b16 %v2438_v53, %v2437_v40  ;;  %4243 = vpow2.f32 %v1965_v10  ;;  %v2290_v24 = vmul.f32 %v4238_v57, %v5914_v17 }
 0x64a   :  { %4245 = vrcp.f32 %v2099_v19  ;;  %v4240_v18 = vpop.eup %4239 }
 0x64b   :  { %v2021_v44 = vpop.xlane.xlu1 %2020  ;;  %4033 = vmatmul.msk.bf16.gmra.mxu1 %vm1616_vm5, %v2467_v61  ;;  %v2264_v10 = vmul.f32 %v4240_v18, %v5916_v1  ;;  %v2354_v19 = vpack.c.bf16 %v2290_v24, %v2290_v24 }
 0x64c   :  { %4247 = vrcp.f32 %v2021_v44 }
 0x64d   :  { %4249 = vrcp.f32 %v6079_v51  ;;  %v2328_v44 = vpack.c.bf16 %v2264_v10, %v2264_v10 }
 0x64e   :  { %v6105_v15 = vpop.eup %4241  ;;  %2065 = vadd.xlane.f32.xlu2 %v2064_v50  ;;  %4251 = vrcp.f32 %v2030_v2 }
 0x64f   :  { %v2127_v22 = vsel %vm1616_vm5, %v6105_v15, 0.0  ;;  %v6114_v39 = vpop.eup %4243  ;;  %v2440_v10 = vunpack.c.l.b16 %v2328_v44 }
 0x650   :  { %1774 = vmax.xlane.f32.xlu0 %v1773_v32  ;;  %2128 = vadd.xlane.f32.xlu1 %v2127_v22  ;;  %v4246_v40 = vpop.eup %4245  ;;  %v1854_v32 = vsub.f32 %v5879_v35, %v6069_v48  ;;  %v2139_v54 = vsel %vm1616_vm5, %v6114_v39, 0.0 }
 0x651   :  { %v2105_v53 = vpop.xlane.xlu0 %2104  ;;  %v6118_v33 = vpop.xlane.xlu2 %1687  ;;  %v2289_v61 = vmul.f32 %v4246_v40, %v5929_v38  ;;  %v2683_v38 = vunpack.c.l.b16 %v2354_v19 }
 0x652   :  { %v4248_v17 = vpop.eup %4247  ;;  %4253 = vrcp.f32 %v2105_v53 }
 0x653   :  { %v1676_v57 = vpop.xlane.xlu1 %1675  ;;  %v2263_v1 = vmul.f32 %v4248_v17, %v5932_v27  ;;  %v2353_v18 = vpack.c.bf16 %v2289_v61, %v2289_v61  ;;  %4255 = vpow2.f32 %v1913_v47  ;;  %v1776_v27 = vsel %vm1616_vm5, %v6116_v7, -inf  ;;  %v6130_v61 = vpop.f32.mrf.mxu0 }
 0x654   :  { %v1828_v50 = vsub.f32 %v5856_v3, %v1676_v57  ;;  %v4250_v3 = vpop.eup %4249  ;;  %v1963_v47 = vmul.f32 1.442695, %v1854_v32 }
 0x655   :  { %v2327_v24 = vpack.c.bf16 %v2263_v1, %v2263_v1  ;;  %v2682_v22 = vunpack.c.l.b16 %v2353_v18  ;;  %v4252_v17 = vpop.eup %4251  ;;  %v1779_v18 = vsel %vm1616_vm5, %v6130_v61, -inf }
 0x656   :  { %v1911_v51 = vmul.f32 1.442695, %v1828_v50  ;;  %2140 = vadd.xlane.f32.xlu2 %v2139_v54  ;;  %v2266_v50 = vmul.f32 %v4252_v17, %v5927_v31  ;;  %v1832_v17 = vsub.f32 %v5943_v5, %v6118_v33 }
 0x657   :  { %v2439_v2 = vunpack.c.l.b16 %v2327_v24  ;;  %v2714_v40 = vpack.c.b16 %v2683_v38, %v2682_v22 }
 0x658   :  { %4257 = vpow2.f32 %v1911_v51  ;;  %1777 = vmax.xlane.f32.xlu1 %v1776_v27  ;;  %v4254_v19 = vpop.eup %4253 }
 0x659   :  { %v2033_v35 = vpop.xlane.xlu0 %2032  ;;  %v2108_v48 = vpop.xlane.xlu2 %2107  ;;  %v2468_v53 = vpack.c.b16 %v2440_v10, %v2439_v2  ;;  %4047 = vmatmul.msk.bf16.vlgmr.msra.gmra.mxu2 %vm1616_vm5, %v2714_v40  ;;  %v2291_v32 = vmul.f32 %v4254_v19, %v5941_v45  ;;  %v2330_v2 = vpack.c.bf16 %v2266_v50, %v2266_v50 }
 0x65a   :  { %4259 = vrcp.f32 %v2108_v48  ;;  %v6134_v1 = vpop.eup %4255 }
 0x65b   :  { %v1751_v57 = vpop.xlane.xlu1 %1750  ;;  %4034 = vmatmul.msk.bf16.gmra.mxu1 %vm1616_vm5, %v2468_v53  ;;  %4261 = vpow2.f32 %v1963_v47  ;;  %v2061_v22 = vsel %vm1616_vm5, %v6134_v1, 0.0  ;;  %v2355_v10 = vpack.c.bf16 %v2291_v32, %v2291_v32 }
 0x65c   :  { %v1853_v44 = vsub.f32 %v5865_v12, %v1751_v57  ;;  %v2265_v12 = vmul.f32 %v4250_v3, %v5901_v29  ;;  %v2442_v3 = vunpack.c.l.b16 %v2330_v2 }
 0x65d   :  { %v2684_v57 = vunpack.c.l.b16 %v2355_v10 }
 0x65e   :  { %v6140_v54 = vpop.eup %4257  ;;  %v1961_v24 = vmul.f32 1.442695, %v1853_v44  ;;  %1780 = vmax.xlane.f32.xlu2 %v1779_v18  ;;  %v2329_v48 = vpack.c.bf16 %v2265_v12, %v2265_v12 }
 0x65f   :  { %v2058_v38 = vsel %vm1616_vm5, %v6140_v54, 0.0 }
 0x660   :  { %4263 = vpow2.f32 %v1961_v24  ;;  %2059 = vadd.xlane.f32.xlu0 %v2058_v38  ;;  %2062 = vadd.xlane.f32.xlu1 %v2061_v22  ;;  %v4260_v51 = vpop.eup %4259  ;;  %v2441_v32 = vunpack.c.l.b16 %v2329_v48  ;;  %v1919_v24 = vmul.f32 1.442695, %v1832_v17  ;;  %v1701_v17 = vsel %vm1616_vm5, %v6077_v46, -inf }
 0x661   :  { %v2036_v31 = vpop.xlane.xlu0 %2035  ;;  %v2039_v27 = vpop.xlane.xlu2 %2038  ;;  %v2292_v45 = vmul.f32 %v4260_v51, %v5957_v0 }
 0x662   :  { %v6149_v53 = vpop.eup %4261  ;;  %4265 = vrcp.f32 %v2036_v31  ;;  %v2469_v38 = vpack.c.b16 %v2442_v3, %v2441_v32 }
 0x663   :  { %v1685_v40 = vpop.xlane.xlu1 %1684  ;;  %v2356_v47 = vpack.c.bf16 %v2292_v45, %v2292_v45  ;;  %4267 = vrcp.f32 %v2033_v35  ;;  %v2136_v50 = vsel %vm1616_vm5, %v6149_v53, 0.0 }
 0x664   :  { %v1831_v29 = vsub.f32 %v5923_v62, %v1685_v40  ;;  %v6167_v40 = vpop.f32.mrf.mxu0 }
 0x665   :  { %v2685_v44 = vunpack.c.l.b16 %v2356_v47 }
 0x666   :  { %v6154_v19 = vpop.eup %4263  ;;  %v1917_v18 = vmul.f32 1.442695, %v1831_v29  ;;  %v6174_v29 = vpop.f32.mrf.mxu3 }
 0x667   :  { %v2133_v0 = vsel %vm1616_vm5, %v6154_v19, 0.0  ;;  %v2715_v5 = vpack.c.b16 %v2685_v44, %v2684_v57 }
 0x668   :  { %4269 = vpow2.f32 %v1917_v18  ;;  %2134 = vadd.xlane.f32.xlu0 %v2133_v0  ;;  %2137 = vadd.xlane.f32.xlu1 %v2136_v50  ;;  %v4266_v22 = vpop.eup %4265 }
 0x669   :  { %v1766_v62 = vpop.xlane.xlu0 %1765  ;;  %v2114_v33 = vpop.xlane.xlu2 %2113  ;;  %4048 = vmatmul.msk.bf16.gmra.mxu2 %vm1616_vm5, %v2715_v5  ;;  %4271 = vpow2.f32 %v1919_v24  ;;  %v2268_v10 = vmul.f32 %v4266_v22, %v5968_v26 }
 0x66a   :  { %v1858_v35 = vsub.f32 %v5976_v36, %v1766_v62  ;;  %v4268_v51 = vpop.eup %4267  ;;  %4273 = vrcp.f32 %v2114_v33 }
 0x66b   :  { %v1760_v12 = vpop.xlane.xlu1 %1759  ;;  %4035 = vmatmul.msk.bf16.gmra.mxu1 %vm1616_vm5, %v2469_v38  ;;  %v2267_v47 = vmul.f32 %v4268_v51, %v5955_v43  ;;  %v2332_v3 = vpack.c.bf16 %v2268_v10, %v2268_v10 }
 0x66c   :  { %v1971_v31 = vmul.f32 1.442695, %v1858_v35  ;;  %v1856_v2 = vsub.f32 %v5945_v49, %v1760_v12 }
 0x66d   :  { %v2331_v50 = vpack.c.bf16 %v2267_v47, %v2267_v47  ;;  %v2444_v5 = vunpack.c.l.b16 %v2332_v3 }
 0x66e   :  { %v6165_v45 = vpop.eup %4269  ;;  %4275 = vpow2.f32 %v1971_v31  ;;  %v1967_v48 = vmul.f32 1.442695, %v1856_v2 }
 0x66f   :  { %v2067_v36 = vsel %vm1616_vm5, %v6165_v45, 0.0  ;;  %v6176_v57 = vpop.eup %4271  ;;  %v2443_v35 = vunpack.c.l.b16 %v2331_v50 }
 0x670   :  { %4277 = vpow2.f32 %v1967_v48  ;;  %2068 = vadd.xlane.f32.xlu0 %v2067_v36  ;;  %1702 = vmax.xlane.f32.xlu1 %v1701_v17  ;;  %v4274_v18 = vpop.eup %4273  ;;  %v2070_v22 = vsel %vm1616_vm5, %v6176_v57, 0.0  ;;  %v6193_v48 = vpop.f32.mrf.mxu3 }
 0x671   :  { %v1691_v49 = vpop.xlane.xlu0 %1690  ;;  %v1763_v26 = vpop.xlane.xlu2 %1762  ;;  %v2470_v31 = vpack.c.b16 %v2444_v5, %v2443_v35 }
 0x672   :  { %v1833_v44 = vsub.f32 %v5992_v41, %v1691_v49  ;;  %v1857_v33 = vsub.f32 %v5959_v37, %v1763_v26  ;;  %v2294_v41 = vmul.f32 %v4274_v18, %v5983_v59  ;;  %v1710_v18 = vsel %vm1616_vm5, %v6193_v48, -inf }
 0x673   :  { %v2111_v0 = vpop.xlane.xlu1 %2110 }
 0x674   :  { %v6179_v32 = vpop.eup %4275  ;;  %v1921_v24 = vmul.f32 1.442695, %v1833_v44  ;;  %4279 = vrcp.f32 %v2111_v0  ;;  %v1969_v10 = vmul.f32 1.442695, %v1857_v33  ;;  %v2358_v59 = vpack.c.bf16 %v2294_v41, %v2294_v41 }
 0x675   :  { %4281 = vrcp.f32 %v2039_v27  ;;  %v2148_v43 = vsel %vm1616_vm5, %v6179_v32, 0.0  ;;  %v6191_v27 = vpop.f32.mrf.mxu0  ;;  %v1782_v44 = vsel %vm1616_vm5, %v6167_v40, -inf }
 0x676   :  { %v6183_v62 = vpop.eup %4277  ;;  %4283 = vpow2.f32 %v1921_v24  ;;  %2149 = vadd.xlane.f32.xlu2 %v2148_v43 }
 0x677   :  { %v2142_v38 = vsel %vm1616_vm5, %v6183_v62, 0.0 }
 0x678   :  { %2143 = vadd.xlane.f32.xlu0 %v2142_v38  ;;  %2071 = vadd.xlane.f32.xlu1 %v2070_v22 }
 0x679   :  { %v2042_v12 = vpop.xlane.xlu0 %2041  ;;  %v1772_v51 = vpop.xlane.xlu2 %1771 }
 0x67a   :  { %v4280_v2 = vpop.eup %4279  ;;  %4285 = vrcp.f32 %v2042_v12 }
 0x67b   :  { %v4282_v37 = vpop.eup %4281  ;;  %v2293_v36 = vmul.f32 %v4280_v2, %v5997_v11  ;;  %v1694_v17 = vpop.xlane.xlu1 %1693  ;;  %4036 = vmatmul.msk.bf16.gmra.mxu1 %vm1616_vm5, %v2470_v31  ;;  %4287 = vpow2.f32 %v1969_v10  ;;  %v2687_v11 = vunpack.c.l.b16 %v2358_v59  ;;  %v1707_v10 = vsel %vm1616_vm5, %v6174_v29, -inf }
 0x67c   :  { %v6197_v47 = vpop.eup %4283  ;;  %v1834_v49 = vsub.f32 %v6012_v55, %v1694_v17  ;;  %v2269_v24 = vmul.f32 %v4282_v37, %v5970_v30 }
 0x67d   :  { %v2357_v26 = vpack.c.bf16 %v2293_v36, %v2293_v36  ;;  %v2073_v3 = vsel %vm1616_vm5, %v6197_v47, 0.0  ;;  %v6208_v33 = vpop.f32.mrf.mxu0 }
 0x67e   :  { %2074 = vadd.xlane.f32.xlu2 %v2073_v3  ;;  %v1923_v50 = vmul.f32 1.442695, %v1834_v49  ;;  %v2333_v35 = vpack.c.bf16 %v2269_v24, %v2269_v24  ;;  %v1788_v30 = vsel %vm1616_vm5, %v6208_v33, -inf }
 0x67f   :  { %v2686_v0 = vunpack.c.l.b16 %v2357_v26 }
 0x680   :  { %v4286_v43 = vpop.eup %4285  ;;  %1783 = vmax.xlane.f32.xlu0 %v1782_v44  ;;  %1711 = vmax.xlane.f32.xlu1 %v1710_v18  ;;  %4289 = vpow2.f32 %v1923_v50  ;;  %v2445_v59 = vunpack.c.l.b16 %v2333_v35 }
 0x681   :  { %v2716_v55 = vpack.c.b16 %v2687_v11, %v2686_v0  ;;  %v2270_v5 = vmul.f32 %v4286_v43, %v6007_v28  ;;  %v2117_v41 = vpop.xlane.xlu0 %2116  ;;  %v2048_v38 = vpop.xlane.xlu2 %2047  ;;  %v1860_v28 = vsub.f32 %v6009_v4, %v1772_v51  ;;  %v1785_v0 = vsel %vm1616_vm5, %v6191_v27, -inf }
 0x682   :  { %v6211_v31 = vpop.eup %4287 }
 0x683   :  { %v2045_v22 = vpop.xlane.xlu1 %2044  ;;  %4049 = vmatmul.msk.bf16.gmra.mxu2 %vm1616_vm5, %v2716_v55  ;;  %v2334_v12 = vpack.c.bf16 %v2270_v5, %v2270_v5  ;;  %v2145_v37 = vsel %vm1616_vm5, %v6211_v31, 0.0  ;;  %v1975_v26 = vmul.f32 1.442695, %v1860_v28 }
 0x684   :  { %4291 = vrcp.f32 %v2045_v22 }
 0x685   :  { %4293 = vrcp.f32 %v2117_v41  ;;  %v2446_v2 = vunpack.c.l.b16 %v2334_v12 }
 0x686   :  { %4295 = vrcp.f32 %v2048_v38  ;;  %1789 = vmax.xlane.f32.xlu2 %v1788_v30  ;;  %v6220_v36 = vpop.eup %4289 }
 0x687   :  { %v2471_v17 = vpack.c.b16 %v2446_v2, %v2445_v59  ;;  %v2076_v11 = vsel %vm1616_vm5, %v6220_v36, 0.0 }
 0x688   :  { %1708 = vmax.xlane.f32.xlu0 %v1707_v10  ;;  %2146 = vadd.xlane.f32.xlu1 %v2145_v37 }
 0x689   :  { %v2051_v5 = vpop.xlane.xlu0 %2050  ;;  %v2123_v37 = vpop.xlane.xlu2 %2122 }
 0x68a   :  { %v4292_v49 = vpop.eup %4291 }
 0x68b   :  { %v4294_v3 = vpop.eup %4293  ;;  %v2120_v44 = vpop.xlane.xlu1 %2119  ;;  %4037 = vmatmul.msk.bf16.gmra.mxu1 %vm1616_vm5, %v2471_v17  ;;  %v2271_v51 = vmul.f32 %v4292_v49, %v6029_v13 }
 0x68c   :  { %v4296_v4 = vpop.eup %4295  ;;  %4297 = vrcp.f32 %v2120_v44  ;;  %v2295_v18 = vmul.f32 %v4294_v3, %v6024_v14  ;;  %v6238_v49 = vpop.f32.mrf.mxu0 }
 0x68d   :  { %4299 = vpow2.f32 %v1975_v26  ;;  %v2272_v50 = vmul.f32 %v4296_v4, %v6027_v6  ;;  %v2335_v24 = vpack.c.bf16 %v2271_v51, %v2271_v51  ;;  %v1791_v4 = vsel %vm1616_vm5, %v6238_v49, -inf }
 0x68e   :  { %v2359_v55 = vpack.c.bf16 %v2295_v18, %v2295_v18  ;;  %4301 = vrcp.f32 %v2051_v5 }
 0x68f   :  { %v2336_v38 = vpack.c.bf16 %v2272_v50, %v2272_v50  ;;  %v2447_v12 = vunpack.c.l.b16 %v2335_v24  ;;  %v6250_v50 = vpop.f32.mrf.mxu1 }
 0x690   :  { %2077 = vadd.xlane.f32.xlu0 %v2076_v11  ;;  %1786 = vmax.xlane.f32.xlu1 %v1785_v0  ;;  %v2688_v2 = vunpack.c.l.b16 %v2359_v55 }
 0x691   :  { %v2448_v10 = vunpack.c.l.b16 %v2336_v38 }
 0x692   :  { %v4298_v43 = vpop.eup %4297 }
 0x693   :  { %v2296_v41 = vmul.f32 %v4298_v43, %v6042_v60  ;;  %v1769_v13 = vpop.xlane.xlu1 %1768  ;;  %v6231_v22 = vpop.eup %4299  ;;  %v2472_v60 = vpack.c.b16 %v2448_v10, %v2447_v12 }
 0x694   :  { %v1859_v14 = vsub.f32 %v5994_v58, %v1769_v13  ;;  %v2154_v28 = vsel %vm1616_vm5, %v6231_v22, 0.0  ;;  %v4302_v58 = vpop.eup %4301 }
 0x695   :  { %v2360_v35 = vpack.c.bf16 %v2296_v41, %v2296_v41  ;;  %v2273_v3 = vmul.f32 %v4302_v58, %v6037_v34  ;;  %v4116_v41 = vld [vmem:[%s7190_s2 + $0x8] sm:$0xff] }
 0x696   :  { %v1973_v30 = vmul.f32 1.442695, %v1859_v14  ;;  %3130 = vmatpush.bf16.msra.mxu3 %v4116_v41 }
 0x697   :  { %v2689_v6 = vunpack.c.l.b16 %v2360_v35  ;;  %v2337_v11 = vpack.c.bf16 %v2273_v3, %v2273_v3  ;;  %v6256_v13 = vpop.f32.mrf.mxu1 }
 0x698   :  { %4303 = vpow2.f32 %v1973_v30  ;;  %2155 = vadd.xlane.f32.xlu1 %v2154_v28 }
 0x699   :  { %v2717_v59 = vpack.c.b16 %v2689_v6, %v2688_v2  ;;  %v2449_v43 = vunpack.c.l.b16 %v2337_v11  ;;  %v6272_v11 = vpop.f32.mrf.mxu0 }
 0x69b   :  { %v2054_v17 = vpop.xlane.xlu1 %2053  ;;  %4038 = vmatmul.msk.bf16.gmra.mxu1 %vm1616_vm5, %v2472_v60  ;;  %4050 = vmatmul.msk.bf16.gmra.mxu2 %vm1616_vm5, %v2717_v59 }
 0x69c   :  { %4305 = vrcp.f32 %v2054_v17 }
 0x69d   :  { %4307 = vrcp.f32 %v2123_v37 }
 0x69e   :  { %v6240_v26 = vpop.eup %4303 }
 0x69f   :  { %v2151_v44 = vsel %vm1616_vm5, %v6240_v26, 0.0 }
 0x6a0   :  { %2152 = vadd.xlane.f32.xlu0 %v2151_v44  ;;  %1792 = vmax.xlane.f32.xlu1 %v1791_v4 }
 0x6a1   :  { %v6247_v51 = vpop.xlane.xlu2 %2056 }
 0x6a2   :  { %v4306_v18 = vpop.eup %4305 }
 0x6a3   :  { %v2274_v0 = vmul.f32 %v4306_v18, %v6054_v42  ;;  %v4308_v35 = vpop.eup %4307 }
 0x6a4   :  { %v2297_v2 = vmul.f32 %v4308_v35, %v6040_v9 }
 0x6a5   :  { %v2338_v24 = vpack.c.bf16 %v2274_v0, %v2274_v0 }
 0x6a6   :  { %v2361_v10 = vpack.c.bf16 %v2297_v2, %v2297_v2 }
 0x6a7   :  { %v2450_v55 = vunpack.c.l.b16 %v2338_v24 }
 0x6a8   :  { %v2690_v44 = vunpack.c.l.b16 %v2361_v10 }
 0x6a9   :  { %v2132_v34 = vpop.xlane.xlu2 %2131  ;;  %v2473_v5 = vpack.c.b16 %v2450_v55, %v2449_v43  ;;  %v1794_v55 = vsel %vm1616_vm5, %v6272_v11, -inf }
 0x6ab   :  { %4039 = vmatmul.msk.bf16.gmra.mxu1 %vm1616_vm5, %v2473_v5 }
 0x6ae   :  { %v6259_v30 = vpop.f32.mrf.mxu1 }
 0x6b1   :  { %v1697_v38 = vpop.xlane.xlu2 %1696 }
 0x6b2   :  { %v1835_v42 = vsub.f32 %v6056_v52, %v1697_v38 }
 0x6b3   :  { %v2126_v14 = vpop.xlane.xlu0 %2125 }
 0x6b4   :  { %v1925_v12 = vmul.f32 1.442695, %v1835_v42  ;;  %4309 = vrcp.f32 %v2126_v14 }
 0x6b6   :  { %4311 = vpow2.f32 %v1925_v12  ;;  %v6268_v9 = vpop.f32.mrf.mxu1 }
 0x6b7   :  { %4313 = vrcp.f32 %v2132_v34 }
 0x6b9   :  { %v1706_v6 = vpop.xlane.xlu2 %1705 }
 0x6ba   :  { %v4310_v28 = vpop.eup %4309  ;;  %v1838_v5 = vsub.f32 %v6089_v21, %v1706_v6 }
 0x6bb   :  { %v2298_v37 = vmul.f32 %v4310_v28, %v6084_v16  ;;  %v1700_v60 = vpop.xlane.xlu0 %1699 }
 0x6bc   :  { %v6263_v59 = vpop.eup %4311  ;;  %v1836_v17 = vsub.f32 %v6067_v8, %v1700_v60  ;;  %v1931_v12 = vmul.f32 1.442695, %v1838_v5 }
 0x6bd   :  { %v2362_v52 = vpack.c.bf16 %v2298_v37, %v2298_v37  ;;  %v2079_v58 = vsel %vm1616_vm5, %v6263_v59, 0.0  ;;  %v4314_v24 = vpop.eup %4313 }
 0x6be   :  { %v1927_v3 = vmul.f32 1.442695, %v1836_v17  ;;  %2080 = vadd.xlane.f32.xlu2 %v2079_v58  ;;  %v2300_v38 = vmul.f32 %v4314_v24, %v6072_v25 }
 0x6bf   :  { %v2691_v4 = vunpack.c.l.b16 %v2362_v52 }
 0x6c0   :  { %4315 = vpow2.f32 %v1927_v3  ;;  %v2364_v2 = vpack.c.bf16 %v2300_v38, %v2300_v38 }
 0x6c1   :  { %v6270_v18 = vpop.xlane.xlu2 %2065  ;;  %v2718_v16 = vpack.c.b16 %v2691_v4, %v2690_v44 }
 0x6c2   :  { %v2693_v60 = vunpack.c.l.b16 %v2364_v2 }
 0x6c3   :  { %v2129_v0 = vpop.xlane.xlu1 %2128  ;;  %4051 = vmatmul.msk.bf16.gmra.mxu2 %vm1616_vm5, %v2718_v16  ;;  %v1775_v8 = vpop.xlane.xlu0 %1774 }
 0x6c4   :  { %4317 = vrcp.f32 %v2129_v0  ;;  %v1861_v43 = vsub.f32 %v6096_v23, %v1775_v8 }
 0x6c6   :  { %v6278_v34 = vpop.eup %4315  ;;  %v1977_v41 = vmul.f32 1.442695, %v1861_v43  ;;  %1795 = vmax.xlane.f32.xlu2 %v1794_v55 }
 0x6c7   :  { %v2082_v42 = vsel %vm1616_vm5, %v6278_v34, 0.0 }
 0x6c8   :  { %4319 = vpow2.f32 %v1977_v41  ;;  %v6284_v14 = vpop.f32.mrf.mxu1  ;;  %2083 = vadd.xlane.f32.xlu0 %v2082_v42 }
 0x6c9   :  { %v6286_v35 = vpop.xlane.xlu2 %2140  ;;  %4321 = vpow2.f32 %v1931_v12 }
 0x6ca   :  { %v4318_v23 = vpop.eup %4317  ;;  %4323 = vrcp.f32 %v6247_v51 }
 0x6cb   :  { %v2299_v28 = vmul.f32 %v4318_v23, %v6105_v15  ;;  %v1778_v10 = vpop.xlane.xlu1 %1777  ;;  %v6312_v23 = vpop.f32.mrf.mxu0 }
 0x6cc   :  { %v1862_v21 = vsub.f32 %v6116_v7, %v1778_v10 }
 0x6cd   :  { %v2363_v6 = vpack.c.bf16 %v2299_v28, %v2299_v28 }
 0x6ce   :  { %v6290_v37 = vpop.eup %4319  ;;  %v1979_v25 = vmul.f32 1.442695, %v1862_v21 }
 0x6cf   :  { %v2692_v17 = vunpack.c.l.b16 %v2363_v6  ;;  %v2157_v52 = vsel %vm1616_vm5, %v6290_v37, 0.0  ;;  %v6299_v16 = vpop.eup %4321 }
 0x6d0   :  { %4325 = vpow2.f32 %v1979_v25  ;;  %v6295_v58 = vpop.f32.mrf.mxu1  ;;  %2158 = vadd.xlane.f32.xlu0 %v2157_v52  ;;  %v4324_v0 = vpop.eup %4323  ;;  %v2088_v43 = vsel %vm1616_vm5, %v6299_v16, 0.0 }
 0x6d1   :  { %v1781_v15 = vpop.xlane.xlu2 %1780  ;;  %v2719_v3 = vpack.c.b16 %v2693_v60, %v2692_v17 }
 0x6d2   :  { %v1863_v7 = vsub.f32 %v6130_v61, %v1781_v15  ;;  %v2275_v61 = vmul.f32 %v4324_v0, %v6063_v63  ;;  %v1797_v63 = vsel %vm1616_vm5, %v6312_v23, -inf }
 0x6d3   :  { %v2063_v44 = vpop.xlane.xlu1 %2062  ;;  %4052 = vmatmul.msk.bf16.gmra.mxu2 %vm1616_vm5, %v2719_v3  ;;  %v2060_v4 = vpop.xlane.xlu0 %2059 }
 0x6d4   :  { %v1981_v51 = vmul.f32 1.442695, %v1863_v7  ;;  %4327 = vrcp.f32 %v2060_v4  ;;  %v2339_v12 = vpack.c.bf16 %v2275_v61, %v2275_v61  ;;  %v2899_v61 = vmul.f32 %v6250_v50, %v5441_v20 }
 0x6d6   :  { %v6301_v8 = vpop.eup %4325  ;;  %4329 = vpow2.f32 %v1981_v51  ;;  %v2451_v21 = vunpack.c.l.b16 %v2339_v12 }
 0x6d7   :  { %v2160_v24 = vsel %vm1616_vm5, %v6301_v8, 0.0  ;;  %4331 = vrcp.f32 %v2063_v44 }
 0x6d8   :  { %2161 = vadd.xlane.f32.xlu1 %v2160_v24  ;;  %v6308_v55 = vpop.f32.mrf.mxu1  ;;  %2089 = vadd.xlane.f32.xlu0 %v2088_v43 }
 0x6da   :  { %v4328_v5 = vpop.eup %4327 }
 0x6db   :  { %v2138_v41 = vpop.xlane.xlu1 %2137  ;;  %v2135_v38 = vpop.xlane.xlu0 %2134  ;;  %v2276_v2 = vmul.f32 %v4328_v5, %v6140_v54 }
 0x6dc   :  { %v6310_v42 = vpop.eup %4329  ;;  %4333 = vrcp.f32 %v2138_v41 }
 0x6dd   :  { %4335 = vrcp.f32 %v2135_v38  ;;  %v2340_v28 = vpack.c.bf16 %v2276_v2, %v2276_v2  ;;  %v2163_v10 = vsel %vm1616_vm5, %v6310_v42, 0.0  ;;  %v4332_v60 = vpop.eup %4331 }
 0x6de   :  { %4337 = vrcp.f32 %v6270_v18  ;;  %v2277_v0 = vmul.f32 %v4332_v60, %v6134_v1  ;;  %v2963_v1 = vsel %vm50_vm0, %v2899_v61, 0.0 }
 0x6df   :  { %v2452_v6 = vunpack.c.l.b16 %v2340_v28  ;;  %4339 = vrcp.f32 %v6286_v35 }
 0x6e0   :  { %1798 = vmax.xlane.f32.xlu1 %v1797_v63  ;;  %v6320_v25 = vpop.f32.mrf.mxu1  ;;  %2164 = vadd.xlane.f32.xlu0 %v2163_v10  ;;  %v2341_v2 = vpack.c.bf16 %v2277_v0, %v2277_v0 }
 0x6e1   :  { %v2474_v54 = vpack.c.b16 %v2452_v6, %v2451_v21 }
 0x6e2   :  { %v4334_v17 = vpop.eup %4333  ;;  %v2453_v60 = vunpack.c.l.b16 %v2341_v2  ;;  %v2901_v2 = vmul.f32 %v6259_v30, %v5441_v20 }
 0x6e3   :  { %v4336_v52 = vpop.eup %4335  ;;  %v2302_v15 = vmul.f32 %v4334_v17, %v6149_v53  ;;  %v1703_v3 = vpop.xlane.xlu1 %1702  ;;  %4040 = vmatmul.msk.bf16.gmra.mxu1 %vm1616_vm5, %v2474_v54 }
 0x6e4   :  { %v2069_v18 = vpop.xlane.xlu0 %2068  ;;  %v2301_v7 = vmul.f32 %v4336_v52, %v6154_v19  ;;  %v1837_v44 = vsub.f32 %v6077_v46, %v1703_v3  ;;  %v4338_v4 = vpop.eup %4337  ;;  %v7409_v46 = vld [vmem:[#allocation3_spill] sm:$0xff] }
 0x6e5   :  { %v2366_v51 = vpack.c.bf16 %v2302_v15, %v2302_v15  ;;  %v2278_v5 = vmul.f32 %v4338_v4, %v6100_v56  ;;  %v4340_v56 = vpop.eup %4339 }
 0x6e6   :  { %v2365_v24 = vpack.c.bf16 %v2301_v7, %v2301_v7  ;;  %v1929_v43 = vmul.f32 1.442695, %v1837_v44  ;;  %v2303_v52 = vmul.f32 %v4340_v56, %v6114_v39 }
 0x6e7   :  { %v2695_v53 = vunpack.c.l.b16 %v2366_v51  ;;  %v2342_v50 = vpack.c.bf16 %v2278_v5, %v2278_v5 }
 0x6e8   :  { %v2694_v41 = vunpack.c.l.b16 %v2365_v24  ;;  %4341 = vpow2.f32 %v1929_v43  ;;  %v2590_v19 = vpop.f32.mrf.mxu1  ;;  %v6344_v24 = vpop.f32.mrf.mxu0  ;;  %v2367_v43 = vpack.c.bf16 %v2303_v52, %v2303_v52 }
 0x6e9   :  { %v2907_v38 = vmul.f32 %v2590_v19, %v7409_v46  ;;  %v2150_v12 = vpop.xlane.xlu2 %2149  ;;  %v2454_v54 = vunpack.c.l.b16 %v2342_v50 }
 0x6ea   :  { %v2720_v28 = vpack.c.b16 %v2695_v53, %v2694_v41 }
 0x6eb   :  { %v2964_v63 = vsel %vm50_vm0, %v2907_v38, 0.0  ;;  %v2072_v10 = vpop.xlane.xlu1 %2071  ;;  %v2475_v44 = vpack.c.b16 %v2454_v54, %v2453_v60  ;;  %v6359_v60 = vpop.f32.mrf.mxu2 }
 0x6ec   :  { %v2144_v21 = vpop.xlane.xlu0 %2143  ;;  %v6334_v6 = vadd.f32 %v2964_v63, %v2963_v1  ;;  %4343 = vrcp.f32 %v2072_v10  ;;  %4053 = vmatmul.msk.bf16.gmra.mxu2 %vm1616_vm5, %v2720_v28  ;;  %v1800_v28 = vsel %vm1616_vm5, %v6344_v24, -inf }
 0x6ed   :  { %4345 = vrcp.f32 %v2144_v21  ;;  %v2977_v21 = vsel %vm50_vm0, %v2901_v2, 0.0 }
 0x6ee   :  { %v6337_v35 = vpop.eup %4341  ;;  %4347 = vrcp.f32 %v2069_v18 }
 0x6ef   :  { %v2085_v17 = vsel %vm1616_vm5, %v6337_v35, 0.0  ;;  %4349 = vrcp.f32 %v2150_v12 }
 0x6f0   :  { %v6342_v15 = vpop.f32.mrf.mxu1  ;;  %2086 = vadd.xlane.f32.xlu2 %v2085_v17 }
 0x6f1   :  { %v2075_v7 = vpop.xlane.xlu2 %2074 }
 0x6f2   :  { %v4344_v3 = vpop.eup %4343 }
 0x6f3   :  { %v4346_v4 = vpop.eup %4345  ;;  %v1712_v51 = vpop.xlane.xlu1 %1711  ;;  %4041 = vmatmul.msk.bf16.gmra.mxu1 %vm1616_vm5, %v2475_v44  ;;  %v2280_v5 = vmul.f32 %v4344_v3, %v6176_v57 }
 0x6f4   :  { %v1784_v0 = vpop.xlane.xlu0 %1783  ;;  %v2304_v18 = vmul.f32 %v4346_v4, %v6183_v62  ;;  %v1840_v61 = vsub.f32 %v6193_v48, %v1712_v51  ;;  %v4348_v53 = vpop.eup %4347  ;;  %v2696_v62 = vunpack.c.l.b16 %v2367_v43 }
 0x6f5   :  { %v1864_v39 = vsub.f32 %v6167_v40, %v1784_v0  ;;  %v2279_v48 = vmul.f32 %v4348_v53, %v6165_v45  ;;  %v2344_v57 = vpack.c.bf16 %v2280_v5, %v2280_v5  ;;  %v4350_v10 = vpop.eup %4349  ;;  %v6377_v53 = vpop.f32.mrf.mxu0 }
 0x6f6   :  { %v2368_v41 = vpack.c.bf16 %v2304_v18, %v2304_v18  ;;  %v1935_v19 = vmul.f32 1.442695, %v1840_v61  ;;  %v2306_v44 = vmul.f32 %v4350_v10, %v6179_v32 }
 0x6f7   :  { %v1983_v38 = vmul.f32 1.442695, %v1864_v39  ;;  %v2343_v17 = vpack.c.bf16 %v2279_v48, %v2279_v48  ;;  %v2456_v4 = vunpack.c.l.b16 %v2344_v57 }
 0x6f8   :  { %v2697_v1 = vunpack.c.l.b16 %v2368_v41  ;;  %4351 = vpow2.f32 %v1935_v19  ;;  %v2595_v63 = vpop.f32.mrf.mxu1  ;;  %1801 = vmax.xlane.f32.xlu2 %v1800_v28 }
 0x6f9   :  { %4353 = vpow2.f32 %v1983_v38  ;;  %v2909_v40 = vmul.f32 %v2595_v63, %v7409_v46  ;;  %v1790_v54 = vpop.xlane.xlu2 %1789  ;;  %v2455_v61 = vunpack.c.l.b16 %v2343_v17  ;;  %v6386_v63 = vpop.f32.mrf.mxu2 }
 0x6fa   :  { %v2721_v12 = vpack.c.b16 %v2697_v1, %v2696_v62  ;;  %v1866_v43 = vsub.f32 %v6208_v33, %v1790_v54  ;;  %v2903_v1 = vmul.f32 %v6284_v14, %v5441_v20 }
 0x6fb   :  { %v2978_v30 = vsel %vm50_vm0, %v2909_v40, 0.0  ;;  %v2147_v50 = vpop.xlane.xlu1 %2146  ;;  %v2476_v5 = vpack.c.b16 %v2456_v4, %v2455_v61 }
 0x6fc   :  { %v1709_v56 = vpop.xlane.xlu0 %1708  ;;  %v6361_v45 = vadd.f32 %v2978_v30, %v2977_v21  ;;  %4355 = vrcp.f32 %v2147_v50  ;;  %4054 = vmatmul.msk.bf16.gmra.mxu2 %vm1616_vm5, %v2721_v12  ;;  %v1987_v41 = vmul.f32 1.442695, %v1866_v43  ;;  %v1803_v21 = vsel %vm1616_vm5, %v6377_v53, -inf }
 0x6fd   :  { %v1839_v52 = vsub.f32 %v6174_v29, %v1709_v56  ;;  %4357 = vrcp.f32 %v2075_v7  ;;  %v2370_v7 = vpack.c.bf16 %v2306_v44, %v2306_v44  ;;  %v2991_v56 = vsel %vm50_vm0, %v2903_v1, 0.0  ;;  %v6397_v44 = vpop.f32.mrf.mxu0 }
 0x6fe   :  { %v6365_v3 = vpop.eup %4351  ;;  %v2905_v1 = vmul.f32 %v6308_v55, %v5441_v20 }
 0x6ff   :  { %v1933_v51 = vmul.f32 1.442695, %v1839_v52  ;;  %v6368_v0 = vpop.eup %4353  ;;  %v2094_v18 = vsel %vm1616_vm5, %v6365_v3, 0.0  ;;  %v2699_v40 = vunpack.c.l.b16 %v2370_v7 }
 0x700   :  { %v6373_v39 = vpop.f32.mrf.mxu1  ;;  %2095 = vadd.xlane.f32.xlu0 %v2094_v18  ;;  %v2166_v29 = vsel %vm1616_vm5, %v6368_v0, 0.0 }
 0x701   :  { %4359 = vpow2.f32 %v1933_v51  ;;  %2167 = vadd.xlane.f32.xlu1 %v2166_v29  ;;  %v6410_v7 = vpop.f32.mrf.mxu2 }
 0x702   :  { %v4356_v32 = vpop.eup %4355 }
 0x703   :  { %v2305_v33 = vmul.f32 %v4356_v32, %v6211_v31  ;;  %v1787_v19 = vpop.xlane.xlu1 %1786  ;;  %v4358_v2 = vpop.eup %4357  ;;  %4042 = vmatmul.msk.bf16.gmra.mxu1 %vm1616_vm5, %v2476_v5  ;;  %v1806_v32 = vsel %vm1616_vm5, %v6397_v44, -inf }
 0x704   :  { %v2078_v38 = vpop.xlane.xlu0 %2077  ;;  %v1865_v28 = vsub.f32 %v6191_v27, %v1787_v19  ;;  %v2281_v31 = vmul.f32 %v4358_v2, %v6197_v47 }
 0x705   :  { %4361 = vrcp.f32 %v2078_v38  ;;  %v2369_v62 = vpack.c.bf16 %v2305_v33, %v2305_v33 }
 0x706   :  { %v1985_v57 = vmul.f32 1.442695, %v1865_v28  ;;  %4363 = vpow2.f32 %v1987_v41  ;;  %v2345_v17 = vpack.c.bf16 %v2281_v31, %v2281_v31 }
 0x707   :  { %v6382_v48 = vpop.eup %4359  ;;  %v2698_v12 = vunpack.c.l.b16 %v2369_v62 }
 0x708   :  { %v2091_v27 = vsel %vm1616_vm5, %v6382_v48, 0.0  ;;  %4365 = vpow2.f32 %v1985_v57  ;;  %v2600_v10 = vpop.f32.mrf.mxu1  ;;  %v2457_v61 = vunpack.c.l.b16 %v2345_v17 }
 0x709   :  { %2092 = vadd.xlane.f32.xlu2 %v2091_v27  ;;  %v2911_v30 = vmul.f32 %v2600_v10, %v7409_v46  ;;  %1804 = vmax.xlane.f32.xlu1 %v1803_v21  ;;  %v2722_v14 = vpack.c.b16 %v2699_v40, %v2698_v12  ;;  %v6422_v27 = vpop.f32.mrf.mxu2  ;;  %v3005_v10 = vsel %vm50_vm0, %v2905_v1, 0.0 }
 0x70b   :  { %v4362_v50 = vpop.eup %4361  ;;  %v2992_v54 = vsel %vm50_vm0, %v2911_v30, 0.0  ;;  %v2156_v52 = vpop.xlane.xlu1 %2155 }
 0x70c   :  { %v2282_v47 = vmul.f32 %v4362_v50, %v6220_v36  ;;  %v6399_v4 = vadd.f32 %v2992_v54, %v2991_v56  ;;  %4055 = vmatmul.msk.bf16.gmra.mxu2 %vm1616_vm5, %v2722_v14  ;;  %v6402_v51 = vpop.eup %4363  ;;  %4367 = vrcp.f32 %v2156_v52 }
 0x70d   :  { %v2172_v41 = vsel %vm1616_vm5, %v6402_v51, 0.0 }
 0x70e   :  { %v2346_v43 = vpack.c.bf16 %v2282_v47, %v2282_v47  ;;  %v6404_v18 = vpop.eup %4365 }
 0x70f   :  { %v2169_v36 = vsel %vm1616_vm5, %v6404_v18, 0.0 }
 0x710   :  { %v2458_v29 = vunpack.c.l.b16 %v2346_v43  ;;  %v6412_v5 = vpop.f32.mrf.mxu1  ;;  %2170 = vadd.xlane.f32.xlu0 %v2169_v36 }
 0x711   :  { %1807 = vmax.xlane.f32.xlu2 %v1806_v32  ;;  %2173 = vadd.xlane.f32.xlu1 %v2172_v41  ;;  %v6435_v52 = vpop.f32.mrf.mxu2 }
 0x712   :  { %v2477_v33 = vpack.c.b16 %v2458_v29, %v2457_v61  ;;  %v4368_v2 = vpop.eup %4367  ;;  %v7410_v61 = vld [vmem:[#allocation4_spill] sm:$0xff] }
 0x713   :  { %v1793_v19 = vpop.xlane.xlu1 %1792  ;;  %v2153_v38 = vpop.xlane.xlu0 %2152  ;;  %v2308_v40 = vmul.f32 %v4368_v2, %v6231_v22 }
 0x714   :  { %v1867_v28 = vsub.f32 %v6238_v49, %v1793_v19  ;;  %4043 = vmatmul.msk.bf16.gmra.mxu1 %vm1616_vm5, %v2477_v33  ;;  %4369 = vrcp.f32 %v2153_v38 }
 0x715   :  { %v2372_v21 = vpack.c.bf16 %v2308_v40, %v2308_v40 }
 0x716   :  { %v1989_v62 = vmul.f32 1.442695, %v1867_v28 }
 0x717   :  { %v2701_v22 = vunpack.c.l.b16 %v2372_v21 }
 0x718   :  { %4371 = vpow2.f32 %v1989_v62  ;;  %v2605_v57 = vpop.f32.mrf.mxu1 }
 0x719   :  { %v2913_v31 = vmul.f32 %v2605_v57, %v7409_v46  ;;  %v6443_v32 = vpop.f32.mrf.mxu2 }
 0x71a   :  { %v4370_v12 = vpop.eup %4369 }
 0x71b   :  { %v2307_v49 = vmul.f32 %v4370_v12, %v6240_v26  ;;  %v3006_v30 = vsel %vm50_vm0, %v2913_v31, 0.0  ;;  %v4115_v26 = vld [vmem:[%s7190_s2] sm:$0xff] }
 0x71c   :  { %v6427_v14 = vadd.f32 %v3006_v30, %v3005_v10  ;;  %3131 = vmatpush.bf16.msra.mxu3 %v4115_v26 }
 0x71d   :  { %v2371_v50 = vpack.c.bf16 %v2307_v49, %v2307_v49  ;;  %v2931_v49 = vmul.f32 %v6359_v60, %v5441_v20 }
 0x71e   :  { %v6429_v55 = vpop.eup %4371 }
 0x71f   :  { %v2700_v56 = vunpack.c.l.b16 %v2371_v50  ;;  %v2175_v17 = vsel %vm1616_vm5, %v6429_v55, 0.0 }
 0x720   :  { %v6433_v47 = vpop.f32.mrf.mxu1  ;;  %2176 = vadd.xlane.f32.xlu2 %v2175_v17  ;;  %v3019_v17 = vsel %vm50_vm0, %v2931_v49, 0.0 }
 0x721   :  { %v2723_v54 = vpack.c.b16 %v2701_v22, %v2700_v56  ;;  %v6448_v19 = vpop.f32.mrf.mxu2 }
 0x723   :  { %4056 = vmatmul.msk.bf16.gmra.mxu2 %vm1616_vm5, %v2723_v54 }
 0x728   :  { %v2610_v43 = vpop.f32.mrf.mxu1 }
 0x729   :  { %v2915_v29 = vmul.f32 %v2610_v43, %v7410_v61  ;;  %v6451_v40 = vpop.f32.mrf.mxu2 }
 0x72b   :  { %v2966_v36 = vsel %vm50_vm0, %v2915_v29, 0.0 }
 0x72c   :  { %v6446_v41 = vadd.f32 %v2966_v36, %v6334_v6 }
 0x731   :  { %v2081_v33 = vpop.xlane.xlu2 %2080 }
 0x732   :  { %4373 = vrcp.f32 %v2081_v33 }
 0x738   :  { %v4374_v62 = vpop.eup %4373 }
 0x739   :  { %v1796_v38 = vpop.xlane.xlu2 %1795  ;;  %v2283_v57 = vmul.f32 %v4374_v62, %v6263_v59 }
 0x73a   :  { %v1868_v2 = vsub.f32 %v6272_v11, %v1796_v38 }
 0x73b   :  { %v2084_v28 = vpop.xlane.xlu0 %2083  ;;  %v2347_v12 = vpack.c.bf16 %v2283_v57, %v2283_v57 }
 0x73c   :  { %v1991_v1 = vmul.f32 1.442695, %v1868_v2  ;;  %4375 = vrcp.f32 %v2084_v28 }
 0x73d   :  { %v2459_v22 = vunpack.c.l.b16 %v2347_v12 }
 0x73e   :  { %4377 = vpow2.f32 %v1991_v1  ;;  %v2933_v1 = vmul.f32 %v6410_v7, %v5441_v20 }
 0x742   :  { %v4376_v31 = vpop.eup %4375 }
 0x743   :  { %v2284_v6 = vmul.f32 %v4376_v31, %v6278_v34  ;;  %v2159_v10 = vpop.xlane.xlu0 %2158 }
 0x744   :  { %v6455_v21 = vpop.eup %4377  ;;  %4379 = vrcp.f32 %v2159_v10 }
 0x745   :  { %v2348_v11 = vpack.c.bf16 %v2284_v6, %v2284_v6  ;;  %v2178_v30 = vsel %vm1616_vm5, %v6455_v21, 0.0 }
 0x746   :  { %2179 = vadd.xlane.f32.xlu0 %v2178_v30  ;;  %v2839_v50 = vpop.f32.mrf.mxu2 }
 0x747   :  { %v2460_v56 = vunpack.c.l.b16 %v2348_v11  ;;  %v2939_v59 = vmul.f32 %v2839_v50, %v7409_v46  ;;  %v6476_v11 = vpop.f32.mrf.mxu1 }
 0x749   :  { %v3020_v34 = vsel %vm50_vm0, %v2939_v59, 0.0  ;;  %v2478_v54 = vpack.c.b16 %v2460_v56, %v2459_v22 }
 0x74a   :  { %v6464_v26 = vadd.f32 %v3020_v34, %v3019_v17  ;;  %v4380_v60 = vpop.eup %4379 }
 0x74b   :  { %v2162_v43 = vpop.xlane.xlu1 %2161  ;;  %4044 = vmatmul.msk.bf16.gmra.mxu1 %vm1616_vm5, %v2478_v54  ;;  %v2309_v36 = vmul.f32 %v4380_v60, %v6290_v37  ;;  %v3033_v37 = vsel %vm50_vm0, %v2933_v1, 0.0 }
 0x74c   :  { %4381 = vrcp.f32 %v2162_v43 }
 0x74d   :  { %v2373_v38 = vpack.c.bf16 %v2309_v36, %v2309_v36 }
 0x74e   :  { %v6467_v29 = vpop.f32.mrf.mxu2 }
 0x74f   :  { %v2702_v6 = vunpack.c.l.b16 %v2373_v38 }
 0x752   :  { %v4382_v33 = vpop.eup %4381 }
 0x753   :  { %v2310_v2 = vmul.f32 %v4382_v33, %v6301_v8  ;;  %v1799_v28 = vpop.xlane.xlu1 %1798 }
 0x754   :  { %v1869_v62 = vsub.f32 %v6312_v23, %v1799_v28  ;;  %v2090_v23 = vpop.xlane.xlu0 %2089 }
 0x755   :  { %v2374_v57 = vpack.c.bf16 %v2310_v2, %v2310_v2 }
 0x756   :  { %v1993_v31 = vmul.f32 1.442695, %v1869_v62  ;;  %v2844_v12 = vpop.f32.mrf.mxu2 }
 0x757   :  { %v2703_v10 = vunpack.c.l.b16 %v2374_v57  ;;  %v2941_v49 = vmul.f32 %v2844_v12, %v7409_v46  ;;  %v2935_v12 = vmul.f32 %v6435_v52, %v5441_v20 }
 0x758   :  { %4383 = vpow2.f32 %v1993_v31 }
 0x759   :  { %v3034_v8 = vsel %vm50_vm0, %v2941_v49, 0.0  ;;  %v2724_v30 = vpack.c.b16 %v2703_v10, %v2702_v6  ;;  %4385 = vrcp.f32 %v2090_v23 }
 0x75a   :  { %v6479_v50 = vadd.f32 %v3034_v8, %v3033_v37 }
 0x75b   :  { %4057 = vmatmul.msk.bf16.gmra.mxu2 %vm1616_vm5, %v2724_v30  ;;  %v3047_v30 = vsel %vm50_vm0, %v2935_v12, 0.0 }
 0x75c   :  { %v2165_v28 = vpop.xlane.xlu0 %2164 }
 0x75e   :  { %v6482_v7 = vpop.eup %4383  ;;  %v6492_v36 = vpop.f32.mrf.mxu2 }
 0x75f   :  { %v2181_v22 = vsel %vm1616_vm5, %v6482_v7, 0.0  ;;  %v4386_v34 = vpop.eup %4385 }
 0x760   :  { %2182 = vadd.xlane.f32.xlu1 %v2181_v22  ;;  %v2615_v56 = vpop.f32.mrf.mxu1  ;;  %v2286_v60 = vmul.f32 %v4386_v34, %v6299_v16 }
 0x761   :  { %v2917_v59 = vmul.f32 %v2615_v56, %v7410_v61 }
 0x762   :  { %v2350_v2 = vpack.c.bf16 %v2286_v60, %v2286_v60 }
 0x763   :  { %v2087_v17 = vpop.xlane.xlu2 %2086  ;;  %v2980_v54 = vsel %vm50_vm0, %v2917_v59, 0.0 }
 0x764   :  { %4387 = vrcp.f32 %v2087_v17  ;;  %v6489_v43 = vadd.f32 %v2980_v54, %v6361_v45  ;;  %v2462_v6 = vunpack.c.l.b16 %v2350_v2 }
 0x765   :  { %4389 = vrcp.f32 %v2165_v28 }
 0x768   :  { %v6494_v33 = vpop.f32.mrf.mxu1 }
 0x76a   :  { %v4388_v38 = vpop.eup %4387 }
 0x76b   :  { %v2285_v62 = vmul.f32 %v4388_v38, %v6337_v35  ;;  %v1802_v1 = vpop.xlane.xlu2 %1801  ;;  %v4390_v59 = vpop.eup %4389 }
 0x76c   :  { %v1870_v57 = vsub.f32 %v6344_v24, %v1802_v1  ;;  %v2311_v38 = vmul.f32 %v4390_v59, %v6310_v42 }
 0x76d   :  { %v2349_v31 = vpack.c.bf16 %v2285_v62, %v2285_v62 }
 0x76e   :  { %v1995_v45 = vmul.f32 1.442695, %v1870_v57  ;;  %v2375_v57 = vpack.c.bf16 %v2311_v38, %v2311_v38 }
 0x76f   :  { %v2461_v16 = vunpack.c.l.b16 %v2349_v31  ;;  %v2849_v10 = vpop.f32.mrf.mxu2 }
 0x770   :  { %4391 = vpow2.f32 %v1995_v45  ;;  %v2943_v49 = vmul.f32 %v2849_v10, %v7409_v46  ;;  %v2620_v37 = vpop.f32.mrf.mxu1  ;;  %v2937_v45 = vmul.f32 %v6448_v19, %v5441_v20 }
 0x771   :  { %v2479_v8 = vpack.c.b16 %v2462_v6, %v2461_v16  ;;  %v2919_v24 = vmul.f32 %v2620_v37, %v7410_v61 }
 0x772   :  { %v3048_v35 = vsel %vm50_vm0, %v2943_v49, 0.0  ;;  %v2704_v49 = vunpack.c.l.b16 %v2375_v57 }
 0x773   :  { %v6504_v23 = vadd.f32 %v3048_v35, %v3047_v30  ;;  %4045 = vmatmul.msk.bf16.gmra.mxu1 %vm1616_vm5, %v2479_v8  ;;  %v2096_v52 = vpop.xlane.xlu0 %2095  ;;  %v2994_v22 = vsel %vm50_vm0, %v2919_v24, 0.0 }
 0x774   :  { %v2168_v56 = vpop.xlane.xlu1 %2167  ;;  %v6509_v17 = vadd.f32 %v2994_v22, %v6399_v4 }
 0x775   :  { %4393 = vrcp.f32 %v2168_v56 }
 0x776   :  { %v6511_v34 = vpop.eup %4391  ;;  %4395 = vrcp.f32 %v2096_v52 }
 0x777   :  { %v6513_v54 = vpop.f32.mrf.mxu2  ;;  %v2184_v60 = vsel %vm1616_vm5, %v6511_v34, 0.0 }
 0x778   :  { %2185 = vadd.xlane.f32.xlu2 %v2184_v60  ;;  %v6518_v2 = vpop.f32.mrf.mxu1 }
 0x77b   :  { %v4394_v28 = vpop.eup %4393 }
 0x77c   :  { %v2093_v62 = vpop.xlane.xlu2 %2092  ;;  %v4396_v1 = vpop.eup %4395  ;;  %v2312_v4 = vmul.f32 %v4394_v28, %v6368_v0  ;;  %v3061_v0 = vsel %vm50_vm0, %v2937_v45, 0.0 }
 0x77d   :  { %v1805_v31 = vpop.xlane.xlu1 %1804  ;;  %4397 = vrcp.f32 %v2093_v62  ;;  %v2288_v16 = vmul.f32 %v4396_v1, %v6365_v3 }
 0x77e   :  { %v1871_v12 = vsub.f32 %v6377_v53, %v1805_v31  ;;  %v2376_v6 = vpack.c.bf16 %v2312_v4, %v2312_v4 }
 0x77f   :  { %v2854_v10 = vpop.f32.mrf.mxu2  ;;  %v2352_v19 = vpack.c.bf16 %v2288_v16, %v2288_v16 }
 0x780   :  { %v1997_v42 = vmul.f32 1.442695, %v1871_v12  ;;  %v2705_v37 = vunpack.c.l.b16 %v2376_v6  ;;  %v2945_v8 = vmul.f32 %v2854_v10, %v7409_v46  ;;  %v2625_v30 = vpop.f32.mrf.mxu1 }
 0x781   :  { %v2921_v53 = vmul.f32 %v2625_v30, %v7410_v61 }
 0x782   :  { %4399 = vpow2.f32 %v1997_v42  ;;  %v3062_v24 = vsel %vm50_vm0, %v2945_v8, 0.0  ;;  %v2725_v52 = vpack.c.b16 %v2705_v37, %v2704_v49 }
 0x783   :  { %v4398_v35 = vpop.eup %4397  ;;  %v6530_v3 = vadd.f32 %v3062_v24, %v3061_v0  ;;  %v2171_v59 = vpop.xlane.xlu0 %2170  ;;  %v3008_v60 = vsel %vm50_vm0, %v2921_v53, 0.0 }
 0x784   :  { %v2287_v22 = vmul.f32 %v4398_v35, %v6382_v48  ;;  %v1808_v56 = vpop.xlane.xlu2 %1807  ;;  %4058 = vmatmul.msk.bf16.gmra.mxu2 %vm1616_vm5, %v2725_v52  ;;  %4401 = vrcp.f32 %v2171_v59  ;;  %v6536_v1 = vadd.f32 %v3008_v60, %v6427_v14  ;;  %v2464_v48 = vunpack.c.l.b16 %v2352_v19 }
 0x785   :  { %v2174_v38 = vpop.xlane.xlu1 %2173  ;;  %v1872_v28 = vsub.f32 %v6397_v44, %v1808_v56  ;;  %v2900_v56 = vmul.f32 %v6256_v13, %v5441_v20  ;;  %v2916_v59 = vmul.f32 %v6476_v11, %v7410_v61 }
 0x786   :  { %v2351_v62 = vpack.c.bf16 %v2287_v22, %v2287_v22  ;;  %4403 = vrcp.f32 %v2174_v38  ;;  %v7411_v38 = vld [vmem:[#allocation5_spill] sm:$0xff] }
 0x787   :  { %v1999_v57 = vmul.f32 1.442695, %v1872_v28  ;;  %v6540_v12 = vpop.f32.mrf.mxu2 }
 0x788   :  { %v6538_v4 = vpop.eup %4399  ;;  %v2463_v31 = vunpack.c.l.b16 %v2351_v62  ;;  %v6544_v44 = vpop.f32.mrf.mxu1  ;;  %v2973_v62 = vsel %vm50_vm0, %v2916_v59, 0.0 }
 0x789   :  { %4405 = vpow2.f32 %v1999_v57  ;;  %v2187_v45 = vsel %vm1616_vm5, %v6538_v4, 0.0 }
 0x78a   :  { %2188 = vadd.xlane.f32.xlu0 %v2187_v45  ;;  %v2480_v6 = vpack.c.b16 %v2464_v48, %v2463_v31  ;;  %v4402_v16 = vpop.eup %4401 }
 0x78b   :  { %v2313_v14 = vmul.f32 %v4402_v16, %v6404_v18  ;;  %v2908_v18 = vmul.f32 %v6342_v15, %v7409_v46  ;;  %v2970_v15 = vsel %vm50_vm0, %v2900_v56, 0.0 }
 0x78c   :  { %v4404_v42 = vpop.eup %4403  ;;  %4046 = vmatmul.msk.bf16.gmra.mxu1 %vm1616_vm5, %v2480_v6 }
 0x78d   :  { %v2314_v10 = vmul.f32 %v4404_v42, %v6402_v51  ;;  %v2377_v49 = vpack.c.bf16 %v2313_v14, %v2313_v14  ;;  %v2971_v60 = vsel %vm50_vm0, %v2908_v18, 0.0 }
 0x78e   :  { %v2972_v57 = vadd.f32 %v2971_v60, %v2970_v15 }
 0x78f   :  { %v6549_v37 = vpop.eup %4405  ;;  %v2378_v8 = vpack.c.bf16 %v2314_v10, %v2314_v10  ;;  %v2706_v30 = vunpack.c.l.b16 %v2377_v49  ;;  %v2859_v35 = vpop.f32.mrf.mxu2  ;;  %v2942_v49 = vmul.f32 %v6492_v36, %v7409_v46 }
 0x790   :  { %v2190_v0 = vsel %vm1616_vm5, %v6549_v37, 0.0  ;;  %v2947_v53 = vmul.f32 %v2859_v35, %v7410_v61  ;;  %v2974_v13 = vadd.f32 %v2973_v62, %v2972_v57 }
 0x791   :  { %v2707_v24 = vunpack.c.l.b16 %v2378_v8  ;;  %2191 = vadd.xlane.f32.xlu1 %v2190_v0  ;;  %v2630_v52 = vpop.f32.mrf.mxu1  ;;  %v3041_v35 = vsel %vm50_vm0, %v2942_v49, 0.0 }
 0x792   :  { %v3022_v19 = vsel %vm50_vm0, %v2947_v53, 0.0  ;;  %v2923_v28 = vmul.f32 %v2630_v52, %v7411_v38 }
 0x793   :  { %v2726_v51 = vpack.c.b16 %v2707_v24, %v2706_v30  ;;  %v6558_v22 = vadd.f32 %v3022_v19, %v6464_v26  ;;  %v2177_v18 = vpop.xlane.xlu2 %2176 }
 0x794   :  { %v2968_v26 = vsel %vm50_vm0, %v2923_v28, 0.0  ;;  %4407 = vrcp.f32 %v2177_v18 }
 0x795   :  { %4059 = vmatmul.msk.bf16.gmra.mxu2 %vm1616_vm5, %v2726_v51  ;;  %v2969_v11 = vadd.f32 %v2968_v26, %v6446_v41  ;;  %v2934_v41 = vmul.f32 %v6422_v27, %v5441_v20  ;;  %v2910_v26 = vmul.f32 %v6373_v39, %v7409_v46 }
 0x797   :  { %v6573_v16 = vpop.f32.mrf.mxu2  ;;  %v3040_v24 = vsel %vm50_vm0, %v2934_v41, 0.0 }
 0x798   :  { %v3042_v52 = vadd.f32 %v3041_v35, %v3040_v24 }
 0x799   :  { %v2632_v48 = vpop.f32.mrf.mxu1 }
 0x79a   :  { %v2924_v31 = vmul.f32 %v2632_v48, %v7411_v38 }
 0x79c   :  { %v2975_v45 = vsel %vm50_vm0, %v2924_v31, 0.0  ;;  %v2902_v31 = vmul.f32 %v6268_v9, %v5441_v20 }
 0x79d   :  { %v2976_v6 = vadd.f32 %v2975_v45, %v2974_v13  ;;  %v2985_v13 = vsel %vm50_vm0, %v2910_v26, 0.0 }
 0x79e   :  { %v2984_v45 = vsel %vm50_vm0, %v2902_v31, 0.0 }
 0x79f   :  { %v3075_v42 = vpack.c.bf16 %v2976_v6, %v2969_v11  ;;  %v2986_v6 = vadd.f32 %v2985_v13, %v2984_v45 }
 0x7a1   :  { %4071 = vmatmul.msk.bf16.vlgmr.msra.gmra.mxu3 %vm50_vm0, %v3075_v42 }
 0x7a6   :  { %v2864_v14 = vpop.f32.mrf.mxu2 }
 0x7a7   :  { %v2949_v10 = vmul.f32 %v2864_v14, %v7410_v61 }
 0x7a9   :  { %v3036_v8 = vsel %vm50_vm0, %v2949_v10, 0.0 }
 0x7aa   :  { %v6581_v30 = vadd.f32 %v3036_v8, %v6479_v50  ;;  %v4408_v50 = vpop.eup %4407 }
 0x7ab   :  { %v2315_v56 = vmul.f32 %v4408_v50, %v6429_v55  ;;  %v2918_v55 = vmul.f32 %v6494_v33, %v7410_v61 }
 0x7ad   :  { %v2379_v59 = vpack.c.bf16 %v2315_v56, %v2315_v56  ;;  %v2987_v11 = vsel %vm50_vm0, %v2918_v55, 0.0 }
 0x7ae   :  { %v2866_v0 = vpop.f32.mrf.mxu2  ;;  %v2988_v10 = vadd.f32 %v2987_v11, %v2986_v6 }
 0x7af   :  { %v2950_v53 = vmul.f32 %v2866_v0, %v7410_v61  ;;  %v2708_v15 = vunpack.c.l.b16 %v2379_v59  ;;  %v2944_v0 = vmul.f32 %v6513_v54, %v7409_v46 }
 0x7b1   :  { %v3043_v19 = vsel %vm50_vm0, %v2950_v53, 0.0 }
 0x7b2   :  { %v6589_v36 = vadd.f32 %v3043_v19, %v3042_v52  ;;  %v2936_v52 = vmul.f32 %v6443_v32, %v5441_v20 }
 0x7b9   :  { %v2180_v51 = vpop.xlane.xlu0 %2179 }
 0x7ba   :  { %4409 = vrcp.f32 %v2180_v51  ;;  %v3054_v51 = vsel %vm50_vm0, %v2936_v52, 0.0  ;;  %v2914_v52 = vmul.f32 %v6433_v47, %v7409_v46  ;;  %v2938_v47 = vmul.f32 %v6451_v40, %v5441_v20 }
 0x7c0   :  { %v4410_v27 = vpop.eup %4409 }
 0x7c1   :  { %v2316_v60 = vmul.f32 %v4410_v27, %v6455_v21 }
 0x7c3   :  { %v2380_v28 = vpack.c.bf16 %v2316_v60, %v2316_v60 }
 0x7c5   :  { %v2709_v62 = vunpack.c.l.b16 %v2380_v28  ;;  %v2912_v28 = vmul.f32 %v6412_v5, %v7409_v46 }
 0x7c7   :  { %v2727_v57 = vpack.c.b16 %v2709_v62, %v2708_v15  ;;  %v2904_v62 = vmul.f32 %v6295_v58, %v5441_v20  ;;  %v2999_v31 = vsel %vm50_vm0, %v2912_v28, 0.0 }
 0x7c8   :  { %v2635_v48 = vpop.f32.mrf.mxu1 }
 0x7c9   :  { %4060 = vmatmul.msk.bf16.gmra.mxu2 %vm1616_vm5, %v2727_v57  ;;  %v2925_v21 = vmul.f32 %v2635_v48, %v7411_v38  ;;  %v2920_v57 = vmul.f32 %v6518_v2, %v7410_v61 }
 0x7cb   :  { %v2982_v39 = vsel %vm50_vm0, %v2925_v21, 0.0  ;;  %v3001_v21 = vsel %vm50_vm0, %v2920_v57, 0.0 }
 0x7cc   :  { %v2983_v49 = vadd.f32 %v2982_v39, %v6489_v43  ;;  %v3055_v43 = vsel %vm50_vm0, %v2944_v0, 0.0 }
 0x7cd   :  { %v3056_v56 = vadd.f32 %v3055_v43, %v3054_v51  ;;  %v2946_v43 = vmul.f32 %v6540_v12, %v7409_v46  ;;  %v2922_v51 = vmul.f32 %v6544_v44, %v7410_v61 }
 0x7cf   :  { %v3069_v12 = vsel %vm50_vm0, %v2946_v43, 0.0  ;;  %v3015_v44 = vsel %vm50_vm0, %v2922_v51, 0.0 }
 0x7d0   :  { %v2637_v42 = vpop.f32.mrf.mxu1 }
 0x7d1   :  { %v2926_v14 = vmul.f32 %v2637_v42, %v7411_v38 }
 0x7d3   :  { %v2989_v9 = vsel %vm50_vm0, %v2926_v14, 0.0  ;;  %v2183_v18 = vpop.xlane.xlu1 %2182 }
 0x7d4   :  { %v2990_v33 = vadd.f32 %v2989_v9, %v2988_v10  ;;  %4411 = vrcp.f32 %v2183_v18 }
 0x7d6   :  { %v3076_v8 = vpack.c.bf16 %v2990_v33, %v2983_v49 }
 0x7d8   :  { %4072 = vmatmul.msk.bf16.gmra.mxu3 %vm50_vm0, %v3076_v8 }
 0x7de   :  { %v2869_v41 = vpop.f32.mrf.mxu2 }
 0x7df   :  { %v2951_v35 = vmul.f32 %v2869_v41, %v7410_v61 }
 0x7e1   :  { %v3050_v24 = vsel %vm50_vm0, %v2951_v35, 0.0 }
 0x7e2   :  { %v6614_v53 = vadd.f32 %v3050_v24, %v6504_v23  ;;  %v4412_v23 = vpop.eup %4411 }
 0x7e3   :  { %v2317_v60 = vmul.f32 %v4412_v23, %v6482_v7  ;;  %v2998_v7 = vsel %vm50_vm0, %v2904_v62, 0.0 }
 0x7e4   :  { %v3000_v11 = vadd.f32 %v2999_v31, %v2998_v7 }
 0x7e5   :  { %v2381_v48 = vpack.c.bf16 %v2317_v60, %v2317_v60 }
 0x7e6   :  { %v2871_v19 = vpop.f32.mrf.mxu2  ;;  %v3002_v39 = vadd.f32 %v3001_v21, %v3000_v11 }
 0x7e7   :  { %v2952_v50 = vmul.f32 %v2871_v19, %v7410_v61  ;;  %v2710_v5 = vunpack.c.l.b16 %v2381_v48 }
 0x7e9   :  { %v3057_v54 = vsel %vm50_vm0, %v2952_v50, 0.0 }
 0x7ea   :  { %v6622_v27 = vadd.f32 %v3057_v54, %v3056_v56  ;;  %v3013_v54 = vsel %vm50_vm0, %v2914_v52, 0.0 }
 0x7eb   :  { %v2186_v59 = vpop.xlane.xlu2 %2185 }
 0x7ec   :  { %4413 = vrcp.f32 %v2186_v59 }
 0x7f0   :  { %v2640_v32 = vpop.f32.mrf.mxu1 }
 0x7f1   :  { %v2927_v13 = vmul.f32 %v2640_v32, %v7411_v38 }
 0x7f2   :  { %v4414_v15 = vpop.eup %4413 }
 0x7f3   :  { %v2318_v26 = vmul.f32 %v4414_v15, %v6511_v34  ;;  %v2996_v58 = vsel %vm50_vm0, %v2927_v13, 0.0 }
 0x7f4   :  { %v2997_v14 = vadd.f32 %v2996_v58, %v6509_v17  ;;  %v2906_v17 = vmul.f32 %v6320_v25, %v5441_v20  ;;  %v2932_v58 = vmul.f32 %v6386_v63, %v5441_v20  ;;  %v6690_v20 = vld [vmem:[%s7186_s8] sm:$0xff] }
 0x7f5   :  { %v2382_v55 = vpack.c.bf16 %v2318_v26, %v2318_v26  ;;  %v6693_v63 = vperm.slane %v6690_v20, 3 }
 0x7f6   :  { %v3012_v23 = vsel %vm50_vm0, %v2906_v17, 0.0 }
 0x7f7   :  { %v2711_v45 = vunpack.c.l.b16 %v2382_v55  ;;  %v3014_v28 = vadd.f32 %v3013_v54, %v3012_v23 }
 0x7f8   :  { %v2642_v6 = vpop.f32.mrf.mxu1 }
 0x7f9   :  { %v2928_v2 = vmul.f32 %v2642_v6, %v7411_v38  ;;  %v2728_v42 = vpack.c.b16 %v2711_v45, %v2710_v5  ;;  %v3016_v31 = vadd.f32 %v3015_v44, %v3014_v28  ;;  %v2940_v6 = vmul.f32 %v6467_v29, %v7409_v46 }
 0x7fb   :  { %v3003_v34 = vsel %vm50_vm0, %v2928_v2, 0.0  ;;  %4061 = vmatmul.msk.bf16.gmra.mxu2 %vm1616_vm5, %v2728_v42  ;;  %v2948_v2 = vmul.f32 %v6573_v16, %v7410_v61  ;;  %v3027_v42 = vsel %vm50_vm0, %v2940_v6, 0.0 }
 0x7fc   :  { %v3004_v10 = vadd.f32 %v3003_v34, %v3002_v39 }
 0x7fd   :  { %v2189_v9 = vpop.xlane.xlu0 %2188  ;;  %v3029_v34 = vsel %vm50_vm0, %v2948_v2, 0.0 }
 0x7fe   :  { %v3077_v49 = vpack.c.bf16 %v3004_v10, %v2997_v14  ;;  %4415 = vrcp.f32 %v2189_v9 }
 0x800   :  { %4073 = vmatmul.msk.bf16.gmra.mxu3 %vm50_vm0, %v3077_v49 }
 0x804   :  { %v2192_v33 = vpop.xlane.xlu1 %2191  ;;  %v4416_v8 = vpop.eup %4415 }
 0x805   :  { %4417 = vrcp.f32 %v2192_v33  ;;  %v2319_v41 = vmul.f32 %v4416_v8, %v6538_v4 }
 0x807   :  { %v2874_v35 = vpop.f32.mrf.mxu2  ;;  %v2383_v4 = vpack.c.bf16 %v2319_v41, %v2319_v41 }
 0x808   :  { %v2953_v0 = vmul.f32 %v2874_v35, %v7410_v61  ;;  %v4484_v35 = vld [vmem:[%s7184_s0] sm:$0xff] }
 0x809   :  { %v2645_v24 = vpop.f32.mrf.mxu1  ;;  %v2712_v60 = vunpack.c.l.b16 %v2383_v4 }
 0x80a   :  { %v3064_v19 = vsel %vm50_vm0, %v2953_v0, 0.0  ;;  %v2929_v59 = vmul.f32 %v2645_v24, %v7411_v38 }
 0x80b   :  { %v4418_v18 = vpop.eup %4417  ;;  %v6655_v56 = vadd.f32 %v3064_v19, %v6530_v3  ;;  %v3068_v3 = vsel %vm50_vm0, %v2938_v47, 0.0 }
 0x80c   :  { %v2320_v50 = vmul.f32 %v4418_v18, %v6549_v37  ;;  %v3070_v62 = vadd.f32 %v3069_v12, %v3068_v3  ;;  %v3010_v57 = vsel %vm50_vm0, %v2929_v59, 0.0  ;;  %v4485_v18 = vld [vmem:[%s7184_s0 + $0x8] sm:$0xff] }
 0x80d   :  { %v3011_v21 = vadd.f32 %v3010_v57, %v6536_v1  ;;  %v3026_v1 = vsel %vm50_vm0, %v2932_v58, 0.0 }
 0x80e   :  { %v2384_v25 = vpack.c.bf16 %v2320_v50, %v2320_v50  ;;  %v3028_v14 = vadd.f32 %v3027_v42, %v3026_v1 }
 0x80f   :  { %v2876_v37 = vpop.f32.mrf.mxu2 }
 0x810   :  { %v2713_v32 = vunpack.c.l.b16 %v2384_v25  ;;  %v2954_v15 = vmul.f32 %v2876_v37, %v7410_v61  ;;  %v3030_v9 = vadd.f32 %v3029_v34, %v3028_v14 }
 0x811   :  { %v2647_v40 = vpop.f32.mrf.mxu1 }
 0x812   :  { %v2930_v48 = vmul.f32 %v2647_v40, %v7411_v38  ;;  %v2729_v26 = vpack.c.b16 %v2713_v32, %v2712_v60  ;;  %v3071_v55 = vsel %vm50_vm0, %v2954_v15, 0.0  ;;  %v4486_v60 = vld [vmem:[%s7184_s0 + $0x10] sm:$0xff] }
 0x813   :  { %v6669_v13 = vadd.f32 %v3071_v55, %v3070_v62 }
 0x814   :  { %v3017_v7 = vsel %vm50_vm0, %v2930_v48, 0.0  ;;  %4062 = vmatmul.msk.bf16.gmra.mxu2 %vm1616_vm5, %v2729_v26  ;;  %v4488_v26 = vld [vmem:[%s7184_s0 + $0x20] sm:$0xff] }
 0x815   :  { %v3018_v5 = vadd.f32 %v3017_v7, %v3016_v31 }
 0x817   :  { %v3078_v45 = vpack.c.bf16 %v3018_v5, %v3011_v21 }
 0x818   :  { %v2879_v11 = vpop.f32.mrf.mxu2 }
 0x819   :  { %4074 = vmatmul.msk.bf16.gmra.mxu3 %vm50_vm0, %v3078_v45  ;;  %v2955_v39 = vmul.f32 %v2879_v11, %v7411_v38 }
 0x81b   :  { %v3024_v46 = vsel %vm50_vm0, %v2955_v39, 0.0  ;;  %v4489_v39 = vld [vmem:[%s7184_s0 + $0x28] sm:$0xff] }
 0x81c   :  { %v3025_v16 = vadd.f32 %v3024_v46, %v6558_v22 }
 0x820   :  { %v2881_v10 = vpop.f32.mrf.mxu2 }
 0x821   :  { %v2956_v29 = vmul.f32 %v2881_v10, %v7411_v38 }
 0x823   :  { %v3031_v61 = vsel %vm50_vm0, %v2956_v29, 0.0  ;;  %v4490_v29 = vld [vmem:[%s7184_s0 + $0x30] sm:$0xff] }
 0x824   :  { %v3032_v49 = vadd.f32 %v3031_v61, %v3030_v9  ;;  %v3133_v33 = vpop.f32.mrf.mxu3  ;;  %v7412_v61 = vld [vmem:[#allocation2_spill] sm:$0xff] }
 0x825   :  { %v3134_v41 = vadd.f32 %v3133_v33, %v6693_v63 }
 0x826   :  { %v3079_v8 = vpack.c.bf16 %v3032_v49, %v3025_v16 }
 0x827   :  { %v6701_v0 = vadd.f32 %v4484_v35, %v3134_v41 }
 0x829   :  { %4075 = vmatmul.msk.bf16.gmra.mxu3 %vm50_vm0, %v3079_v8  ;;  %v3189_v24 = vsel %vm50_vm0, %v6701_v0, 0.0 }
 0x82a   :  { %3190 = vadd.xlane.f32.xlu2 %v3189_v24 }
 0x82c   :  { %v3135_v52 = vpop.f32.mrf.mxu3 }
 0x82d   :  { %v3136_v22 = vadd.f32 %v3135_v52, %v6693_v63 }
 0x82f   :  { %v6710_v17 = vadd.f32 %v4485_v18, %v3136_v22 }
 0x831   :  { %v3192_v43 = vsel %vm50_vm0, %v6710_v17, 0.0 }
 0x832   :  { %3193 = vadd.xlane.f32.xlu0 %v3192_v43 }
 0x84c   :  { %v2884_v19 = vpop.f32.mrf.mxu2 }
 0x84d   :  { %v2957_v51 = vmul.f32 %v2884_v19, %v7411_v38 }
 0x84f   :  { %v3038_v50 = vsel %vm50_vm0, %v2957_v51, 0.0 }
 0x850   :  { %v3039_v25 = vadd.f32 %v3038_v50, %v6581_v30 }
 0x854   :  { %v2886_v4 = vpop.f32.mrf.mxu2 }
 0x855   :  { %v2958_v47 = vmul.f32 %v2886_v4, %v7411_v38 }
 0x857   :  { %v3045_v54 = vsel %vm50_vm0, %v2958_v47, 0.0 }
 0x858   :  { %v3046_v59 = vadd.f32 %v3045_v54, %v6589_v36  ;;  %v4487_v36 = vld [vmem:[%s7184_s0 + $0x18] sm:$0xff] }
 0x85a   :  { %v3080_v12 = vpack.c.bf16 %v3046_v59, %v3039_v25 }
 0x85b   :  { %v3138_v23 = vpop.f32.mrf.mxu3 }
 0x85c   :  { %v3139_v44 = vadd.f32 %v3138_v23, %v6693_v63  ;;  %4076 = vmatmul.msk.bf16.gmra.mxu3 %vm50_vm0, %v3080_v12 }
 0x85e   :  { %v6725_v32 = vadd.f32 %v4486_v60, %v3139_v44  ;;  %v4492_v44 = vld [vmem:[%s7184_s0 + $0x40] sm:$0xff] }
 0x860   :  { %v3195_v37 = vsel %vm50_vm0, %v6725_v32, 0.0 }
 0x861   :  { %3196 = vadd.xlane.f32.xlu1 %v3195_v37 }
 0x863   :  { %v3140_v28 = vpop.f32.mrf.mxu3 }
 0x864   :  { %v3141_v30 = vadd.f32 %v3140_v28, %v6693_v63  ;;  %v4118_v28 = vld [vmem:[%s7191_s3 + $0x8] sm:$0xff] }
 0x865   :  { %3630 = vmatpush.bf16.msra.mxu0 %v4118_v28 }
 0x866   :  { %v6733_v3 = vadd.f32 %v4487_v36, %v3141_v30 }
 0x868   :  { %v3198_v15 = vsel %vm50_vm0, %v6733_v3, 0.0 }
 0x869   :  { %3199 = vadd.xlane.f32.xlu2 %v3198_v15 }
 0x87e   :  { %v2889_v40 = vpop.f32.mrf.mxu2 }
 0x87f   :  { %v2959_v62 = vmul.f32 %v2889_v40, %v7411_v38 }
 0x881   :  { %v3052_v7 = vsel %vm50_vm0, %v2959_v62, 0.0 }
 0x882   :  { %v3053_v11 = vadd.f32 %v3052_v7, %v6614_v53  ;;  %v4493_v7 = vld [vmem:[%s7184_s0 + $0x48] sm:$0xff] }
 0x883   :  { %v3143_v57 = vpop.f32.mrf.mxu3 }
 0x884   :  { %v3144_v48 = vadd.f32 %v3143_v57, %v6693_v63 }
 0x886   :  { %v6742_v31 = vadd.f32 %v4488_v26, %v3144_v48  ;;  %v2891_v55 = vpop.f32.mrf.mxu2 }
 0x887   :  { %v2960_v21 = vmul.f32 %v2891_v55, %v7411_v38 }
 0x888   :  { %v3201_v5 = vsel %vm50_vm0, %v6742_v31, 0.0 }
 0x889   :  { %v3059_v45 = vsel %vm50_vm0, %v2960_v21, 0.0  ;;  %3202 = vadd.xlane.f32.xlu0 %v3201_v5 }
 0x88a   :  { %v3060_v6 = vadd.f32 %v3059_v45, %v6622_v27 }
 0x88b   :  { %v3145_v58 = vpop.f32.mrf.mxu3 }
 0x88c   :  { %v3081_v2 = vpack.c.bf16 %v3060_v6, %v3053_v11  ;;  %v3146_v42 = vadd.f32 %v3145_v58, %v6693_v63 }
 0x88e   :  { %v6755_v1 = vadd.f32 %v4489_v39, %v3146_v42  ;;  %4077 = vmatmul.msk.bf16.gmra.mxu3 %vm50_vm0, %v3081_v2  ;;  %v4494_v42 = vld [vmem:[%s7184_s0 + $0x50] sm:$0xff] }
 0x890   :  { %v3204_v34 = vsel %vm50_vm0, %v6755_v1, 0.0 }
 0x891   :  { %3205 = vadd.xlane.f32.xlu1 %v3204_v34 }
 0x897   :  { %v2894_v14 = vpop.f32.mrf.mxu2 }
 0x898   :  { %v2961_v53 = vmul.f32 %v2894_v14, %v7411_v38 }
 0x89a   :  { %v3066_v33 = vsel %vm50_vm0, %v2961_v53, 0.0 }
 0x89b   :  { %v3067_v52 = vadd.f32 %v3066_v33, %v6655_v56  ;;  %v4491_v56 = vld [vmem:[%s7184_s0 + $0x38] sm:$0xff] }
 0x89c   :  { %v3148_v27 = vpop.f32.mrf.mxu3 }
 0x89d   :  { %v3149_v10 = vadd.f32 %v3148_v27, %v6693_v63  ;;  %v3191_v46 = vpop.xlane.xlu2 %3190 }
 0x89e   :  { %v3237_v16 = vmul.f32 %v3191_v46, %v7412_v61 }
 0x89f   :  { %v6765_v9 = vadd.f32 %v4490_v29, %v3149_v10  ;;  %v2896_v49 = vpop.f32.mrf.mxu2 }
 0x8a0   :  { %v2962_v8 = vmul.f32 %v2896_v49, %v7411_v38  ;;  %v6771_v41 = vsub.f32 %v6701_v0, %v3237_v16 }
 0x8a1   :  { %v3207_v35 = vsel %vm50_vm0, %v6765_v9, 0.0 }
 0x8a2   :  { %v3073_v24 = vsel %vm50_vm0, %v2962_v8, 0.0  ;;  %3208 = vadd.xlane.f32.xlu1 %v3207_v35  ;;  %v3269_v18 = vmul.f32 %v6771_v41, %v6771_v41  ;;  %v4495_v8 = vld [vmem:[%s7184_s0 + $0x58] sm:$0xff] }
 0x8a3   :  { %v3074_v22 = vadd.f32 %v3073_v24, %v6669_v13 }
 0x8a4   :  { %v3150_v43 = vpop.f32.mrf.mxu3  ;;  %v3285_v51 = vsel %vm50_vm0, %v3269_v18, 0.0 }
 0x8a5   :  { %v3082_v19 = vpack.c.bf16 %v3074_v22, %v3067_v52  ;;  %v3151_v38 = vadd.f32 %v3150_v43, %v6693_v63  ;;  %3286 = vadd.xlane.f32.xlu2 %v3285_v51  ;;  %v3194_v4 = vpop.xlane.xlu0 %3193 }
 0x8a6   :  { %v3238_v50 = vmul.f32 %v3194_v4, %v7412_v61 }
 0x8a7   :  { %4078 = vmatmul.msk.bf16.gmra.mxu3 %vm50_vm0, %v3082_v19  ;;  %v6787_v13 = vadd.f32 %v4491_v56, %v3151_v38  ;;  %v4496_v38 = vld [vmem:[%s7184_s0 + $0x60] sm:$0xff] }
 0x8a8   :  { %v6790_v47 = vsub.f32 %v6710_v17, %v3238_v50 }
 0x8a9   :  { %v3210_v12 = vsel %vm50_vm0, %v6787_v13, 0.0 }
 0x8aa   :  { %v3270_v54 = vmul.f32 %v6790_v47, %v6790_v47 }
 0x8ac   :  { %v3153_v25 = vpop.f32.mrf.mxu3  ;;  %v3288_v23 = vsel %vm50_vm0, %v3270_v54, 0.0 }
 0x8ad   :  { %v3154_v59 = vadd.f32 %v3153_v25, %v6693_v63  ;;  %3211 = vadd.xlane.f32.xlu2 %v3210_v12  ;;  %3289 = vadd.xlane.f32.xlu0 %v3288_v23 }
 0x8af   :  { %v6801_v60 = vadd.f32 %v4492_v44, %v3154_v59 }
 0x8b1   :  { %v3213_v37 = vsel %vm50_vm0, %v6801_v60, 0.0 }
 0x8b4   :  { %v3155_v40 = vpop.f32.mrf.mxu3 }
 0x8b5   :  { %3214 = vadd.xlane.f32.xlu2 %v3213_v37  ;;  %v3156_v57 = vadd.f32 %v3155_v40, %v6693_v63 }
 0x8b7   :  { %v6820_v21 = vadd.f32 %v4493_v7, %v3156_v57 }
 0x8b9   :  { %v3216_v2 = vsel %vm50_vm0, %v6820_v21, 0.0 }
 0x8d4   :  { %v3197_v30 = vpop.xlane.xlu1 %3196 }
 0x8d5   :  { %v3239_v36 = vmul.f32 %v3197_v30, %v7412_v61  ;;  %v4117_v30 = vld [vmem:[%s7191_s3] sm:$0xff] }
 0x8d6   :  { %3631 = vmatpush.bf16.msra.mxu0 %v4117_v30 }
 0x8d7   :  { %v6810_v15 = vsub.f32 %v6725_v32, %v3239_v36  ;;  %v4497_v36 = vld [vmem:[%s7184_s0 + $0x68] sm:$0xff] }
 0x8d9   :  { %v3271_v62 = vmul.f32 %v6810_v15, %v6810_v15 }
 0x8db   :  { %v3291_v48 = vsel %vm50_vm0, %v3271_v62, 0.0 }
 0x8dc   :  { %v3200_v26 = vpop.xlane.xlu2 %3199  ;;  %3292 = vadd.xlane.f32.xlu0 %v3291_v48 }
 0x8dd   :  { %v3240_v55 = vmul.f32 %v3200_v26, %v7412_v61 }
 0x8df   :  { %v6823_v5 = vsub.f32 %v6733_v3, %v3240_v55  ;;  %v3158_v45 = vpop.f32.mrf.mxu3 }
 0x8e0   :  { %v3159_v6 = vadd.f32 %v3158_v45, %v6693_v63 }
 0x8e1   :  { %v3272_v11 = vmul.f32 %v6823_v5, %v6823_v5 }
 0x8e2   :  { %v6834_v39 = vadd.f32 %v4494_v42, %v3159_v6 }
 0x8e3   :  { %v3294_v58 = vsel %vm50_vm0, %v3272_v11, 0.0 }
 0x8e4   :  { %3295 = vadd.xlane.f32.xlu1 %v3294_v58  ;;  %3217 = vadd.xlane.f32.xlu0 %v3216_v2  ;;  %v3219_v34 = vsel %vm50_vm0, %v6834_v39, 0.0 }
 0x8e7   :  { %v3160_v10 = vpop.f32.mrf.mxu3 }
 0x8e8   :  { %v3161_v29 = vadd.f32 %v3160_v10, %v6693_v63 }
 0x8ea   :  { %v6850_v35 = vadd.f32 %v4495_v8, %v3161_v29 }
 0x8ec   :  { %3220 = vadd.xlane.f32.xlu0 %v3219_v34  ;;  %v3222_v18 = vsel %vm50_vm0, %v6850_v35, 0.0 }
 0x8fc   :  { %v3203_v14 = vpop.xlane.xlu0 %3202 }
 0x8fd   :  { %v3241_v53 = vmul.f32 %v3203_v14, %v7412_v61 }
 0x8ff   :  { %v6840_v27 = vsub.f32 %v6742_v31, %v3241_v53 }
 0x901   :  { %v3273_v46 = vmul.f32 %v6840_v27, %v6840_v27 }
 0x903   :  { %v3297_v16 = vsel %vm50_vm0, %v3273_v46, 0.0 }
 0x904   :  { %v3206_v49 = vpop.xlane.xlu1 %3205  ;;  %3298 = vadd.xlane.f32.xlu1 %v3297_v16 }
 0x905   :  { %v3242_v33 = vmul.f32 %v3206_v49, %v7412_v61 }
 0x907   :  { %v6853_v24 = vsub.f32 %v6755_v1, %v3242_v33 }
 0x909   :  { %v3274_v52 = vmul.f32 %v6853_v24, %v6853_v24 }
 0x90b   :  { %v3300_v22 = vsel %vm50_vm0, %v3274_v52, 0.0  ;;  %v4498_v52 = vld [vmem:[%s7184_s0 + $0x70] sm:$0xff] }
 0x90c   :  { %3301 = vadd.xlane.f32.xlu2 %v3300_v22  ;;  %3223 = vadd.xlane.f32.xlu1 %v3222_v18 }
 0x911   :  { %v3163_v43 = vpop.f32.mrf.mxu3 }
 0x912   :  { %v3164_v19 = vadd.f32 %v3163_v43, %v6693_v63 }
 0x914   :  { %v6864_v51 = vadd.f32 %v4496_v38, %v3164_v19 }
 0x915   :  { %v3209_v4 = vpop.xlane.xlu1 %3208 }
 0x916   :  { %v3243_v50 = vmul.f32 %v3209_v4, %v7412_v61  ;;  %v3225_v56 = vsel %vm50_vm0, %v6864_v51, 0.0 }
 0x917   :  { %3226 = vadd.xlane.f32.xlu1 %v3225_v56 }
 0x918   :  { %v6870_v54 = vsub.f32 %v6765_v9, %v3243_v50  ;;  %v3287_v25 = vpop.xlane.xlu2 %3286 }
 0x919   :  { %v3333_v59 = vmul.f32 %v3287_v25, %v7412_v61  ;;  %v3165_v12 = vpop.f32.mrf.mxu3 }
 0x91a   :  { %v3275_v23 = vmul.f32 %v6870_v54, %v6870_v54  ;;  %v3166_v37 = vadd.f32 %v3165_v12, %v6693_v63  ;;  %v6912_v12 = vperm.slane %v6690_v20, 4 }
 0x91b   :  { %v3349_v44 = vadd.f32 1e-05, %v3333_v59 }
 0x91c   :  { %v3303_v28 = vsel %vm50_vm0, %v3275_v23, 0.0  ;;  %v6883_v40 = vadd.f32 %v4497_v36, %v3166_v37  ;;  %v4499_v37 = vld [vmem:[%s7184_s0 + $0x78] sm:$0xff] }
 0x91d   :  { %3304 = vadd.xlane.f32.xlu2 %v3303_v28  ;;  %4419 = vrsqrt.f32 %v3349_v44  ;;  %vm3371_vm7 = vweird.f32 %v3349_v44 }
 0x91e   :  { %v3228_v11 = vsel %vm50_vm0, %v6883_v40, 0.0 }
 0x920   :  { %v3212_v62 = vpop.xlane.xlu2 %3211  ;;  %v3290_v57 = vpop.xlane.xlu0 %3289 }
 0x921   :  { %v3244_v48 = vmul.f32 %v3212_v62, %v7412_v61  ;;  %v3334_v26 = vmul.f32 %v3290_v57, %v7412_v61 }
 0x923   :  { %v4420_v55 = vpop.eup %4419  ;;  %v6888_v7 = vsub.f32 %v6787_v13, %v3244_v48  ;;  %v3350_v45 = vadd.f32 1e-05, %v3334_v26 }
 0x924   :  { %v3366_v6 = vmul.f32 %v4420_v55, %v3349_v44  ;;  %vm3372_vm6 = vweird.f32 %v4420_v55 }
 0x925   :  { %3229 = vadd.xlane.f32.xlu2 %v3228_v11  ;;  %4421 = vrsqrt.f32 %v3350_v45  ;;  %v3276_v58 = vmul.f32 %v6888_v7, %v6888_v7  ;;  %vm3373_vm8 = vmor %vm3371_vm7, %vm3372_vm6  ;;  %vm3381_vm10 = vweird.f32 %v3350_v45 }
 0x926   :  { %v3367_v2 = vmul.f32 %v4420_v55, %v3366_v6 }
 0x927   :  { %v3306_v42 = vsel %vm50_vm0, %v3276_v58, 0.0 }
 0x928   :  { %v3368_v34 = vmul.f32 0.5, %v3367_v2  ;;  %v3215_v14 = vpop.xlane.xlu2 %3214  ;;  %3307 = vadd.xlane.f32.xlu0 %v3306_v42 }
 0x929   :  { %v3245_v53 = vmul.f32 %v3215_v14, %v7412_v61 }
 0x92a   :  { %v3168_v10 = vpop.f32.mrf.mxu3  ;;  %v3369_v46 = vsub.f32 1.5, %v3368_v34 }
 0x92b   :  { %v3169_v29 = vadd.f32 %v3168_v10, %v6693_v63  ;;  %v4422_v16 = vpop.eup %4421  ;;  %v6898_v49 = vsub.f32 %v6801_v60, %v3245_v53 }
 0x92c   :  { %v3370_v33 = vmul.f32 %v4420_v55, %v3369_v46  ;;  %v3376_v8 = vmul.f32 %v4422_v16, %v3350_v45  ;;  %vm3382_vm9 = vweird.f32 %v4422_v16 }
 0x92d   :  { %v6903_v22 = vadd.f32 %v4498_v52, %v3169_v29  ;;  %v3277_v18 = vmul.f32 %v6898_v49, %v6898_v49  ;;  %vm3383_vm11 = vmor %vm3381_vm10, %vm3382_vm9 }
 0x92e   :  { %v3377_v43 = vmul.f32 %v4422_v16, %v3376_v8  ;;  %v3374_v4 = vsel %vm3373_vm8, %v4420_v55, %v3370_v33 }
 0x92f   :  { %v3231_v19 = vsel %vm50_vm0, %v6903_v22, 0.0  ;;  %v3309_v38 = vsel %vm50_vm0, %v3277_v18, 0.0  ;;  %v3525_v23 = vmul.f32 %v3374_v4, %v6771_v41 }
 0x930   :  { %3232 = vadd.xlane.f32.xlu2 %v3231_v19  ;;  %v3378_v50 = vmul.f32 0.5, %v3377_v43  ;;  %3310 = vadd.xlane.f32.xlu0 %v3309_v38 }
 0x931   :  { %v3542_v62 = vmul.f32 %v6912_v12, %v3525_v23 }
 0x932   :  { %v3170_v56 = vpop.f32.mrf.mxu3  ;;  %v3379_v25 = vsub.f32 1.5, %v3378_v50 }
 0x933   :  { %v3171_v59 = vadd.f32 %v3170_v56, %v6693_v63  ;;  %v6923_v63 = vperm.slane %v6690_v20, 5 }
 0x934   :  { %v3380_v44 = vmul.f32 %v4422_v16, %v3379_v25 }
 0x935   :  { %v6918_v28 = vadd.f32 %v4499_v37, %v3171_v59  ;;  %v3559_v48 = vadd.f32 %v6923_v63, %v3542_v62 }
 0x936   :  { %v3384_v30 = vsel %vm3383_vm11, %v4422_v16, %v3380_v44 }
 0x937   :  { %v3234_v36 = vsel %vm50_vm0, %v6918_v28, 0.0  ;;  %v3526_v41 = vmul.f32 %v3384_v30, %v6790_v47 }
 0x938   :  { %3235 = vadd.xlane.f32.xlu0 %v3234_v36 }
 0x939   :  { %v3543_v57 = vmul.f32 %v6912_v12, %v3526_v41 }
 0x93b   :  { %v3560_v26 = vadd.f32 %v6923_v63, %v3543_v57 }
 0x93d   :  { %v3575_v55 = vpack.c.bf16 %v3560_v26, %v3559_v48 }
 0x93f   :  { %4087 = vmatmul.msk.bf16.vlgmr.msra.gmra.mxu0 %vm50_vm0, %v3575_v55 }
 0x94f   :  { %v3293_v45 = vpop.xlane.xlu0 %3292 }
 0x950   :  { %v3335_v11 = vmul.f32 %v3293_v45, %v7412_v61 }
 0x952   :  { %v3351_v6 = vadd.f32 1e-05, %v3335_v11 }
 0x954   :  { %4423 = vrsqrt.f32 %v3351_v6  ;;  %vm3391_vm13 = vweird.f32 %v3351_v6 }
 0x957   :  { %v3296_v58 = vpop.xlane.xlu1 %3295  ;;  %v3218_v2 = vpop.xlane.xlu0 %3217 }
 0x958   :  { %v3336_v42 = vmul.f32 %v3296_v58, %v7412_v61  ;;  %v3246_v47 = vmul.f32 %v3218_v2, %v7412_v61 }
 0x95a   :  { %v4424_v34 = vpop.eup %4423  ;;  %v3352_v14 = vadd.f32 1e-05, %v3336_v42  ;;  %v6935_v53 = vsub.f32 %v6820_v21, %v3246_v47 }
 0x95b   :  { %v3386_v10 = vmul.f32 %v4424_v34, %v3351_v6  ;;  %vm3392_vm12 = vweird.f32 %v4424_v34 }
 0x95c   :  { %4425 = vrsqrt.f32 %v3352_v14  ;;  %v3278_v46 = vmul.f32 %v6935_v53, %v6935_v53  ;;  %vm3393_vm14 = vmor %vm3391_vm13, %vm3392_vm12  ;;  %vm3401_vm1 = vweird.f32 %v3352_v14 }
 0x95d   :  { %v3387_v29 = vmul.f32 %v4424_v34, %v3386_v10 }
 0x95e   :  { %v3312_v16 = vsel %vm50_vm0, %v3278_v46, 0.0 }
 0x95f   :  { %v3388_v33 = vmul.f32 0.5, %v3387_v29  ;;  %3313 = vadd.xlane.f32.xlu1 %v3312_v16  ;;  %v3221_v8 = vpop.xlane.xlu0 %3220  ;;  %v4120_v16 = vld [vmem:[%s7192_s4 + $0x8] sm:$0xff] }
 0x960   :  { %v3247_v52 = vmul.f32 %v3221_v8, %v7412_v61  ;;  %3872 = vmatpush.bf16.msra.mxu1 %v4120_v16 }
 0x961   :  { %v3389_v18 = vsub.f32 1.5, %v3388_v33 }
 0x962   :  { %v4426_v43 = vpop.eup %4425  ;;  %v6942_v19 = vsub.f32 %v6834_v39, %v3247_v52 }
 0x963   :  { %v3390_v38 = vmul.f32 %v4424_v34, %v3389_v18  ;;  %v3396_v4 = vmul.f32 %v4426_v43, %v3352_v14  ;;  %vm3402_vm15 = vweird.f32 %v4426_v43 }
 0x964   :  { %v3279_v50 = vmul.f32 %v6942_v19, %v6942_v19  ;;  %vm3403_vm2 = vmor %vm3401_vm1, %vm3402_vm15 }
 0x965   :  { %v3397_v56 = vmul.f32 %v4426_v43, %v3396_v4  ;;  %v3394_v59 = vsel %vm3393_vm14, %v4424_v34, %v3390_v38 }
 0x966   :  { %v3315_v25 = vsel %vm50_vm0, %v3279_v50, 0.0  ;;  %v3527_v37 = vmul.f32 %v3394_v59, %v6810_v15 }
 0x967   :  { %v3398_v23 = vmul.f32 0.5, %v3397_v56  ;;  %3316 = vadd.xlane.f32.xlu1 %v3315_v25 }
 0x968   :  { %v3544_v41 = vmul.f32 %v6912_v12, %v3527_v37 }
 0x969   :  { %v3399_v44 = vsub.f32 1.5, %v3398_v23 }
 0x96a   :  { %v3561_v48 = vadd.f32 %v6923_v63, %v3544_v41 }
 0x96b   :  { %v3400_v30 = vmul.f32 %v4426_v43, %v3399_v44 }
 0x96d   :  { %v3404_v36 = vsel %vm3403_vm2, %v4426_v43, %v3400_v30 }
 0x96e   :  { %v3528_v62 = vmul.f32 %v3404_v36, %v6823_v5 }
 0x970   :  { %v3545_v57 = vmul.f32 %v6912_v12, %v3528_v62 }
 0x972   :  { %v3562_v26 = vadd.f32 %v6923_v63, %v3545_v57 }
 0x974   :  { %v3576_v55 = vpack.c.bf16 %v3562_v26, %v3561_v48 }
 0x976   :  { %4088 = vmatmul.msk.bf16.gmra.mxu0 %vm50_vm0, %v3576_v55 }
 0x977   :  { %v3299_v45 = vpop.xlane.xlu1 %3298 }
 0x978   :  { %v3337_v15 = vmul.f32 %v3299_v45, %v7412_v61 }
 0x97a   :  { %v3353_v11 = vadd.f32 1e-05, %v3337_v15 }
 0x97c   :  { %4427 = vrsqrt.f32 %v3353_v11  ;;  %vm3411_vm4 = vweird.f32 %v3353_v11 }
 0x97f   :  { %v3302_v6 = vpop.xlane.xlu2 %3301  ;;  %v3224_v58 = vpop.xlane.xlu1 %3223 }
 0x980   :  { %v3338_v5 = vmul.f32 %v3302_v6, %v7412_v61  ;;  %v3248_v2 = vmul.f32 %v3224_v58, %v7412_v61 }
 0x982   :  { %v4428_v42 = vpop.eup %4427  ;;  %v3354_v47 = vadd.f32 1e-05, %v3338_v5  ;;  %v6958_v34 = vsub.f32 %v6850_v35, %v3248_v2 }
 0x983   :  { %v3406_v14 = vmul.f32 %v4428_v42, %v3353_v11  ;;  %vm3412_vm3 = vweird.f32 %v4428_v42 }
 0x984   :  { %4429 = vrsqrt.f32 %v3354_v47  ;;  %v3280_v10 = vmul.f32 %v6958_v34, %v6958_v34  ;;  %vm3413_vm5 = vmor %vm3411_vm4, %vm3412_vm3  ;;  %vm3421_vm7 = vweird.f32 %v3354_v47 }
 0x985   :  { %v3407_v46 = vmul.f32 %v4428_v42, %v3406_v14 }
 0x986   :  { %v3318_v29 = vsel %vm50_vm0, %v3280_v10, 0.0 }
 0x987   :  { %v3408_v33 = vmul.f32 0.5, %v3407_v46  ;;  %3319 = vadd.xlane.f32.xlu2 %v3318_v29 }
 0x989   :  { %v3409_v8 = vsub.f32 1.5, %v3408_v33 }
 0x98a   :  { %v4430_v52 = vpop.eup %4429  ;;  %v3227_v18 = vpop.xlane.xlu1 %3226 }
 0x98b   :  { %v3410_v43 = vmul.f32 %v4428_v42, %v3409_v8  ;;  %v3416_v38 = vmul.f32 %v4430_v52, %v3354_v47  ;;  %v3249_v4 = vmul.f32 %v3227_v18, %v7412_v61  ;;  %vm3422_vm6 = vweird.f32 %v4430_v52 }
 0x98c   :  { %vm3423_vm8 = vmor %vm3421_vm7, %vm3422_vm6 }
 0x98d   :  { %v3417_v50 = vmul.f32 %v4430_v52, %v3416_v38  ;;  %v6968_v56 = vsub.f32 %v6864_v51, %v3249_v4  ;;  %v3414_v25 = vsel %vm3413_vm5, %v4428_v42, %v3410_v43 }
 0x98e   :  { %v3529_v62 = vmul.f32 %v3414_v25, %v6840_v27 }
 0x98f   :  { %v3418_v59 = vmul.f32 0.5, %v3417_v50  ;;  %v3281_v44 = vmul.f32 %v6968_v56, %v6968_v56 }
 0x990   :  { %v3305_v23 = vpop.xlane.xlu2 %3304  ;;  %v3546_v55 = vmul.f32 %v6912_v12, %v3529_v62 }
 0x991   :  { %v3339_v37 = vmul.f32 %v3305_v23, %v7412_v61  ;;  %v3419_v30 = vsub.f32 1.5, %v3418_v59  ;;  %v3321_v36 = vsel %vm50_vm0, %v3281_v44, 0.0 }
 0x992   :  { %3322 = vadd.xlane.f32.xlu0 %v3321_v36  ;;  %v3563_v27 = vadd.f32 %v6923_v63, %v3546_v55 }
 0x993   :  { %v3355_v41 = vadd.f32 1e-05, %v3339_v37  ;;  %v3420_v57 = vmul.f32 %v4430_v52, %v3419_v30 }
 0x995   :  { %4431 = vrsqrt.f32 %v3355_v41  ;;  %v3424_v48 = vsel %vm3423_vm8, %v4430_v52, %v3420_v57  ;;  %vm3431_vm10 = vweird.f32 %v3355_v41 }
 0x996   :  { %v3530_v26 = vmul.f32 %v3424_v48, %v6853_v24 }
 0x998   :  { %v3230_v45 = vpop.xlane.xlu2 %3229  ;;  %v3547_v11 = vmul.f32 %v6912_v12, %v3530_v26 }
 0x999   :  { %v3250_v15 = vmul.f32 %v3230_v45, %v7412_v61 }
 0x99a   :  { %v3564_v5 = vadd.f32 %v6923_v63, %v3547_v11 }
 0x99b   :  { %v4432_v6 = vpop.eup %4431  ;;  %v6980_v58 = vsub.f32 %v6883_v40, %v3250_v15  ;;  %v3308_v42 = vpop.xlane.xlu0 %3307 }
 0x99c   :  { %v3426_v2 = vmul.f32 %v4432_v6, %v3355_v41  ;;  %v3340_v47 = vmul.f32 %v3308_v42, %v7412_v61  ;;  %v3577_v24 = vpack.c.bf16 %v3564_v5, %v3563_v27  ;;  %vm3432_vm9 = vweird.f32 %v4432_v6 }
 0x99d   :  { %v3282_v14 = vmul.f32 %v6980_v58, %v6980_v58  ;;  %vm3433_vm11 = vmor %vm3431_vm10, %vm3432_vm9 }
 0x99e   :  { %v3427_v10 = vmul.f32 %v4432_v6, %v3426_v2  ;;  %v3356_v46 = vadd.f32 1e-05, %v3340_v47  ;;  %4089 = vmatmul.msk.bf16.gmra.mxu0 %vm50_vm0, %v3577_v24  ;;  %v7010_v2 = vperm.slane %v6690_v20, 6 }
 0x99f   :  { %v3324_v29 = vsel %vm50_vm0, %v3282_v14, 0.0 }
 0x9a0   :  { %v3428_v16 = vmul.f32 0.5, %v3427_v10  ;;  %3325 = vadd.xlane.f32.xlu1 %v3324_v29  ;;  %4433 = vrsqrt.f32 %v3356_v46  ;;  %vm3441_vm13 = vweird.f32 %v3356_v46 }
 0x9a2   :  { %v3429_v8 = vsub.f32 1.5, %v3428_v16 }
 0x9a3   :  { %v3233_v33 = vpop.xlane.xlu2 %3232  ;;  %v3311_v18 = vpop.xlane.xlu0 %3310 }
 0x9a4   :  { %v3251_v52 = vmul.f32 %v3233_v33, %v7412_v61  ;;  %v3430_v4 = vmul.f32 %v4432_v6, %v3429_v8  ;;  %v3341_v47 = vmul.f32 %v3311_v18, %v7412_v61 }
 0x9a6   :  { %v6991_v43 = vsub.f32 %v6903_v22, %v3251_v52  ;;  %v4434_v38 = vpop.eup %4433  ;;  %v3434_v44 = vsel %vm3433_vm11, %v4432_v6, %v3430_v4  ;;  %v3357_v10 = vadd.f32 1e-05, %v3341_v47 }
 0x9a7   :  { %v3436_v50 = vmul.f32 %v4434_v38, %v3356_v46  ;;  %vm3442_vm12 = vweird.f32 %v4434_v38  ;;  %v3531_v57 = vmul.f32 %v3434_v44, %v6870_v54 }
 0x9a8   :  { %v3283_v25 = vmul.f32 %v6991_v43, %v6991_v43  ;;  %vm3443_vm14 = vmor %vm3441_vm13, %vm3442_vm12  ;;  %4435 = vrsqrt.f32 %v3357_v10  ;;  %vm3451_vm1 = vweird.f32 %v3357_v10 }
 0x9a9   :  { %v3437_v59 = vmul.f32 %v4434_v38, %v3436_v50  ;;  %v3548_v11 = vmul.f32 %v6912_v12, %v3531_v57 }
 0x9aa   :  { %v3327_v23 = vsel %vm50_vm0, %v3283_v25, 0.0 }
 0x9ab   :  { %3328 = vadd.xlane.f32.xlu2 %v3327_v23  ;;  %v3438_v37 = vmul.f32 0.5, %v3437_v59  ;;  %v3236_v30 = vpop.xlane.xlu0 %3235  ;;  %v3565_v54 = vadd.f32 %v6923_v63, %v3548_v11 }
 0x9ac   :  { %v3252_v36 = vmul.f32 %v3236_v30, %v7412_v61 }
 0x9ad   :  { %v3439_v62 = vsub.f32 1.5, %v3438_v37 }
 0x9ae   :  { %v6999_v48 = vsub.f32 %v6918_v28, %v3252_v36  ;;  %v4436_v4 = vpop.eup %4435 }
 0x9af   :  { %v3440_v26 = vmul.f32 %v4434_v38, %v3439_v62  ;;  %v3446_v59 = vmul.f32 %v4436_v4, %v3357_v10  ;;  %vm3452_vm15 = vweird.f32 %v4436_v4 }
 0x9b0   :  { %v3284_v41 = vmul.f32 %v6999_v48, %v6999_v48  ;;  %vm3453_vm2 = vmor %vm3451_vm1, %vm3452_vm15 }
 0x9b1   :  { %v3444_v55 = vsel %vm3443_vm14, %v4434_v38, %v3440_v26  ;;  %v3447_v23 = vmul.f32 %v4436_v4, %v3446_v59 }
 0x9b2   :  { %v3532_v45 = vmul.f32 %v3444_v55, %v6888_v7  ;;  %v3330_v15 = vsel %vm50_vm0, %v3284_v41, 0.0  ;;  %v4119_v7 = vld [vmem:[%s7192_s4] sm:$0xff] }
 0x9b3   :  { %3331 = vadd.xlane.f32.xlu0 %v3330_v15  ;;  %3873 = vmatpush.bf16.msra.mxu1 %v4119_v7  ;;  %v3448_v62 = vmul.f32 0.5, %v3447_v23 }
 0x9b4   :  { %v3549_v6 = vmul.f32 %v6912_v12, %v3532_v45 }
 0x9b5   :  { %v3449_v15 = vsub.f32 1.5, %v3448_v62 }
 0x9b6   :  { %v3566_v27 = vadd.f32 %v6923_v63, %v3549_v6 }
 0x9b8   :  { %v3578_v5 = vpack.c.bf16 %v3566_v27, %v3565_v54 }
 0x9ba   :  { %4090 = vmatmul.msk.bf16.gmra.mxu0 %vm50_vm0, %v3578_v5  ;;  %v3450_v5 = vmul.f32 %v4436_v4, %v3449_v15 }
 0x9bc   :  { %v3633_v42 = vpop.f32.mrf.mxu0 }
 0x9bd   :  { %v3634_v24 = vadd.f32 %v3633_v42, %v7010_v2 }
 0x9bf   :  { %v3689_v14 = vmul.f32 0.044715, %v3634_v24  ;;  %v3673_v41 = vmul.f32 0.5, %v3634_v24 }
 0x9c1   :  { %v3705_v46 = vmul.f32 %v3689_v14, %v3634_v24  ;;  %v3454_v14 = vsel %vm3453_vm2, %v4436_v4, %v3450_v5 }
 0x9c3   :  { %v3721_v29 = vmul.f32 %v3705_v46, %v3634_v24 }
 0x9c4   :  { %v3635_v16 = vpop.f32.mrf.mxu0 }
 0x9c5   :  { %v3737_v20 = vadd.f32 %v3721_v29, %v3634_v24  ;;  %v3636_v33 = vadd.f32 %v3635_v16, %v7010_v2  ;;  %v3533_v16 = vmul.f32 %v3454_v14, %v6898_v49 }
 0x9c7   :  { %v3690_v8 = vmul.f32 0.044715, %v3636_v33  ;;  %v3753_v52 = vmul.f32 0.7978846, %v3737_v20  ;;  %v3674_v55 = vmul.f32 0.5, %v3636_v33  ;;  %v3550_v10 = vmul.f32 %v6912_v12, %v3533_v16 }
 0x9c9   :  { %v3706_v38 = vmul.f32 %v3690_v8, %v3636_v33  ;;  %4437 = vtanh.f32 %v3753_v52  ;;  %v3567_v4 = vadd.f32 %v6923_v63, %v3550_v10 }
 0x9cb   :  { %v3722_v50 = vmul.f32 %v3706_v38, %v3636_v33 }
 0x9cd   :  { %v3738_v25 = vadd.f32 %v3722_v50, %v3636_v33 }
 0x9cf   :  { %v3754_v18 = vmul.f32 0.7978846, %v3738_v25  ;;  %v4438_v37 = vpop.eup %4437 }
 0x9d0   :  { %v3785_v57 = vadd.f32 1.0, %v4438_v37 }
 0x9d1   :  { %4439 = vtanh.f32 %v3754_v18 }
 0x9d2   :  { %v3314_v44 = vpop.xlane.xlu1 %3313  ;;  %v3801_v11 = vmul.f32 %v3785_v57, %v3673_v41 }
 0x9d3   :  { %v3342_v30 = vmul.f32 %v3314_v44, %v7412_v61 }
 0x9d5   :  { %v3358_v36 = vadd.f32 1e-05, %v3342_v30 }
 0x9d7   :  { %v4440_v26 = vpop.eup %4439  ;;  %4441 = vrsqrt.f32 %v3358_v36  ;;  %vm3461_vm4 = vweird.f32 %v3358_v36 }
 0x9d8   :  { %v3786_v45 = vadd.f32 1.0, %v4440_v26 }
 0x9da   :  { %v3802_v6 = vmul.f32 %v3786_v45, %v3674_v55  ;;  %v3317_v47 = vpop.xlane.xlu1 %3316 }
 0x9db   :  { %v3343_v24 = vmul.f32 %v3317_v47, %v7412_v61 }
 0x9dc   :  { %v3817_v54 = vpack.c.bf16 %v3802_v6, %v3801_v11 }
 0x9dd   :  { %v4442_v27 = vpop.eup %4441  ;;  %v3359_v8 = vadd.f32 1e-05, %v3343_v24 }
 0x9de   :  { %v3456_v7 = vmul.f32 %v4442_v27, %v3358_v36  ;;  %4103 = vmatmul.msk.bf16.vlgmr.msra.gmra.mxu1 %vm50_vm0, %v3817_v54  ;;  %vm3462_vm3 = vweird.f32 %v4442_v27 }
 0x9df   :  { %vm3463_vm5 = vmor %vm3461_vm4, %vm3462_vm3  ;;  %4443 = vrsqrt.f32 %v3359_v8  ;;  %vm3471_vm7 = vweird.f32 %v3359_v8 }
 0x9e0   :  { %v3457_v42 = vmul.f32 %v4442_v27, %v3456_v7 }
 0x9e2   :  { %v3458_v46 = vmul.f32 0.5, %v3457_v42 }
 0x9e4   :  { %v3459_v29 = vsub.f32 1.5, %v3458_v46 }
 0x9e5   :  { %v4444_v49 = vpop.eup %4443 }
 0x9e6   :  { %v3460_v20 = vmul.f32 %v4442_v27, %v3459_v29  ;;  %v3466_v23 = vmul.f32 %v4444_v49, %v3359_v8  ;;  %vm3472_vm6 = vweird.f32 %v4444_v49 }
 0x9e7   :  { %vm3473_vm8 = vmor %vm3471_vm7, %vm3472_vm6 }
 0x9e8   :  { %v3464_v33 = vsel %vm3463_vm5, %v4442_v27, %v3460_v20 }
 0x9e9   :  { %v3534_v52 = vmul.f32 %v3464_v33, %v6935_v53  ;;  %v3467_v53 = vmul.f32 %v4444_v49, %v3466_v23 }
 0x9eb   :  { %v3551_v38 = vmul.f32 %v6912_v12, %v3534_v52  ;;  %v3468_v55 = vmul.f32 0.5, %v3467_v53 }
 0x9ed   :  { %v3568_v50 = vadd.f32 %v6923_v63, %v3551_v38  ;;  %v3469_v54 = vsub.f32 1.5, %v3468_v55 }
 0x9ef   :  { %v3579_v25 = vpack.c.bf16 %v3568_v50, %v3567_v4  ;;  %v3470_v42 = vmul.f32 %v4444_v49, %v3469_v54 }
 0x9f1   :  { %4091 = vmatmul.msk.bf16.gmra.mxu0 %vm50_vm0, %v3579_v25  ;;  %v3474_v20 = vsel %vm3473_vm8, %v4444_v49, %v3470_v42 }
 0x9f2   :  { %v3535_v10 = vmul.f32 %v3474_v20, %v6942_v19 }
 0x9f3   :  { %v3638_v59 = vpop.f32.mrf.mxu0 }
 0x9f4   :  { %v3639_v18 = vadd.f32 %v3638_v59, %v7010_v2  ;;  %v3552_v53 = vmul.f32 %v6912_v12, %v3535_v10 }
 0x9f6   :  { %v3691_v44 = vmul.f32 0.044715, %v3639_v18  ;;  %v3675_v59 = vmul.f32 0.5, %v3639_v18 }
 0x9f8   :  { %v3707_v37 = vmul.f32 %v3691_v44, %v3639_v18 }
 0x9fa   :  { %v3723_v30 = vmul.f32 %v3707_v37, %v3639_v18  ;;  %v3320_v36 = vpop.xlane.xlu2 %3319 }
 0x9fb   :  { %v3344_v62 = vmul.f32 %v3320_v36, %v7412_v61  ;;  %v3640_v57 = vpop.f32.mrf.mxu0 }
 0x9fc   :  { %v3739_v26 = vadd.f32 %v3723_v30, %v3639_v18  ;;  %v3641_v41 = vadd.f32 %v3640_v57, %v7010_v2  ;;  %v3569_v18 = vadd.f32 %v6923_v63, %v3552_v53 }
 0x9fd   :  { %v3360_v45 = vadd.f32 1e-05, %v3344_v62 }
 0x9fe   :  { %v3692_v15 = vmul.f32 0.044715, %v3641_v41  ;;  %v3755_v11 = vmul.f32 0.7978846, %v3739_v26  ;;  %v3676_v23 = vmul.f32 0.5, %v3641_v41 }
 0x9ff   :  { %4445 = vrsqrt.f32 %v3360_v45  ;;  %vm3481_vm10 = vweird.f32 %v3360_v45 }
 0xa00   :  { %v3708_v6 = vmul.f32 %v3692_v15, %v3641_v41  ;;  %4447 = vtanh.f32 %v3755_v11 }
 0xa02   :  { %v3724_v27 = vmul.f32 %v3708_v6, %v3641_v41 }
 0xa04   :  { %v3740_v5 = vadd.f32 %v3724_v27, %v3641_v41 }
 0xa05   :  { %v4446_v7 = vpop.eup %4445  ;;  %v3323_v47 = vpop.xlane.xlu0 %3322 }
 0xa06   :  { %v3476_v14 = vmul.f32 %v4446_v7, %v3360_v45  ;;  %v3756_v46 = vmul.f32 0.7978846, %v3740_v5  ;;  %v3345_v29 = vmul.f32 %v3323_v47, %v7412_v61  ;;  %v4448_v33 = vpop.eup %4447  ;;  %vm3482_vm9 = vweird.f32 %v4446_v7 }
 0xa07   :  { %v3787_v4 = vadd.f32 1.0, %v4448_v33  ;;  %vm3483_vm11 = vmor %vm3481_vm10, %vm3482_vm9 }
 0xa08   :  { %v3477_v24 = vmul.f32 %v4446_v7, %v3476_v14  ;;  %v3361_v16 = vadd.f32 1e-05, %v3345_v29  ;;  %4449 = vtanh.f32 %v3756_v46 }
 0xa09   :  { %v3803_v36 = vmul.f32 %v3787_v4, %v3675_v59 }
 0xa0a   :  { %v3478_v52 = vmul.f32 0.5, %v3477_v24  ;;  %4451 = vrsqrt.f32 %v3361_v16  ;;  %vm3491_vm13 = vweird.f32 %v3361_v16 }
 0xa0c   :  { %v3479_v38 = vsub.f32 1.5, %v3478_v52 }
 0xa0e   :  { %v4450_v50 = vpop.eup %4449  ;;  %v3480_v25 = vmul.f32 %v4446_v7, %v3479_v38 }
 0xa0f   :  { %v3788_v8 = vadd.f32 1.0, %v4450_v50 }
 0xa10   :  { %v4452_v44 = vpop.eup %4451  ;;  %v3484_v37 = vsel %vm3483_vm11, %v4446_v7, %v3480_v25 }
 0xa11   :  { %v3536_v49 = vmul.f32 %v3484_v37, %v6958_v34  ;;  %v3486_v30 = vmul.f32 %v4452_v44, %v3361_v16  ;;  %v3804_v62 = vmul.f32 %v3788_v8, %v3676_v23  ;;  %vm3492_vm12 = vweird.f32 %v4452_v44 }
 0xa12   :  { %vm3493_vm14 = vmor %vm3491_vm13, %vm3492_vm12 }
 0xa13   :  { %v3326_v19 = vpop.xlane.xlu1 %3325  ;;  %v3487_v57 = vmul.f32 %v4452_v44, %v3486_v30  ;;  %v3818_v55 = vpack.c.bf16 %v3804_v62, %v3803_v36  ;;  %v3553_v45 = vmul.f32 %v6912_v12, %v3536_v49 }
 0xa14   :  { %v3346_v26 = vmul.f32 %v3326_v19, %v7412_v61 }
 0xa15   :  { %4104 = vmatmul.msk.bf16.gmra.mxu1 %vm50_vm0, %v3818_v55  ;;  %v3570_v41 = vadd.f32 %v6923_v63, %v3553_v45  ;;  %v3488_v11 = vmul.f32 0.5, %v3487_v57 }
 0xa16   :  { %v3362_v15 = vadd.f32 1e-05, %v3346_v26 }
 0xa17   :  { %v3580_v34 = vpack.c.bf16 %v3570_v41, %v3569_v18  ;;  %v3489_v6 = vsub.f32 1.5, %v3488_v11 }
 0xa18   :  { %4453 = vrsqrt.f32 %v3362_v15  ;;  %vm3501_vm1 = vweird.f32 %v3362_v15 }
 0xa19   :  { %4092 = vmatmul.msk.bf16.gmra.mxu0 %vm50_vm0, %v3580_v34  ;;  %v3490_v42 = vmul.f32 %v4452_v44, %v3489_v6 }
 0xa1b   :  { %v3643_v54 = vpop.f32.mrf.mxu0  ;;  %v3494_v33 = vsel %vm3493_vm14, %v4452_v44, %v3490_v42 }
 0xa1c   :  { %v7043_v27 = vadd.f32 %v3643_v54, %v7010_v2  ;;  %v3537_v59 = vmul.f32 %v3494_v33, %v6968_v56 }
 0xa1e   :  { %v4454_v5 = vpop.eup %4453  ;;  %v3329_v7 = vpop.xlane.xlu2 %3328  ;;  %v3693_v14 = vmul.f32 0.044715, %v7043_v27  ;;  %v3554_v57 = vmul.f32 %v6912_v12, %v3537_v59 }
 0xa1f   :  { %v3496_v47 = vmul.f32 %v4454_v5, %v3362_v15  ;;  %v3347_v46 = vmul.f32 %v3329_v7, %v7412_v61  ;;  %vm3502_vm15 = vweird.f32 %v4454_v5 }
 0xa20   :  { %v3709_v24 = vmul.f32 %v3693_v14, %v7043_v27  ;;  %vm3503_vm2 = vmor %vm3501_vm1, %vm3502_vm15 }
 0xa21   :  { %v3497_v29 = vmul.f32 %v4454_v5, %v3496_v47  ;;  %v3363_v20 = vadd.f32 1e-05, %v3347_v46 }
 0xa22   :  { %v3725_v10 = vmul.f32 %v3709_v24, %v7043_v27  ;;  %v3677_v24 = vmul.f32 0.5, %v7043_v27 }
 0xa23   :  { %v3498_v52 = vmul.f32 0.5, %v3497_v29  ;;  %4455 = vrsqrt.f32 %v3363_v20  ;;  %v3645_v38 = vpop.f32.mrf.mxu0  ;;  %vm3511_vm4 = vweird.f32 %v3363_v20 }
 0xa24   :  { %v3741_v50 = vadd.f32 %v3725_v10, %v7043_v27  ;;  %v3646_v25 = vadd.f32 %v3645_v38, %v7010_v2 }
 0xa25   :  { %v3499_v4 = vsub.f32 1.5, %v3498_v52 }
 0xa26   :  { %v3694_v23 = vmul.f32 0.044715, %v3646_v25  ;;  %v3332_v8 = vpop.xlane.xlu0 %3331  ;;  %v3757_v49 = vmul.f32 0.7978846, %v3741_v50  ;;  %v3678_v33 = vmul.f32 0.5, %v3646_v25 }
 0xa27   :  { %v3500_v16 = vmul.f32 %v4454_v5, %v3499_v4  ;;  %v3348_v44 = vmul.f32 %v3332_v8, %v7412_v61  ;;  %v3571_v61 = vadd.f32 %v6923_v63, %v3554_v57 }
 0xa28   :  { %v3710_v30 = vmul.f32 %v3694_v23, %v3646_v25 }
 0xa29   :  { %v4456_v37 = vpop.eup %4455  ;;  %v3504_v53 = vsel %vm3503_vm2, %v4454_v5, %v3500_v16  ;;  %v3364_v19 = vadd.f32 1e-05, %v3348_v44 }
 0xa2a   :  { %v3538_v36 = vmul.f32 %v3504_v53, %v6980_v58  ;;  %v3506_v62 = vmul.f32 %v4456_v37, %v3363_v20  ;;  %v3726_v26 = vmul.f32 %v3710_v30, %v3646_v25  ;;  %vm3512_vm3 = vweird.f32 %v4456_v37 }
 0xa2b   :  { %4457 = vrsqrt.f32 %v3364_v19  ;;  %vm3513_vm5 = vmor %vm3511_vm4, %vm3512_vm3  ;;  %vm3521_vm7 = vweird.f32 %v3364_v19 }
 0xa2c   :  { %v3507_v55 = vmul.f32 %v4456_v37, %v3506_v62  ;;  %v3555_v56 = vmul.f32 %v6912_v12, %v3538_v36  ;;  %v3742_v45 = vadd.f32 %v3726_v26, %v3646_v25  ;;  %4459 = vtanh.f32 %v3757_v49 }
 0xa2e   :  { %v3508_v15 = vmul.f32 0.5, %v3507_v55  ;;  %v3572_v18 = vadd.f32 %v6923_v63, %v3555_v56  ;;  %v3758_v41 = vmul.f32 0.7978846, %v3742_v45 }
 0xa30   :  { %v3509_v11 = vsub.f32 1.5, %v3508_v15  ;;  %v3581_v34 = vpack.c.bf16 %v3572_v18, %v3571_v61  ;;  %4461 = vtanh.f32 %v3758_v41 }
 0xa31   :  { %v4458_v58 = vpop.eup %4457 }
 0xa32   :  { %4093 = vmatmul.msk.bf16.gmra.mxu0 %vm50_vm0, %v3581_v34  ;;  %v4460_v6 = vpop.eup %4459  ;;  %v3510_v54 = vmul.f32 %v4456_v37, %v3509_v11  ;;  %v3516_v5 = vmul.f32 %v4458_v58, %v3364_v19  ;;  %vm3522_vm6 = vweird.f32 %v4458_v58 }
 0xa33   :  { %v3789_v42 = vadd.f32 1.0, %v4460_v6  ;;  %vm3523_vm8 = vmor %vm3521_vm7, %vm3522_vm6  ;;  %v4500_v6 = vld [vmem:[%s7186_s8] sm:$0xff] }
 0xa34   :  { %v3517_v7 = vmul.f32 %v4458_v58, %v3516_v5  ;;  %v3514_v14 = vsel %vm3513_vm5, %v4456_v37, %v3510_v54  ;;  %v7073_v54 = vperm.slane %v4500_v6, 7 }
 0xa35   :  { %v3539_v4 = vmul.f32 %v3514_v14, %v6991_v43  ;;  %v3805_v50 = vmul.f32 %v3789_v42, %v3677_v24 }
 0xa36   :  { %v4462_v47 = vpop.eup %4461  ;;  %v3518_v46 = vmul.f32 0.5, %v3517_v7 }
 0xa37   :  { %v3648_v29 = vpop.f32.mrf.mxu0  ;;  %v3790_v52 = vadd.f32 1.0, %v4462_v47  ;;  %v3556_v27 = vmul.f32 %v6912_v12, %v3539_v4 }
 0xa38   :  { %v3519_v10 = vsub.f32 1.5, %v3518_v46  ;;  %v3649_v38 = vadd.f32 %v3648_v29, %v7010_v2 }
 0xa39   :  { %v3806_v59 = vmul.f32 %v3790_v52, %v3678_v33  ;;  %v3573_v36 = vadd.f32 %v6923_v63, %v3556_v27 }
 0xa3a   :  { %v3520_v20 = vmul.f32 %v4458_v58, %v3519_v10  ;;  %v3695_v16 = vmul.f32 0.044715, %v3649_v38  ;;  %v3679_v18 = vmul.f32 0.5, %v3649_v38 }
 0xa3b   :  { %v3819_v23 = vpack.c.bf16 %v3806_v59, %v3805_v50 }
 0xa3c   :  { %v3524_v8 = vsel %vm3523_vm8, %v4458_v58, %v3520_v20  ;;  %v3711_v44 = vmul.f32 %v3695_v16, %v3649_v38 }
 0xa3d   :  { %v3540_v37 = vmul.f32 %v3524_v8, %v6999_v48  ;;  %4105 = vmatmul.msk.bf16.gmra.mxu1 %vm50_vm0, %v3819_v23 }
 0xa3e   :  { %v3727_v25 = vmul.f32 %v3711_v44, %v3649_v38 }
 0xa3f   :  { %v3650_v53 = vpop.f32.mrf.mxu0  ;;  %v3557_v49 = vmul.f32 %v6912_v12, %v3540_v37 }
 0xa40   :  { %v3743_v43 = vadd.f32 %v3727_v25, %v3649_v38  ;;  %v3651_v30 = vadd.f32 %v3650_v53, %v7010_v2 }
 0xa41   :  { %v3574_v62 = vadd.f32 %v6923_v63, %v3557_v49 }
 0xa42   :  { %v3696_v19 = vmul.f32 0.044715, %v3651_v30  ;;  %v3759_v26 = vmul.f32 0.7978846, %v3743_v43  ;;  %v3680_v41 = vmul.f32 0.5, %v3651_v30 }
 0xa43   :  { %v3582_v57 = vpack.c.bf16 %v3574_v62, %v3573_v36 }
 0xa44   :  { %v3712_v55 = vmul.f32 %v3696_v19, %v3651_v30  ;;  %4463 = vtanh.f32 %v3759_v26 }
 0xa45   :  { %4094 = vmatmul.msk.bf16.gmra.mxu0 %vm50_vm0, %v3582_v57 }
 0xa46   :  { %v3728_v48 = vmul.f32 %v3712_v55, %v3651_v30 }
 0xa48   :  { %v3744_v56 = vadd.f32 %v3728_v48, %v3651_v30 }
 0xa4a   :  { %v3760_v45 = vmul.f32 0.7978846, %v3744_v56  ;;  %v4464_v15 = vpop.eup %4463 }
 0xa4b   :  { %v3791_v12 = vadd.f32 1.0, %v4464_v15 }
 0xa4c   :  { %4465 = vtanh.f32 %v3760_v45 }
 0xa4d   :  { %v3807_v34 = vmul.f32 %v3791_v12, %v3679_v18 }
 0xa52   :  { %v4466_v61 = vpop.eup %4465 }
 0xa53   :  { %v3792_v11 = vadd.f32 1.0, %v4466_v61 }
 0xa55   :  { %v3808_v58 = vmul.f32 %v3792_v11, %v3680_v41 }
 0xa57   :  { %v3820_v63 = vpack.c.bf16 %v3808_v58, %v3807_v34 }
 0xa59   :  { %4106 = vmatmul.msk.bf16.gmra.mxu1 %vm50_vm0, %v3820_v63 }
 0xa5b   :  { %v3875_v5 = vpop.f32.mrf.mxu1 }
 0xa5c   :  { %v3876_v7 = vadd.f32 %v3875_v5, %v7073_v54 }
 0xa5e   :  { %v3915_v42 = vadd.f32 %v3876_v7, %v6701_v0 }
 0xa60   :  { %3931 = vst.msk [vmem:[%s7193_s9] sm:$0xff] %vm50_vm0, %v3915_v42 }
 0xa63   :  { %v3877_v47 = vpop.f32.mrf.mxu1 }
 0xa64   :  { %v3878_v14 = vadd.f32 %v3877_v47, %v7073_v54 }
 0xa66   :  { %v3916_v46 = vadd.f32 %v3878_v14, %v6710_v17 }
 0xa68   :  { %3932 = vst.msk [vmem:[%s7193_s9 + $0x8] sm:$0xff] %vm50_vm0, %v3916_v46 }
 0xa6e   :  { %v3653_v29 = vpop.f32.mrf.mxu0 }
 0xa6f   :  { %v3654_v24 = vadd.f32 %v3653_v29, %v7010_v2 }
 0xa71   :  { %v3697_v33 = vmul.f32 0.044715, %v3654_v24  ;;  %v3681_v27 = vmul.f32 0.5, %v3654_v24 }
 0xa73   :  { %v3713_v0 = vmul.f32 %v3697_v33, %v3654_v24 }
 0xa75   :  { %v3729_v52 = vmul.f32 %v3713_v0, %v3654_v24 }
 0xa76   :  { %v3655_v10 = vpop.f32.mrf.mxu0 }
 0xa77   :  { %v3745_v38 = vadd.f32 %v3729_v52, %v3654_v24  ;;  %v3656_v4 = vadd.f32 %v3655_v10, %v7010_v2 }
 0xa79   :  { %v3698_v50 = vmul.f32 0.044715, %v3656_v4  ;;  %v3761_v59 = vmul.f32 0.7978846, %v3745_v38  ;;  %v3682_v25 = vmul.f32 0.5, %v3656_v4 }
 0xa7b   :  { %v3714_v20 = vmul.f32 %v3698_v50, %v3656_v4  ;;  %4467 = vtanh.f32 %v3761_v59 }
 0xa7d   :  { %v3730_v16 = vmul.f32 %v3714_v20, %v3656_v4 }
 0xa7f   :  { %v3746_v17 = vadd.f32 %v3730_v16, %v3656_v4 }
 0xa81   :  { %v3762_v23 = vmul.f32 0.7978846, %v3746_v17  ;;  %v4468_v8 = vpop.eup %4467 }
 0xa82   :  { %v3793_v44 = vadd.f32 1.0, %v4468_v8 }
 0xa83   :  { %4469 = vtanh.f32 %v3762_v23 }
 0xa84   :  { %v3809_v49 = vmul.f32 %v3793_v44, %v3681_v27 }
 0xa89   :  { %v4470_v37 = vpop.eup %4469 }
 0xa8a   :  { %v3794_v53 = vadd.f32 1.0, %v4470_v37 }
 0xa8c   :  { %v3810_v43 = vmul.f32 %v3794_v53, %v3682_v25 }
 0xa8e   :  { %v3821_v30 = vpack.c.bf16 %v3810_v43, %v3809_v49 }
 0xa90   :  { %4107 = vmatmul.msk.bf16.gmra.mxu1 %vm50_vm0, %v3821_v30 }
 0xa92   :  { %v3880_v36 = vpop.f32.mrf.mxu1 }
 0xa93   :  { %v3881_v62 = vadd.f32 %v3880_v36, %v7073_v54 }
 0xa95   :  { %v3917_v19 = vadd.f32 %v3881_v62, %v6725_v32 }
 0xa96   :  { %v3658_v57 = vpop.f32.mrf.mxu0 }
 0xa97   :  { %3933 = vst.msk [vmem:[%s7193_s9 + $0x10] sm:$0xff] %vm50_vm0, %v3917_v19  ;;  %v3659_v26 = vadd.f32 %v3658_v57, %v7010_v2 }
 0xa99   :  { %v3699_v55 = vmul.f32 0.044715, %v3659_v26  ;;  %v3683_v46 = vmul.f32 0.5, %v3659_v26 }
 0xa9a   :  { %v3882_v48 = vpop.f32.mrf.mxu1 }
 0xa9b   :  { %v3715_v56 = vmul.f32 %v3699_v55, %v3659_v26  ;;  %v3883_v45 = vadd.f32 %v3882_v48, %v7073_v54 }
 0xa9d   :  { %v3731_v15 = vmul.f32 %v3715_v56, %v3659_v26  ;;  %v3918_v12 = vadd.f32 %v3883_v45, %v6733_v3 }
 0xa9e   :  { %v3660_v61 = vpop.f32.mrf.mxu0 }
 0xa9f   :  { %v3747_v18 = vadd.f32 %v3731_v15, %v3659_v26  ;;  %3934 = vst.msk [vmem:[%s7193_s9 + $0x18] sm:$0xff] %vm50_vm0, %v3918_v12  ;;  %v3661_v32 = vadd.f32 %v3660_v61, %v7010_v2 }
 0xaa1   :  { %v3700_v41 = vmul.f32 0.044715, %v3661_v32  ;;  %v3763_v11 = vmul.f32 0.7978846, %v3747_v18  ;;  %v3684_v29 = vmul.f32 0.5, %v3661_v32 }
 0xaa3   :  { %v3716_v34 = vmul.f32 %v3700_v41, %v3661_v32  ;;  %4471 = vtanh.f32 %v3763_v11 }
 0xaa5   :  { %v3732_v58 = vmul.f32 %v3716_v34, %v3661_v32 }
 0xaa7   :  { %v3748_v63 = vadd.f32 %v3732_v58, %v3661_v32 }
 0xaa9   :  { %v3764_v6 = vmul.f32 0.7978846, %v3748_v63  ;;  %v4472_v5 = vpop.eup %4471 }
 0xaaa   :  { %v3795_v42 = vadd.f32 1.0, %v4472_v5 }
 0xaab   :  { %4473 = vtanh.f32 %v3764_v6 }
 0xaac   :  { %v3811_v0 = vmul.f32 %v3795_v42, %v3683_v46 }
 0xaaf   :  { %v3663_v7 = vpop.f32.mrf.mxu0 }
 0xab0   :  { %v3664_v3 = vadd.f32 %v3663_v7, %v7010_v2 }
 0xab1   :  { %v4474_v47 = vpop.eup %4473 }
 0xab2   :  { %v3701_v14 = vmul.f32 0.044715, %v3664_v3  ;;  %v3796_v24 = vadd.f32 1.0, %v4474_v47  ;;  %v3685_v56 = vmul.f32 0.5, %v3664_v3 }
 0xab4   :  { %v3717_v33 = vmul.f32 %v3701_v14, %v3664_v3  ;;  %v3812_v52 = vmul.f32 %v3796_v24, %v3684_v29 }
 0xab6   :  { %v3733_v10 = vmul.f32 %v3717_v33, %v3664_v3  ;;  %v3822_v4 = vpack.c.bf16 %v3812_v52, %v3811_v0 }
 0xab7   :  { %v3665_v38 = vpop.f32.mrf.mxu0 }
 0xab8   :  { %v3749_v50 = vadd.f32 %v3733_v10, %v3664_v3  ;;  %v3666_v59 = vadd.f32 %v3665_v38, %v7010_v2  ;;  %4108 = vmatmul.msk.bf16.gmra.mxu1 %vm50_vm0, %v3822_v4 }
 0xaba   :  { %v3702_v20 = vmul.f32 0.044715, %v3666_v59  ;;  %v3885_v16 = vpop.f32.mrf.mxu1  ;;  %v3765_v17 = vmul.f32 0.7978846, %v3749_v50  ;;  %v3686_v45 = vmul.f32 0.5, %v3666_v59 }
 0xabb   :  { %v3886_v8 = vadd.f32 %v3885_v16, %v7073_v54 }
 0xabc   :  { %v3718_v23 = vmul.f32 %v3702_v20, %v3666_v59  ;;  %4475 = vtanh.f32 %v3765_v17 }
 0xabd   :  { %v3919_v37 = vadd.f32 %v3886_v8, %v6742_v31 }
 0xabe   :  { %v3734_v44 = vmul.f32 %v3718_v23, %v3666_v59 }
 0xabf   :  { %3935 = vst.msk [vmem:[%s7193_s9 + $0x20] sm:$0xff] %vm50_vm0, %v3919_v37 }
 0xac0   :  { %v3750_v27 = vadd.f32 %v3734_v44, %v3666_v59 }
 0xac2   :  { %v3766_v25 = vmul.f32 0.7978846, %v3750_v27  ;;  %v3668_v53 = vpop.f32.mrf.mxu0  ;;  %v3887_v49 = vpop.f32.mrf.mxu1 }
 0xac3   :  { %v3669_v43 = vadd.f32 %v3668_v53, %v7010_v2  ;;  %v3888_v30 = vadd.f32 %v3887_v49, %v7073_v54  ;;  %v4476_v36 = vpop.eup %4475 }
 0xac4   :  { %4477 = vtanh.f32 %v3766_v25  ;;  %v3797_v57 = vadd.f32 1.0, %v4476_v36 }
 0xac5   :  { %v3703_v62 = vmul.f32 0.044715, %v3669_v43  ;;  %v3920_v19 = vadd.f32 %v3888_v30, %v6755_v1  ;;  %v3687_v46 = vmul.f32 0.5, %v3669_v43 }
 0xac6   :  { %v3813_v18 = vmul.f32 %v3797_v57, %v3685_v56 }
 0xac7   :  { %v3719_v31 = vmul.f32 %v3703_v62, %v3669_v43  ;;  %3936 = vst.msk [vmem:[%s7193_s9 + $0x28] sm:$0xff] %vm50_vm0, %v3920_v19 }
 0xac9   :  { %v3735_v55 = vmul.f32 %v3719_v31, %v3669_v43 }
 0xaca   :  { %v4478_v26 = vpop.eup %4477  ;;  %v3670_v48 = vpop.f32.mrf.mxu0 }
 0xacb   :  { %v3798_v15 = vadd.f32 1.0, %v4478_v26  ;;  %v3751_v12 = vadd.f32 %v3735_v55, %v3669_v43  ;;  %v3671_v61 = vadd.f32 %v3670_v48, %v7010_v2 }
 0xacd   :  { %v3814_v32 = vmul.f32 %v3798_v15, %v3686_v45  ;;  %v3704_v41 = vmul.f32 0.044715, %v3671_v61  ;;  %v3767_v11 = vmul.f32 0.7978846, %v3751_v12  ;;  %v3688_v29 = vmul.f32 0.5, %v3671_v61 }
 0xacf   :  { %v3823_v1 = vpack.c.bf16 %v3814_v32, %v3813_v18  ;;  %v3720_v34 = vmul.f32 %v3704_v41, %v3671_v61  ;;  %4479 = vtanh.f32 %v3767_v11 }
 0xad1   :  { %4109 = vmatmul.msk.bf16.gmra.mxu1 %vm50_vm0, %v3823_v1  ;;  %v3736_v58 = vmul.f32 %v3720_v34, %v3671_v61 }
 0xad3   :  { %v3752_v63 = vadd.f32 %v3736_v58, %v3671_v61 }
 0xad5   :  { %v3768_v6 = vmul.f32 0.7978846, %v3752_v63  ;;  %v4480_v3 = vpop.eup %4479 }
 0xad6   :  { %v3890_v5 = vpop.f32.mrf.mxu1  ;;  %v3799_v2 = vadd.f32 1.0, %v4480_v3 }
 0xad7   :  { %v3891_v7 = vadd.f32 %v3890_v5, %v7073_v54  ;;  %4481 = vtanh.f32 %v3768_v6 }
 0xad8   :  { %v3815_v0 = vmul.f32 %v3799_v2, %v3687_v46 }
 0xad9   :  { %v3921_v42 = vadd.f32 %v3891_v7, %v6765_v9 }
 0xadb   :  { %3937 = vst.msk [vmem:[%s7193_s9 + $0x30] sm:$0xff] %vm50_vm0, %v3921_v42 }
 0xadd   :  { %v4482_v47 = vpop.eup %4481 }
 0xade   :  { %v3892_v14 = vpop.f32.mrf.mxu1  ;;  %v3800_v24 = vadd.f32 1.0, %v4482_v47 }
 0xadf   :  { %v3893_v33 = vadd.f32 %v3892_v14, %v7073_v54 }
 0xae0   :  { %v3816_v52 = vmul.f32 %v3800_v24, %v3688_v29 }
 0xae1   :  { %v3922_v10 = vadd.f32 %v3893_v33, %v6787_v13 }
 0xae2   :  { %v3824_v38 = vpack.c.bf16 %v3816_v52, %v3815_v0 }
 0xae3   :  { %3938 = vst.msk [vmem:[%s7193_s9 + $0x38] sm:$0xff] %vm50_vm0, %v3922_v10 }
 0xae4   :  { %4110 = vmatmul.msk.bf16.gmra.mxu1 %vm50_vm0, %v3824_v38 }
 0xb0d   :  { %v3895_v9 = vpop.f32.mrf.mxu1 }
 0xb0e   :  { %v3896_v4 = vadd.f32 %v3895_v9, %v7073_v54 }
 0xb10   :  { %v3923_v50 = vadd.f32 %v3896_v4, %v6801_v60 }
 0xb12   :  { %3939 = vst.msk [vmem:[%s7193_s9 + $0x40] sm:$0xff] %vm50_vm0, %v3923_v50 }
 0xb15   :  { %v3897_v59 = vpop.f32.mrf.mxu1 }
 0xb16   :  { %v3898_v13 = vadd.f32 %v3897_v59, %v7073_v54 }
 0xb18   :  { %v3924_v20 = vadd.f32 %v3898_v13, %v6820_v21 }
 0xb1a   :  { %3940 = vst.msk [vmem:[%s7193_s9 + $0x48] sm:$0xff] %vm50_vm0, %v3924_v20 }
 0xb35   :  { %v3900_v16 = vpop.f32.mrf.mxu1 }
 0xb36   :  { %v3901_v17 = vadd.f32 %v3900_v16, %v7073_v54 }
 0xb38   :  { %v3925_v60 = vadd.f32 %v3901_v17, %v6834_v39 }
 0xb3a   :  { %3941 = vst.msk [vmem:[%s7193_s9 + $0x50] sm:$0xff] %vm50_vm0, %v3925_v60 }
 0xb3d   :  { %v3902_v23 = vpop.f32.mrf.mxu1 }
 0xb3e   :  { %v3903_v8 = vadd.f32 %v3902_v23, %v7073_v54 }
 0xb40   :  { %v3926_v21 = vadd.f32 %v3903_v8, %v6850_v35 }
 0xb42   :  { %3942 = vst.msk [vmem:[%s7193_s9 + $0x58] sm:$0xff] %vm50_vm0, %v3926_v21 }
 0xb4e   :  { %v3905_v44 = vpop.f32.mrf.mxu1 }
 0xb4f   :  { %v3906_v37 = vadd.f32 %v3905_v44, %v7073_v54 }
 0xb51   :  { %v3927_v39 = vadd.f32 %v3906_v37, %v6864_v51 }
 0xb53   :  { %3943 = vst.msk [vmem:[%s7193_s9 + $0x60] sm:$0xff] %vm50_vm0, %v3927_v39 }
 0xb56   :  { %v3907_v27 = vpop.f32.mrf.mxu1 }
 0xb57   :  { %v3908_v25 = vadd.f32 %v3907_v27, %v7073_v54 }
 0xb59   :  { %v3928_v35 = vadd.f32 %v3908_v25, %v6883_v40 }
 0xb5b   :  { %3944 = vst.msk [vmem:[%s7193_s9 + $0x68] sm:$0xff] %vm50_vm0, %v3928_v35 }
 0xb61   :  { %v3910_v53 = vpop.f32.mrf.mxu1 }
 0xb62   :  { %v3911_v49 = vadd.f32 %v3910_v53, %v7073_v54 }
 0xb64   :  { %v3929_v51 = vadd.f32 %v3911_v49, %v6903_v22 }
 0xb66   :  { %3945 = vst.msk [vmem:[%s7193_s9 + $0x70] sm:$0xff] %vm50_vm0, %v3929_v51 }
 0xb69   :  { %v3912_v43 = vpop.f32.mrf.mxu1 }
 0xb6a   :  { %v3913_v30 = vadd.f32 %v3912_v43, %v7073_v54 }
 0xb6c   :  { %v3930_v40 = vadd.f32 %v3913_v30, %v6918_v28 }
 0xb6e   :  { %3946 = vst.msk [vmem:[%s7193_s9 + $0x78] sm:$0xff] %vm50_vm0, %v3930_v40 }

</bundles_post_ra>
